<compile_context>
chip_gen: v7x
topology: tpu7x:2x2x1
jax: 0.10.0
libtpu: 0.0.40
codegen_flags: <defaults>
</compile_context>

<pallas_src>
import functools
import math

import jax
import jax.numpy as jnp
from jax.experimental import pallas as pl
from jax.experimental.pallas import tpu as pltpu


PARAM_ORDER = ("ln_g", "ln_b",
               "qw1", "qb1", "qw2", "qb2",
               "kvw1", "kvb1",
               "kw2", "kb2", "vw2", "vb2",
               "rw", "rb")


def _cross_attn_kernel(x_ref, cc_ref,
                       ln_g_ref, ln_b_ref,
                       qw1_ref, qb1_ref, qw2_ref, qb2_ref,
                       kvw1_ref, kvb1_ref,
                       kw2_ref, kb2_ref, vw2_ref, vb2_ref,
                       rw_ref, rb_ref,
                       o_ref, *, heads, matmul_dtype, fuse_residual_proj):
    f32 = jnp.float32
    mm = matmul_dtype

    Bt, Sq, D = x_ref.shape
    _, Sk, Dc = cc_ref.shape
    H = kvw1_ref.shape[1] // 2
    ds = D // heads
    scale = 1.0 / math.sqrt(ds)

    # Flatten (Bt, S, D) -> (Bt*S, D): fills sublanes, amortizes per-step cost.
    x = x_ref[...].reshape(Bt * Sq, D)                      # f32
    cc = cc_ref[...].reshape(Bt * Sk, Dc).astype(mm)        # bf16 cast ONCE

    # --- hoisted parameter broadcasts (each small param read exactly once) ---
    ln_g = ln_g_ref[0]; ln_b = ln_b_ref[0]
    qb1 = qb1_ref[0]; qb2 = qb2_ref[0]
    kvb1 = kvb1_ref[0]
    kb2 = kb2_ref[0]; vb2 = vb2_ref[0]
    rb = rb_ref[0]

    # --- LayerNorm(in_dim), elementwise affine, eps=1e-5 (f32 math) ---
    mu = jnp.mean(x, axis=-1, keepdims=True)
    var = jnp.mean(jnp.square(x - mu), axis=-1, keepdims=True)
    xn = (x - mu) * jax.lax.rsqrt(var + 1e-5) * ln_g + ln_b

    # --- q block: Linear -> SiLU -> Linear (bf16 MXU, f32 accumulation) ---
    hq = jnp.dot(xn.astype(mm), qw1_ref[...], preferred_element_type=f32) + qb1
    hq = hq * jax.nn.sigmoid(hq)
    q = jnp.dot(hq.astype(mm), qw2_ref[...], preferred_element_type=f32) + qb2
    q = q * scale        # fold softmax 1/sqrt(ds) into q (one (Bt*Sq,D) mul)

    # --- k/v blocks: first layers fused into one (Dc, 2H) matmul ---
    hkv = jnp.dot(cc, kvw1_ref[...], preferred_element_type=f32) + kvb1
    hkv = (hkv * jax.nn.sigmoid(hkv)).astype(mm)            # (Bt*Sk, 2H)
    k = jnp.dot(hkv[:, :H], kw2_ref[...], preferred_element_type=f32) + kb2
    v = jnp.dot(hkv[:, H:], vw2_ref[...], preferred_element_type=f32) + vb2

    q_b = q.astype(mm).reshape(Bt, Sq, D)
    k_b = k.astype(mm).reshape(Bt, Sk, D)
    v_b = v.astype(mm).reshape(Bt, Sk, D)

    # --- multi-head attention (no mask); contraction on the LAST dim of both
    # operands (no transpose).  Head outputs are concatenated along lanes at
    # static offsets (multiples of ds), so the residual projection is a single
    # full-contraction (Bt*Sq, D) @ (D, D) matmul. ---
    pv_heads = []
    for h in range(heads):
        sl = slice(h * ds, (h + 1) * ds)
        s = jnp.einsum('bqd,bkd->bqk', q_b[:, :, sl], k_b[:, :, sl],
                       preferred_element_type=f32)          # (Bt, Sq, Sk) f32
        s = s - jnp.max(s, axis=-1, keepdims=True)
        p = jnp.exp(s)
        p = p * pl.reciprocal(jnp.sum(p, axis=-1, keepdims=True), approx=True)
        pv_heads.append(jnp.einsum('bqk,bkd->bqd', p.astype(mm), v_b[:, :, sl],
                                   preferred_element_type=f32))  # (Bt,Sq,ds)

    if fuse_residual_proj:
        attn = jnp.concatenate(pv_heads, axis=-1).reshape(Bt * Sq, D)
        out = jnp.dot(attn.astype(mm), rw_ref[...], preferred_element_type=f32)
    else:
        # fallback: per-head matmul-accumulate against row-slices of rw
        out = jnp.zeros((Bt * Sq, D), f32)
        for h in range(heads):
            sl = slice(h * ds, (h + 1) * ds)
            out = out + jnp.dot(pv_heads[h].reshape(Bt * Sq, ds).astype(mm),
                                rw_ref[sl, :], preferred_element_type=f32)

    # --- ResidualLinearLayer: (+bias) + identity skip -> SiLU ---
    out = out + rb + x
    out = out * jax.nn.sigmoid(out)
    o_ref[...] = out.reshape(Bt, Sq, D).astype(o_ref.dtype)


def _vmem_per_batch_bytes(Sq, Sk, D, Dc, H):
    """Per-batch-element VMEM estimate: DMA slabs + dominant intermediates."""
    f32, bf16 = 4, 2
    b = 0
    b += 2 * f32 * Sq * D                      # x input  (double-buffered DMA)
    b += 2 * f32 * Sk * Dc                     # cross_cond input
    b += 2 * f32 * Sq * D                      # output
    b += (f32 + bf16) * 3 * Sq * D             # xn, q, attn (+ bf16 copies)
    b += (f32 + bf16) * 2 * Sk * D             # k, v
    b += (f32 + bf16) * (Sq * H + 2 * Sk * H)  # hq, hkv
    b += bf16 * Sk * Dc                        # cc bf16
    b += (2 * f32 + bf16) * Sq * Sk            # per-head s / exp(s) / p bf16
    b += f32 * Sq * D                          # pre-store activation
    return b


def cross_attention_block(x, cross_cond, params, *, heads,
                          batch_block=None, matmul_dtype=jnp.bfloat16,
                          single_buffer_weights=True):
    B, Sq, D = x.shape
    Bc, Sk, Dc = cross_cond.shape
    assert Bc == B and D % heads == 0, "in_dim must be divisible by heads"
    H = params["qw1"].shape[1]
    f32 = jnp.float32

    # --- parameter prep: bf16 matmul weights, fused k/v first layer ---
    prm = {
        "ln_g": params["ln_g"].astype(f32),
        "ln_b": params["ln_b"].astype(f32),
        "qw1": params["qw1"].astype(matmul_dtype),
        "qb1": params["qb1"].astype(f32),
        "qw2": params["qw2"].astype(matmul_dtype),
        "qb2": params["qb2"].astype(f32),
        "kvw1": jnp.concatenate([params["kw1"], params["vw1"]],
                                axis=1).astype(matmul_dtype),
        "kvb1": jnp.concatenate([params["kb1"], params["vb1"]],
                                axis=1).astype(f32),
        "kw2": params["kw2"].astype(matmul_dtype),
        "kb2": params["kb2"].astype(f32),
        "vw2": params["vw2"].astype(matmul_dtype),
        "vb2": params["vb2"].astype(f32),
        "rw": params["rw"].astype(matmul_dtype),
        "rb": params["rb"].astype(f32),
    }
    flat = [prm[name] for name in PARAM_ORDER]
    weight_bytes = sum(int(w.size) * w.dtype.itemsize for w in flat)

    # --- generation-aware VMEM budget (v7x: 64 MiB, v5e/v6e: 128 MiB) ---
    try:
        vmem_cap = int(getattr(pltpu.get_tpu_info(), "vmem_capacity_bytes",
                               64 << 20))
    except Exception:
        vmem_cap = 64 << 20
    vmem_limit = int(min(int(0.75 * vmem_cap), 96 << 20))
    budget = int(0.70 * vmem_limit)

    if batch_block is None:
        per_b = _vmem_per_batch_bytes(Sq, Sk, D, Dc, H)
        fixed = weight_bytes * (1 if single_buffer_weights else 2)
        batch_block = 1
        for d in range(1, B + 1):
            if B % d == 0 and fixed + d * per_b <= budget:
                batch_block = d
        # keep >=2 grid steps so the "parallel" batch axis can shard across
        # v7x's 2 TensorCores (megacore); skip if B is too small / prime.
        if B // batch_block < 2:
            cands = [d for d in range(1, B // 2 + 1)
                     if B % d == 0 and fixed + d * per_b <= budget]
            if cands:
                batch_block = max(cands)
        # TODO(synk): if B is prime and per_b is large, Bt degrades to 1;
        # padding B (with masking) would recover the intended tile size.
    Bt = batch_block
    assert B % Bt == 0, "batch_block must divide batch"
    grid = (B // Bt,)

    x_spec = pl.BlockSpec((Bt, Sq, D), lambda b: (b, 0, 0))
    cc_spec = pl.BlockSpec((Bt, Sk, Dc), lambda b: (b, 0, 0))
    out_spec = pl.BlockSpec((Bt, Sq, D), lambda b: (b, 0, 0))

    def build(use_single_buffer, fuse_residual_proj):
        w_specs = []
        for w in flat:
            idx = (lambda _n: (lambda b: (0,) * _n))(w.ndim)
            if use_single_buffer:
                # constant index_map -> never re-fetched; 1 buffer is enough
                w_specs.append(pl.BlockSpec(w.shape, idx,
                                            pipeline_mode=pl.Buffered(1)))
            else:
                w_specs.append(pl.BlockSpec(w.shape, idx))
        return pl.pallas_call(
            functools.partial(_cross_attn_kernel, heads=heads,
                              matmul_dtype=matmul_dtype,
                              fuse_residual_proj=fuse_residual_proj),
            out_shape=jax.ShapeDtypeStruct((B, Sq, D), x.dtype),
            grid_spec=pltpu.PrefetchScalarGridSpec(
                num_scalar_prefetch=0,
                grid=grid,
                in_specs=[x_spec, cc_spec] + w_specs,
                out_specs=out_spec,
            ),
            compiler_params=pltpu.CompilerParams(
                dimension_semantics=("parallel",),
                vmem_limit_bytes=vmem_limit,
            ),
        )

    # Try the fully optimized configuration first; fall back gracefully if the
    # installed Mosaic/Pallas rejects single-buffering or minor-dim concat.
    attempts = []
    if single_buffer_weights and hasattr(pl, "Buffered"):
        attempts.append((True, True))
    attempts += [(False, True), (False, False)]

    last_err = None
    for sb, fused in attempts:
        try:
            return build(sb, fused)(x, cross_cond, *flat)
        except Exception as e:   # fallback path for older Pallas/Mosaic
            last_err = e
    raise last_err


def reference(x, cc, p, heads, matmul_dtype=jnp.bfloat16):
    """Pure-JAX reference mirroring the PyTorch forward pass (bf16 matmuls,
    f32 accumulation, f32 elementwise — same numerics regime as the kernel)."""
    mm = matmul_dtype
    f32 = jnp.float32

    mu = x.mean(-1, keepdims=True)
    var = ((x - mu) ** 2).mean(-1, keepdims=True)
    xn = (x - mu) * jax.lax.rsqrt(var + 1e-5) * p["ln_g"][0] + p["ln_b"][0]

    def two_layer(inp, w1, b1, w2, b2):
        h = jnp.einsum('bsd,dh->bsh', inp.astype(mm), w1.astype(mm),
                       preferred_element_type=f32) + b1[0]
        h = h * jax.nn.sigmoid(h)
        return jnp.einsum('bsd,dh->bsh', h.astype(mm), w2.astype(mm),
                          preferred_element_type=f32) + b2[0]

    q = two_layer(xn, p["qw1"], p["qb1"], p["qw2"], p["qb2"])
    k = two_layer(cc, p["kw1"], p["kb1"], p["kw2"], p["kb2"])
    v = two_layer(cc, p["vw1"], p["vb1"], p["vw2"], p["vb2"])

    B, Sq, D = q.shape
    _, Sk, _ = k.shape
    ds = D // heads
    qh = q.reshape(B, Sq, heads, ds).transpose(0, 2, 1, 3)
    kh = k.reshape(B, Sk, heads, ds).transpose(0, 2, 1, 3)
    vh = v.reshape(B, Sk, heads, ds).transpose(0, 2, 1, 3)
    s = jnp.einsum("nhqd,nhkd->nhqk", qh.astype(mm), kh.astype(mm),
                   preferred_element_type=f32) / math.sqrt(ds)
    pmat = jax.nn.softmax(s, axis=-1)
    attn = jnp.einsum("nhqk,nhkd->nhqd", pmat.astype(mm), vh.astype(mm),
                      preferred_element_type=f32)
    attn = attn.transpose(0, 2, 1, 3).reshape(B, Sq, D)

    out = jnp.einsum('bsd,de->bse', attn.astype(mm), p["rw"].astype(mm),
                     preferred_element_type=f32) + p["rb"][0]
    out = out + x
    return out * jax.nn.sigmoid(out)


if __name__ == "__main__":
    B, Sq, Sk = 2, 8, 8
    D, Dc, H, HEADS = 32, 32, 64, 4

    key = jax.random.PRNGKey(0)
    keys = jax.random.split(key, 32)
    ki = iter(range(32))

    def rnd(shape, scale=0.05):
        return scale * jax.random.normal(keys[next(ki)], shape, dtype=jnp.float32)

    params = {
        # LayerNorm affine params (PyTorch default init: weight=1, bias=0)
        "ln_g": jnp.ones((1, D), jnp.float32),
        "ln_b": jnp.zeros((1, D), jnp.float32),
        # q_block: Linear(D,H)+SiLU, Linear(H,D)
        "qw1": rnd((D, H)), "qb1": rnd((1, H)),
        "qw2": rnd((H, D)), "qb2": rnd((1, D)),
        # k_block: Linear(Dc,H)+SiLU, Linear(H,D)
        "kw1": rnd((Dc, H)), "kb1": rnd((1, H)),
        "kw2": rnd((H, D)), "kb2": rnd((1, D)),
        # v_block: Linear(Dc,H)+SiLU, Linear(H,D)
        "vw1": rnd((Dc, H)), "vb1": rnd((1, H)),
        "vw2": rnd((H, D)), "vb2": rnd((1, D)),
        # residual linear: Linear(D,D)
        "rw": rnd((D, D)), "rb": rnd((1, D)),
    }

    x = jax.random.normal(keys[next(ki)], (B, Sq, D), dtype=jnp.float32)
    cross_cond = jax.random.normal(keys[next(ki)], (B, Sk, Dc), dtype=jnp.float32)

    out = cross_attention_block(x, cross_cond, params, heads=HEADS)
    out = jax.block_until_ready(out)

    ref = reference(x, cross_cond, params, heads=HEADS)
    assert out.shape == (B, Sq, D)
    assert jnp.allclose(out, ref, rtol=2e-3, atol=2e-3), "mismatch vs. JAX reference"

    print("KERNEL_OK")
</pallas_src>

<mosaic_0001>
module attributes {stable_mosaic.version = 11 : i64} {
  func.func @_cross_attn_kernel(%arg0: i32, %arg1: memref<1x8x32xf32, #tpu.memory_space<vmem>>, %arg2: memref<1x8x32xf32, #tpu.memory_space<vmem>>, %arg3: memref<1x32xf32, #tpu.memory_space<vmem>>, %arg4: memref<1x32xf32, #tpu.memory_space<vmem>>, %arg5: memref<32x64xbf16, #tpu.memory_space<vmem>>, %arg6: memref<1x64xf32, #tpu.memory_space<vmem>>, %arg7: memref<64x32xbf16, #tpu.memory_space<vmem>>, %arg8: memref<1x32xf32, #tpu.memory_space<vmem>>, %arg9: memref<32x128xbf16, #tpu.memory_space<vmem>>, %arg10: memref<1x128xf32, #tpu.memory_space<vmem>>, %arg11: memref<64x32xbf16, #tpu.memory_space<vmem>>, %arg12: memref<1x32xf32, #tpu.memory_space<vmem>>, %arg13: memref<64x32xbf16, #tpu.memory_space<vmem>>, %arg14: memref<1x32xf32, #tpu.memory_space<vmem>>, %arg15: memref<32x32xbf16, #tpu.memory_space<vmem>>, %arg16: memref<1x32xf32, #tpu.memory_space<vmem>>, %arg17: memref<1x8x32xf32, #tpu.memory_space<vmem>>) attributes {dimension_semantics = [#tpu.dimension_semantics<parallel>], iteration_bounds = array<i64: 2>, scalar_prefetch = 0 : i64, scratch_operands = 0 : i64, tpu.core_type = #tpu.core_type<tc>, window_params = [{transform_indices = @transform_0, window_bounds = array<i64: 1, 8, 32>}, {transform_indices = @transform_1, window_bounds = array<i64: 1, 8, 32>}, {pipeline_mode = #tpu.pipeline_mode<synchronous>, transform_indices = @transform_2, window_bounds = array<i64: 1, 32>}, {pipeline_mode = #tpu.pipeline_mode<synchronous>, transform_indices = @transform_3, window_bounds = array<i64: 1, 32>}, {pipeline_mode = #tpu.pipeline_mode<synchronous>, transform_indices = @transform_4, window_bounds = array<i64: 32, 64>}, {pipeline_mode = #tpu.pipeline_mode<synchronous>, transform_indices = @transform_5, window_bounds = array<i64: 1, 64>}, {pipeline_mode = #tpu.pipeline_mode<synchronous>, transform_indices = @transform_6, window_bounds = array<i64: 64, 32>}, {pipeline_mode = #tpu.pipeline_mode<synchronous>, transform_indices = @transform_7, window_bounds = array<i64: 1, 32>}, {pipeline_mode = #tpu.pipeline_mode<synchronous>, transform_indices = @transform_8, window_bounds = array<i64: 32, 128>}, {pipeline_mode = #tpu.pipeline_mode<synchronous>, transform_indices = @transform_9, window_bounds = array<i64: 1, 128>}, {pipeline_mode = #tpu.pipeline_mode<synchronous>, transform_indices = @transform_10, window_bounds = array<i64: 64, 32>}, {pipeline_mode = #tpu.pipeline_mode<synchronous>, transform_indices = @transform_11, window_bounds = array<i64: 1, 32>}, {pipeline_mode = #tpu.pipeline_mode<synchronous>, transform_indices = @transform_12, window_bounds = array<i64: 64, 32>}, {pipeline_mode = #tpu.pipeline_mode<synchronous>, transform_indices = @transform_13, window_bounds = array<i64: 1, 32>}, {pipeline_mode = #tpu.pipeline_mode<synchronous>, transform_indices = @transform_14, window_bounds = array<i64: 32, 32>}, {pipeline_mode = #tpu.pipeline_mode<synchronous>, transform_indices = @transform_15, window_bounds = array<i64: 1, 32>}, {transform_indices = @transform_16, window_bounds = array<i64: 1, 8, 32>}]} {
    %c0 = arith.constant 0 : index
    %c0_0 = arith.constant 0 : index
    %c0_1 = arith.constant 0 : index
    %0 = vector.load %arg1[%c0, %c0_0, %c0_1] : memref<1x8x32xf32, #tpu.memory_space<vmem>>, vector<1x8x32xf32>
    %1 = vector.shape_cast %0 : vector<1x8x32xf32> to vector<8x32xf32>
    %c0_2 = arith.constant 0 : index
    %c0_3 = arith.constant 0 : index
    %c0_4 = arith.constant 0 : index
    %2 = vector.load %arg2[%c0_2, %c0_3, %c0_4] : memref<1x8x32xf32, #tpu.memory_space<vmem>>, vector<1x8x32xf32>
    %3 = vector.shape_cast %2 : vector<1x8x32xf32> to vector<8x32xf32>
    %4 = arith.truncf %3 : vector<8x32xf32> to vector<8x32xbf16>
    %c0_5 = arith.constant 0 : index
    %c0_6 = arith.constant 0 : index
    %5 = vector.load %arg3[%c0_5, %c0_6] : memref<1x32xf32, #tpu.memory_space<vmem>>, vector<1x32xf32>
    %6 = vector.shape_cast %5 : vector<1x32xf32> to vector<32xf32>
    %c0_7 = arith.constant 0 : index
    %c0_8 = arith.constant 0 : index
    %7 = vector.load %arg4[%c0_7, %c0_8] : memref<1x32xf32, #tpu.memory_space<vmem>>, vector<1x32xf32>
    %8 = vector.shape_cast %7 : vector<1x32xf32> to vector<32xf32>
    %c0_9 = arith.constant 0 : index
    %c0_10 = arith.constant 0 : index
    %9 = vector.load %arg6[%c0_9, %c0_10] : memref<1x64xf32, #tpu.memory_space<vmem>>, vector<1x64xf32>
    %10 = vector.shape_cast %9 : vector<1x64xf32> to vector<64xf32>
    %c0_11 = arith.constant 0 : index
    %c0_12 = arith.constant 0 : index
    %11 = vector.load %arg8[%c0_11, %c0_12] : memref<1x32xf32, #tpu.memory_space<vmem>>, vector<1x32xf32>
    %12 = vector.shape_cast %11 : vector<1x32xf32> to vector<32xf32>
    %c0_13 = arith.constant 0 : index
    %c0_14 = arith.constant 0 : index
    %13 = vector.load %arg10[%c0_13, %c0_14] : memref<1x128xf32, #tpu.memory_space<vmem>>, vector<1x128xf32>
    %14 = vector.shape_cast %13 : vector<1x128xf32> to vector<128xf32>
    %c0_15 = arith.constant 0 : index
    %c0_16 = arith.constant 0 : index
    %15 = vector.load %arg12[%c0_15, %c0_16] : memref<1x32xf32, #tpu.memory_space<vmem>>, vector<1x32xf32>
    %16 = vector.shape_cast %15 : vector<1x32xf32> to vector<32xf32>
    %c0_17 = arith.constant 0 : index
    %c0_18 = arith.constant 0 : index
    %17 = vector.load %arg14[%c0_17, %c0_18] : memref<1x32xf32, #tpu.memory_space<vmem>>, vector<1x32xf32>
    %18 = vector.shape_cast %17 : vector<1x32xf32> to vector<32xf32>
    %c0_19 = arith.constant 0 : index
    %c0_20 = arith.constant 0 : index
    %19 = vector.load %arg16[%c0_19, %c0_20] : memref<1x32xf32, #tpu.memory_space<vmem>>, vector<1x32xf32>
    %20 = vector.shape_cast %19 : vector<1x32xf32> to vector<32xf32>
    %cst = arith.constant dense<0.000000e+00> : vector<8xf32>
    %21 = vector.multi_reduction <add>, %1, %cst [1] : vector<8x32xf32> to vector<8xf32>
    %22 = vector.shape_cast %21 : vector<8xf32> to vector<8x1xf32>
    %cst_21 = arith.constant 3.200000e+01 : f32
    %23 = vector.broadcast %cst_21 : f32 to vector<8x1xf32>
    %24 = arith.divf %22, %23 : vector<8x1xf32>
    %25 = vector.broadcast %24 : vector<8x1xf32> to vector<8x32xf32>
    %26 = arith.subf %1, %25 : vector<8x32xf32>
    %27 = arith.mulf %26, %26 : vector<8x32xf32>
    %cst_22 = arith.constant dense<0.000000e+00> : vector<8xf32>
    %28 = vector.multi_reduction <add>, %27, %cst_22 [1] : vector<8x32xf32> to vector<8xf32>
    %29 = vector.shape_cast %28 : vector<8xf32> to vector<8x1xf32>
    %cst_23 = arith.constant 3.200000e+01 : f32
    %30 = vector.broadcast %cst_23 : f32 to vector<8x1xf32>
    %31 = arith.divf %29, %30 : vector<8x1xf32>
    %32 = vector.broadcast %24 : vector<8x1xf32> to vector<8x32xf32>
    %33 = arith.subf %1, %32 : vector<8x32xf32>
    %cst_24 = arith.constant 9.99999974E-6 : f32
    %34 = vector.broadcast %cst_24 : f32 to vector<8x1xf32>
    %35 = arith.addf %31, %34 : vector<8x1xf32>
    %36 = math.rsqrt %35 : vector<8x1xf32>
    %37 = vector.broadcast %36 : vector<8x1xf32> to vector<8x32xf32>
    %38 = arith.mulf %33, %37 : vector<8x32xf32>
    %39 = vector.shape_cast %6 : vector<32xf32> to vector<1x32xf32>
    %40 = vector.broadcast %39 : vector<1x32xf32> to vector<8x32xf32>
    %41 = arith.mulf %38, %40 : vector<8x32xf32>
    %42 = vector.shape_cast %8 : vector<32xf32> to vector<1x32xf32>
    %43 = vector.broadcast %42 : vector<1x32xf32> to vector<8x32xf32>
    %44 = arith.addf %41, %43 : vector<8x32xf32>
    %45 = arith.truncf %44 : vector<8x32xf32> to vector<8x32xbf16>
    %c0_25 = arith.constant 0 : index
    %c0_26 = arith.constant 0 : index
    %46 = vector.load %arg5[%c0_25, %c0_26] : memref<32x64xbf16, #tpu.memory_space<vmem>>, vector<32x64xbf16>
    %cst_27 = arith.constant dense<0.000000e+00> : vector<8x64xf32>
    %47 = tpu.matmul %45, %46, %cst_27 {dimension_numbers = #tpu.dot_dimension_numbers<[1], [0], [0], [1], [0, 0, 1, 1], [], []>} : vector<8x32xbf16>, vector<32x64xbf16>, vector<8x64xf32> -> vector<8x64xf32>
    %48 = vector.shape_cast %10 : vector<64xf32> to vector<1x64xf32>
    %49 = vector.broadcast %48 : vector<1x64xf32> to vector<8x64xf32>
    %50 = arith.addf %47, %49 : vector<8x64xf32>
    %51 = arith.negf %50 : vector<8x64xf32>
    %52 = math.exp %51 : vector<8x64xf32>
    %cst_28 = arith.constant 1.000000e+00 : f32
    %53 = vector.broadcast %cst_28 : f32 to vector<8x64xf32>
    %54 = arith.addf %53, %52 : vector<8x64xf32>
    %55 = arith.divf %53, %54 : vector<8x64xf32>
    %56 = arith.mulf %50, %55 : vector<8x64xf32>
    %57 = arith.truncf %56 : vector<8x64xf32> to vector<8x64xbf16>
    %c0_29 = arith.constant 0 : index
    %c0_30 = arith.constant 0 : index
    %58 = vector.load %arg7[%c0_29, %c0_30] : memref<64x32xbf16, #tpu.memory_space<vmem>>, vector<64x32xbf16>
    %cst_31 = arith.constant dense<0.000000e+00> : vector<8x32xf32>
    %59 = tpu.matmul %57, %58, %cst_31 {dimension_numbers = #tpu.dot_dimension_numbers<[1], [0], [0], [1], [0, 0, 1, 1], [], []>} : vector<8x64xbf16>, vector<64x32xbf16>, vector<8x32xf32> -> vector<8x32xf32>
    %60 = vector.shape_cast %12 : vector<32xf32> to vector<1x32xf32>
    %61 = vector.broadcast %60 : vector<1x32xf32> to vector<8x32xf32>
    %62 = arith.addf %59, %61 : vector<8x32xf32>
    %cst_32 = arith.constant 0.353553385 : f32
    %63 = vector.broadcast %cst_32 : f32 to vector<8x32xf32>
    %64 = arith.mulf %62, %63 : vector<8x32xf32>
    %c0_33 = arith.constant 0 : index
    %c0_34 = arith.constant 0 : index
    %65 = vector.load %arg9[%c0_33, %c0_34] : memref<32x128xbf16, #tpu.memory_space<vmem>>, vector<32x128xbf16>
    %cst_35 = arith.constant dense<0.000000e+00> : vector<8x128xf32>
    %66 = tpu.matmul %4, %65, %cst_35 {dimension_numbers = #tpu.dot_dimension_numbers<[1], [0], [0], [1], [0, 0, 1, 1], [], []>} : vector<8x32xbf16>, vector<32x128xbf16>, vector<8x128xf32> -> vector<8x128xf32>
    %67 = vector.shape_cast %14 : vector<128xf32> to vector<1x128xf32>
    %68 = vector.broadcast %67 : vector<1x128xf32> to vector<8x128xf32>
    %69 = arith.addf %66, %68 : vector<8x128xf32>
    %70 = arith.negf %69 : vector<8x128xf32>
    %71 = math.exp %70 : vector<8x128xf32>
    %cst_36 = arith.constant 1.000000e+00 : f32
    %72 = vector.broadcast %cst_36 : f32 to vector<8x128xf32>
    %73 = arith.addf %72, %71 : vector<8x128xf32>
    %74 = arith.divf %72, %73 : vector<8x128xf32>
    %75 = arith.mulf %69, %74 : vector<8x128xf32>
    %76 = arith.truncf %75 : vector<8x128xf32> to vector<8x128xbf16>
    %77 = vector.extract_strided_slice %76 {offsets = [0, 0], sizes = [8, 64], strides = [1, 1]} : vector<8x128xbf16> to vector<8x64xbf16>
    %c0_37 = arith.constant 0 : index
    %c0_38 = arith.constant 0 : index
    %78 = vector.load %arg11[%c0_37, %c0_38] : memref<64x32xbf16, #tpu.memory_space<vmem>>, vector<64x32xbf16>
    %cst_39 = arith.constant dense<0.000000e+00> : vector<8x32xf32>
    %79 = tpu.matmul %77, %78, %cst_39 {dimension_numbers = #tpu.dot_dimension_numbers<[1], [0], [0], [1], [0, 0, 1, 1], [], []>} : vector<8x64xbf16>, vector<64x32xbf16>, vector<8x32xf32> -> vector<8x32xf32>
    %80 = vector.shape_cast %16 : vector<32xf32> to vector<1x32xf32>
    %81 = vector.broadcast %80 : vector<1x32xf32> to vector<8x32xf32>
    %82 = arith.addf %79, %81 : vector<8x32xf32>
    %83 = vector.extract_strided_slice %76 {offsets = [0, 64], sizes = [8, 64], strides = [1, 1]} : vector<8x128xbf16> to vector<8x64xbf16>
    %c0_40 = arith.constant 0 : index
    %c0_41 = arith.constant 0 : index
    %84 = vector.load %arg13[%c0_40, %c0_41] : memref<64x32xbf16, #tpu.memory_space<vmem>>, vector<64x32xbf16>
    %cst_42 = arith.constant dense<0.000000e+00> : vector<8x32xf32>
    %85 = tpu.matmul %83, %84, %cst_42 {dimension_numbers = #tpu.dot_dimension_numbers<[1], [0], [0], [1], [0, 0, 1, 1], [], []>} : vector<8x64xbf16>, vector<64x32xbf16>, vector<8x32xf32> -> vector<8x32xf32>
    %86 = vector.shape_cast %18 : vector<32xf32> to vector<1x32xf32>
    %87 = vector.broadcast %86 : vector<1x32xf32> to vector<8x32xf32>
    %88 = arith.addf %85, %87 : vector<8x32xf32>
    %89 = arith.truncf %64 : vector<8x32xf32> to vector<8x32xbf16>
    %90 = vector.shape_cast %89 : vector<8x32xbf16> to vector<1x8x32xbf16>
    %91 = arith.truncf %82 : vector<8x32xf32> to vector<8x32xbf16>
    %92 = vector.shape_cast %91 : vector<8x32xbf16> to vector<1x8x32xbf16>
    %93 = arith.truncf %88 : vector<8x32xf32> to vector<8x32xbf16>
    %94 = vector.shape_cast %93 : vector<8x32xbf16> to vector<1x8x32xbf16>
    %95 = vector.extract_strided_slice %90 {offsets = [0, 0, 0], sizes = [1, 8, 8], strides = [1, 1, 1]} : vector<1x8x32xbf16> to vector<1x8x8xbf16>
    %96 = vector.extract_strided_slice %92 {offsets = [0, 0, 0], sizes = [1, 8, 8], strides = [1, 1, 1]} : vector<1x8x32xbf16> to vector<1x8x8xbf16>
    "tpu.trace_start"() <{level = 10 : i32, message = "bqd,bkd->bqk"}> : () -> ()
    %cst_43 = arith.constant dense<0.000000e+00> : vector<1x8x8xf32>
    %97 = tpu.matmul %95, %96, %cst_43 {dimension_numbers = #tpu.dot_dimension_numbers<[2], [2], [1], [1], [0, 0, 0, 1, 1, 1], [0], [0]>} : vector<1x8x8xbf16>, vector<1x8x8xbf16>, vector<1x8x8xf32> -> vector<1x8x8xf32>
    "tpu.trace_stop"() : () -> ()
    %cst_44 = arith.constant dense<0xFF800000> : vector<1x8xf32>
    %98 = vector.multi_reduction <maximumf>, %97, %cst_44 [2] : vector<1x8x8xf32> to vector<1x8xf32>
    %99 = vector.shape_cast %98 : vector<1x8xf32> to vector<1x8x1xf32>
    %100 = vector.broadcast %99 : vector<1x8x1xf32> to vector<1x8x8xf32>
    %101 = arith.subf %97, %100 : vector<1x8x8xf32>
    %102 = math.exp %101 : vector<1x8x8xf32>
    %cst_45 = arith.constant dense<0.000000e+00> : vector<1x8xf32>
    %103 = vector.multi_reduction <add>, %102, %cst_45 [2] : vector<1x8x8xf32> to vector<1x8xf32>
    %104 = vector.shape_cast %103 : vector<1x8xf32> to vector<1x8x1xf32>
    %105 = tpu.reciprocal %104 {approx = true} : vector<1x8x1xf32> -> vector<1x8x1xf32>
    %106 = vector.broadcast %105 : vector<1x8x1xf32> to vector<1x8x8xf32>
    %107 = arith.mulf %102, %106 : vector<1x8x8xf32>
    %108 = arith.truncf %107 : vector<1x8x8xf32> to vector<1x8x8xbf16>
    %109 = vector.extract_strided_slice %94 {offsets = [0, 0, 0], sizes = [1, 8, 8], strides = [1, 1, 1]} : vector<1x8x32xbf16> to vector<1x8x8xbf16>
    "tpu.trace_start"() <{level = 10 : i32, message = "bqk,bkd->bqd"}> : () -> ()
    %cst_46 = arith.constant dense<0.000000e+00> : vector<1x8x8xf32>
    %110 = tpu.matmul %108, %109, %cst_46 {dimension_numbers = #tpu.dot_dimension_numbers<[2], [1], [1], [2], [0, 0, 0, 1, 1, 2], [0], [0]>} : vector<1x8x8xbf16>, vector<1x8x8xbf16>, vector<1x8x8xf32> -> vector<1x8x8xf32>
    "tpu.trace_stop"() : () -> ()
    %111 = vector.extract_strided_slice %90 {offsets = [0, 0, 8], sizes = [1, 8, 8], strides = [1, 1, 1]} : vector<1x8x32xbf16> to vector<1x8x8xbf16>
    %112 = vector.extract_strided_slice %92 {offsets = [0, 0, 8], sizes = [1, 8, 8], strides = [1, 1, 1]} : vector<1x8x32xbf16> to vector<1x8x8xbf16>
    "tpu.trace_start"() <{level = 10 : i32, message = "bqd,bkd->bqk"}> : () -> ()
    %cst_47 = arith.constant dense<0.000000e+00> : vector<1x8x8xf32>
    %113 = tpu.matmul %111, %112, %cst_47 {dimension_numbers = #tpu.dot_dimension_numbers<[2], [2], [1], [1], [0, 0, 0, 1, 1, 1], [0], [0]>} : vector<1x8x8xbf16>, vector<1x8x8xbf16>, vector<1x8x8xf32> -> vector<1x8x8xf32>
    "tpu.trace_stop"() : () -> ()
    %cst_48 = arith.constant dense<0xFF800000> : vector<1x8xf32>
    %114 = vector.multi_reduction <maximumf>, %113, %cst_48 [2] : vector<1x8x8xf32> to vector<1x8xf32>
    %115 = vector.shape_cast %114 : vector<1x8xf32> to vector<1x8x1xf32>
    %116 = vector.broadcast %115 : vector<1x8x1xf32> to vector<1x8x8xf32>
    %117 = arith.subf %113, %116 : vector<1x8x8xf32>
    %118 = math.exp %117 : vector<1x8x8xf32>
    %cst_49 = arith.constant dense<0.000000e+00> : vector<1x8xf32>
    %119 = vector.multi_reduction <add>, %118, %cst_49 [2] : vector<1x8x8xf32> to vector<1x8xf32>
    %120 = vector.shape_cast %119 : vector<1x8xf32> to vector<1x8x1xf32>
    %121 = tpu.reciprocal %120 {approx = true} : vector<1x8x1xf32> -> vector<1x8x1xf32>
    %122 = vector.broadcast %121 : vector<1x8x1xf32> to vector<1x8x8xf32>
    %123 = arith.mulf %118, %122 : vector<1x8x8xf32>
    %124 = arith.truncf %123 : vector<1x8x8xf32> to vector<1x8x8xbf16>
    %125 = vector.extract_strided_slice %94 {offsets = [0, 0, 8], sizes = [1, 8, 8], strides = [1, 1, 1]} : vector<1x8x32xbf16> to vector<1x8x8xbf16>
    "tpu.trace_start"() <{level = 10 : i32, message = "bqk,bkd->bqd"}> : () -> ()
    %cst_50 = arith.constant dense<0.000000e+00> : vector<1x8x8xf32>
    %126 = tpu.matmul %124, %125, %cst_50 {dimension_numbers = #tpu.dot_dimension_numbers<[2], [1], [1], [2], [0, 0, 0, 1, 1, 2], [0], [0]>} : vector<1x8x8xbf16>, vector<1x8x8xbf16>, vector<1x8x8xf32> -> vector<1x8x8xf32>
    "tpu.trace_stop"() : () -> ()
    %127 = vector.extract_strided_slice %90 {offsets = [0, 0, 16], sizes = [1, 8, 8], strides = [1, 1, 1]} : vector<1x8x32xbf16> to vector<1x8x8xbf16>
    %128 = vector.extract_strided_slice %92 {offsets = [0, 0, 16], sizes = [1, 8, 8], strides = [1, 1, 1]} : vector<1x8x32xbf16> to vector<1x8x8xbf16>
    "tpu.trace_start"() <{level = 10 : i32, message = "bqd,bkd->bqk"}> : () -> ()
    %cst_51 = arith.constant dense<0.000000e+00> : vector<1x8x8xf32>
    %129 = tpu.matmul %127, %128, %cst_51 {dimension_numbers = #tpu.dot_dimension_numbers<[2], [2], [1], [1], [0, 0, 0, 1, 1, 1], [0], [0]>} : vector<1x8x8xbf16>, vector<1x8x8xbf16>, vector<1x8x8xf32> -> vector<1x8x8xf32>
    "tpu.trace_stop"() : () -> ()
    %cst_52 = arith.constant dense<0xFF800000> : vector<1x8xf32>
    %130 = vector.multi_reduction <maximumf>, %129, %cst_52 [2] : vector<1x8x8xf32> to vector<1x8xf32>
    %131 = vector.shape_cast %130 : vector<1x8xf32> to vector<1x8x1xf32>
    %132 = vector.broadcast %131 : vector<1x8x1xf32> to vector<1x8x8xf32>
    %133 = arith.subf %129, %132 : vector<1x8x8xf32>
    %134 = math.exp %133 : vector<1x8x8xf32>
    %cst_53 = arith.constant dense<0.000000e+00> : vector<1x8xf32>
    %135 = vector.multi_reduction <add>, %134, %cst_53 [2] : vector<1x8x8xf32> to vector<1x8xf32>
    %136 = vector.shape_cast %135 : vector<1x8xf32> to vector<1x8x1xf32>
    %137 = tpu.reciprocal %136 {approx = true} : vector<1x8x1xf32> -> vector<1x8x1xf32>
    %138 = vector.broadcast %137 : vector<1x8x1xf32> to vector<1x8x8xf32>
    %139 = arith.mulf %134, %138 : vector<1x8x8xf32>
    %140 = arith.truncf %139 : vector<1x8x8xf32> to vector<1x8x8xbf16>
    %141 = vector.extract_strided_slice %94 {offsets = [0, 0, 16], sizes = [1, 8, 8], strides = [1, 1, 1]} : vector<1x8x32xbf16> to vector<1x8x8xbf16>
    "tpu.trace_start"() <{level = 10 : i32, message = "bqk,bkd->bqd"}> : () -> ()
    %cst_54 = arith.constant dense<0.000000e+00> : vector<1x8x8xf32>
    %142 = tpu.matmul %140, %141, %cst_54 {dimension_numbers = #tpu.dot_dimension_numbers<[2], [1], [1], [2], [0, 0, 0, 1, 1, 2], [0], [0]>} : vector<1x8x8xbf16>, vector<1x8x8xbf16>, vector<1x8x8xf32> -> vector<1x8x8xf32>
    "tpu.trace_stop"() : () -> ()
    %143 = vector.extract_strided_slice %90 {offsets = [0, 0, 24], sizes = [1, 8, 8], strides = [1, 1, 1]} : vector<1x8x32xbf16> to vector<1x8x8xbf16>
    %144 = vector.extract_strided_slice %92 {offsets = [0, 0, 24], sizes = [1, 8, 8], strides = [1, 1, 1]} : vector<1x8x32xbf16> to vector<1x8x8xbf16>
    "tpu.trace_start"() <{level = 10 : i32, message = "bqd,bkd->bqk"}> : () -> ()
    %cst_55 = arith.constant dense<0.000000e+00> : vector<1x8x8xf32>
    %145 = tpu.matmul %143, %144, %cst_55 {dimension_numbers = #tpu.dot_dimension_numbers<[2], [2], [1], [1], [0, 0, 0, 1, 1, 1], [0], [0]>} : vector<1x8x8xbf16>, vector<1x8x8xbf16>, vector<1x8x8xf32> -> vector<1x8x8xf32>
    "tpu.trace_stop"() : () -> ()
    %cst_56 = arith.constant dense<0xFF800000> : vector<1x8xf32>
    %146 = vector.multi_reduction <maximumf>, %145, %cst_56 [2] : vector<1x8x8xf32> to vector<1x8xf32>
    %147 = vector.shape_cast %146 : vector<1x8xf32> to vector<1x8x1xf32>
    %148 = vector.broadcast %147 : vector<1x8x1xf32> to vector<1x8x8xf32>
    %149 = arith.subf %145, %148 : vector<1x8x8xf32>
    %150 = math.exp %149 : vector<1x8x8xf32>
    %cst_57 = arith.constant dense<0.000000e+00> : vector<1x8xf32>
    %151 = vector.multi_reduction <add>, %150, %cst_57 [2] : vector<1x8x8xf32> to vector<1x8xf32>
    %152 = vector.shape_cast %151 : vector<1x8xf32> to vector<1x8x1xf32>
    %153 = tpu.reciprocal %152 {approx = true} : vector<1x8x1xf32> -> vector<1x8x1xf32>
    %154 = vector.broadcast %153 : vector<1x8x1xf32> to vector<1x8x8xf32>
    %155 = arith.mulf %150, %154 : vector<1x8x8xf32>
    %156 = arith.truncf %155 : vector<1x8x8xf32> to vector<1x8x8xbf16>
    %157 = vector.extract_strided_slice %94 {offsets = [0, 0, 24], sizes = [1, 8, 8], strides = [1, 1, 1]} : vector<1x8x32xbf16> to vector<1x8x8xbf16>
    "tpu.trace_start"() <{level = 10 : i32, message = "bqk,bkd->bqd"}> : () -> ()
    %cst_58 = arith.constant dense<0.000000e+00> : vector<1x8x8xf32>
    %158 = tpu.matmul %156, %157, %cst_58 {dimension_numbers = #tpu.dot_dimension_numbers<[2], [1], [1], [2], [0, 0, 0, 1, 1, 2], [0], [0]>} : vector<1x8x8xbf16>, vector<1x8x8xbf16>, vector<1x8x8xf32> -> vector<1x8x8xf32>
    "tpu.trace_stop"() : () -> ()
    %159 = tpu.concatenate %110, %126, %142, %158 in 2 : vector<1x8x8xf32>, vector<1x8x8xf32>, vector<1x8x8xf32>, vector<1x8x8xf32> -> vector<1x8x32xf32>
    %160 = vector.shape_cast %159 : vector<1x8x32xf32> to vector<8x32xf32>
    %161 = arith.truncf %160 : vector<8x32xf32> to vector<8x32xbf16>
    %c0_59 = arith.constant 0 : index
    %c0_60 = arith.constant 0 : index
    %162 = vector.load %arg15[%c0_59, %c0_60] : memref<32x32xbf16, #tpu.memory_space<vmem>>, vector<32x32xbf16>
    %cst_61 = arith.constant dense<0.000000e+00> : vector<8x32xf32>
    %163 = tpu.matmul %161, %162, %cst_61 {dimension_numbers = #tpu.dot_dimension_numbers<[1], [0], [0], [1], [0, 0, 1, 1], [], []>} : vector<8x32xbf16>, vector<32x32xbf16>, vector<8x32xf32> -> vector<8x32xf32>
    %164 = vector.shape_cast %20 : vector<32xf32> to vector<1x32xf32>
    %165 = vector.broadcast %164 : vector<1x32xf32> to vector<8x32xf32>
    %166 = arith.addf %163, %165 : vector<8x32xf32>
    %167 = arith.addf %166, %1 : vector<8x32xf32>
    %168 = arith.negf %167 : vector<8x32xf32>
    %169 = math.exp %168 : vector<8x32xf32>
    %cst_62 = arith.constant 1.000000e+00 : f32
    %170 = vector.broadcast %cst_62 : f32 to vector<8x32xf32>
    %171 = arith.addf %170, %169 : vector<8x32xf32>
    %172 = arith.divf %170, %171 : vector<8x32xf32>
    %173 = arith.mulf %167, %172 : vector<8x32xf32>
    %174 = vector.shape_cast %173 : vector<8x32xf32> to vector<1x8x32xf32>
    %c0_63 = arith.constant 0 : index
    %c0_64 = arith.constant 0 : index
    %c0_65 = arith.constant 0 : index
    %175 = vector.load %arg17[%c0_63, %c0_64, %c0_65] : memref<1x8x32xf32, #tpu.memory_space<vmem>>, vector<1x8x32xf32>
    tpu.vector_store %arg17[%c0_63, %c0_64, %c0_65], %174 {strides = array<i32>} : memref<1x8x32xf32, #tpu.memory_space<vmem>>, vector<1x8x32xf32>,
    return
  }
  func.func @transform_0(%arg0: i32) -> (i32, i32, i32) {
    %c0_i32 = arith.constant 0 : i32
    %c0_i32_0 = arith.constant 0 : i32
    %c0_i32_1 = arith.constant 0 : i32
    return %arg0, %c0_i32, %c0_i32_0 : i32, i32, i32
  }
  func.func @transform_1(%arg0: i32) -> (i32, i32, i32) {
    %c0_i32 = arith.constant 0 : i32
    %c0_i32_0 = arith.constant 0 : i32
    %c0_i32_1 = arith.constant 0 : i32
    return %arg0, %c0_i32, %c0_i32_0 : i32, i32, i32
  }
  func.func @transform_2(%arg0: i32) -> (i32, i32) {
    %c0_i32 = arith.constant 0 : i32
    %c0_i32_0 = arith.constant 0 : i32
    %c0_i32_1 = arith.constant 0 : i32
    return %c0_i32, %c0_i32_0 : i32, i32
  }
  func.func @transform_3(%arg0: i32) -> (i32, i32) {
    %c0_i32 = arith.constant 0 : i32
    %c0_i32_0 = arith.constant 0 : i32
    %c0_i32_1 = arith.constant 0 : i32
    return %c0_i32, %c0_i32_0 : i32, i32
  }
  func.func @transform_4(%arg0: i32) -> (i32, i32) {
    %c0_i32 = arith.constant 0 : i32
    %c0_i32_0 = arith.constant 0 : i32
    %c0_i32_1 = arith.constant 0 : i32
    return %c0_i32, %c0_i32_0 : i32, i32
  }
  func.func @transform_5(%arg0: i32) -> (i32, i32) {
    %c0_i32 = arith.constant 0 : i32
    %c0_i32_0 = arith.constant 0 : i32
    %c0_i32_1 = arith.constant 0 : i32
    return %c0_i32, %c0_i32_0 : i32, i32
  }
  func.func @transform_6(%arg0: i32) -> (i32, i32) {
    %c0_i32 = arith.constant 0 : i32
    %c0_i32_0 = arith.constant 0 : i32
    %c0_i32_1 = arith.constant 0 : i32
    return %c0_i32, %c0_i32_0 : i32, i32
  }
  func.func @transform_7(%arg0: i32) -> (i32, i32) {
    %c0_i32 = arith.constant 0 : i32
    %c0_i32_0 = arith.constant 0 : i32
    %c0_i32_1 = arith.constant 0 : i32
    return %c0_i32, %c0_i32_0 : i32, i32
  }
  func.func @transform_8(%arg0: i32) -> (i32, i32) {
    %c0_i32 = arith.constant 0 : i32
    %c0_i32_0 = arith.constant 0 : i32
    %c0_i32_1 = arith.constant 0 : i32
    return %c0_i32, %c0_i32_0 : i32, i32
  }
  func.func @transform_9(%arg0: i32) -> (i32, i32) {
    %c0_i32 = arith.constant 0 : i32
    %c0_i32_0 = arith.constant 0 : i32
    %c0_i32_1 = arith.constant 0 : i32
    return %c0_i32, %c0_i32_0 : i32, i32
  }
  func.func @transform_10(%arg0: i32) -> (i32, i32) {
    %c0_i32 = arith.constant 0 : i32
    %c0_i32_0 = arith.constant 0 : i32
    %c0_i32_1 = arith.constant 0 : i32
    return %c0_i32, %c0_i32_0 : i32, i32
  }
  func.func @transform_11(%arg0: i32) -> (i32, i32) {
    %c0_i32 = arith.constant 0 : i32
    %c0_i32_0 = arith.constant 0 : i32
    %c0_i32_1 = arith.constant 0 : i32
    return %c0_i32, %c0_i32_0 : i32, i32
  }
  func.func @transform_12(%arg0: i32) -> (i32, i32) {
    %c0_i32 = arith.constant 0 : i32
    %c0_i32_0 = arith.constant 0 : i32
    %c0_i32_1 = arith.constant 0 : i32
    return %c0_i32, %c0_i32_0 : i32, i32
  }
  func.func @transform_13(%arg0: i32) -> (i32, i32) {
    %c0_i32 = arith.constant 0 : i32
    %c0_i32_0 = arith.constant 0 : i32
    %c0_i32_1 = arith.constant 0 : i32
    return %c0_i32, %c0_i32_0 : i32, i32
  }
  func.func @transform_14(%arg0: i32) -> (i32, i32) {
    %c0_i32 = arith.constant 0 : i32
    %c0_i32_0 = arith.constant 0 : i32
    %c0_i32_1 = arith.constant 0 : i32
    return %c0_i32, %c0_i32_0 : i32, i32
  }
  func.func @transform_15(%arg0: i32) -> (i32, i32) {
    %c0_i32 = arith.constant 0 : i32
    %c0_i32_0 = arith.constant 0 : i32
    %c0_i32_1 = arith.constant 0 : i32
    return %c0_i32, %c0_i32_0 : i32, i32
  }
  func.func @transform_16(%arg0: i32) -> (i32, i32, i32) {
    %c0_i32 = arith.constant 0 : i32
    %c0_i32_0 = arith.constant 0 : i32
    %c0_i32_1 = arith.constant 0 : i32
    return %arg0, %c0_i32, %c0_i32_0 : i32, i32, i32
  }
}

module attributes {stable_mosaic.version = 11 : i64} {
  func.func @_cross_attn_kernel(%arg0: i32, %arg1: memref<1x8x32xf32, #tpu.memory_space<vmem>>, %arg2: memref<1x8x32xf32, #tpu.memory_space<vmem>>, %arg3: memref<1x32xf32, #tpu.memory_space<vmem>>, %arg4: memref<1x32xf32, #tpu.memory_space<vmem>>, %arg5: memref<32x64xbf16, #tpu.memory_space<vmem>>, %arg6: memref<1x64xf32, #tpu.memory_space<vmem>>, %arg7: memref<64x32xbf16, #tpu.memory_space<vmem>>, %arg8: memref<1x32xf32, #tpu.memory_space<vmem>>, %arg9: memref<32x128xbf16, #tpu.memory_space<vmem>>, %arg10: memref<1x128xf32, #tpu.memory_space<vmem>>, %arg11: memref<64x32xbf16, #tpu.memory_space<vmem>>, %arg12: memref<1x32xf32, #tpu.memory_space<vmem>>, %arg13: memref<64x32xbf16, #tpu.memory_space<vmem>>, %arg14: memref<1x32xf32, #tpu.memory_space<vmem>>, %arg15: memref<32x32xbf16, #tpu.memory_space<vmem>>, %arg16: memref<1x32xf32, #tpu.memory_space<vmem>>, %arg17: memref<1x8x32xf32, #tpu.memory_space<vmem>>) attributes {dimension_semantics = [#tpu.dimension_semantics<parallel>], iteration_bounds = array<i64: 2>, scalar_prefetch = 0 : i64, scratch_operands = 0 : i64, tpu.core_type = #tpu.core_type<tc>, window_params = [{transform_indices = @transform_0, window_bounds = array<i64: 1, 8, 32>}, {transform_indices = @transform_1, window_bounds = array<i64: 1, 8, 32>}, {pipeline_mode = #tpu.pipeline_mode<synchronous>, transform_indices = @transform_2, window_bounds = array<i64: 1, 32>}, {pipeline_mode = #tpu.pipeline_mode<synchronous>, transform_indices = @transform_3, window_bounds = array<i64: 1, 32>}, {pipeline_mode = #tpu.pipeline_mode<synchronous>, transform_indices = @transform_4, window_bounds = array<i64: 32, 64>}, {pipeline_mode = #tpu.pipeline_mode<synchronous>, transform_indices = @transform_5, window_bounds = array<i64: 1, 64>}, {pipeline_mode = #tpu.pipeline_mode<synchronous>, transform_indices = @transform_6, window_bounds = array<i64: 64, 32>}, {pipeline_mode = #tpu.pipeline_mode<synchronous>, transform_indices = @transform_7, window_bounds = array<i64: 1, 32>}, {pipeline_mode = #tpu.pipeline_mode<synchronous>, transform_indices = @transform_8, window_bounds = array<i64: 32, 128>}, {pipeline_mode = #tpu.pipeline_mode<synchronous>, transform_indices = @transform_9, window_bounds = array<i64: 1, 128>}, {pipeline_mode = #tpu.pipeline_mode<synchronous>, transform_indices = @transform_10, window_bounds = array<i64: 64, 32>}, {pipeline_mode = #tpu.pipeline_mode<synchronous>, transform_indices = @transform_11, window_bounds = array<i64: 1, 32>}, {pipeline_mode = #tpu.pipeline_mode<synchronous>, transform_indices = @transform_12, window_bounds = array<i64: 64, 32>}, {pipeline_mode = #tpu.pipeline_mode<synchronous>, transform_indices = @transform_13, window_bounds = array<i64: 1, 32>}, {pipeline_mode = #tpu.pipeline_mode<synchronous>, transform_indices = @transform_14, window_bounds = array<i64: 32, 32>}, {pipeline_mode = #tpu.pipeline_mode<synchronous>, transform_indices = @transform_15, window_bounds = array<i64: 1, 32>}, {transform_indices = @transform_16, window_bounds = array<i64: 1, 8, 32>}]} {
    %c0 = arith.constant 0 : index
    %c0_0 = arith.constant 0 : index
    %c0_1 = arith.constant 0 : index
    %0 = vector.load %arg1[%c0, %c0_0, %c0_1] : memref<1x8x32xf32, #tpu.memory_space<vmem>>, vector<1x8x32xf32>
    %1 = vector.shape_cast %0 : vector<1x8x32xf32> to vector<8x32xf32>
    %c0_2 = arith.constant 0 : index
    %c0_3 = arith.constant 0 : index
    %c0_4 = arith.constant 0 : index
    %2 = vector.load %arg2[%c0_2, %c0_3, %c0_4] : memref<1x8x32xf32, #tpu.memory_space<vmem>>, vector<1x8x32xf32>
    %3 = vector.shape_cast %2 : vector<1x8x32xf32> to vector<8x32xf32>
    %4 = arith.truncf %3 : vector<8x32xf32> to vector<8x32xbf16>
    %c0_5 = arith.constant 0 : index
    %c0_6 = arith.constant 0 : index
    %5 = vector.load %arg3[%c0_5, %c0_6] : memref<1x32xf32, #tpu.memory_space<vmem>>, vector<1x32xf32>
    %6 = vector.shape_cast %5 : vector<1x32xf32> to vector<32xf32>
    %c0_7 = arith.constant 0 : index
    %c0_8 = arith.constant 0 : index
    %7 = vector.load %arg4[%c0_7, %c0_8] : memref<1x32xf32, #tpu.memory_space<vmem>>, vector<1x32xf32>
    %8 = vector.shape_cast %7 : vector<1x32xf32> to vector<32xf32>
    %c0_9 = arith.constant 0 : index
    %c0_10 = arith.constant 0 : index
    %9 = vector.load %arg6[%c0_9, %c0_10] : memref<1x64xf32, #tpu.memory_space<vmem>>, vector<1x64xf32>
    %10 = vector.shape_cast %9 : vector<1x64xf32> to vector<64xf32>
    %c0_11 = arith.constant 0 : index
    %c0_12 = arith.constant 0 : index
    %11 = vector.load %arg8[%c0_11, %c0_12] : memref<1x32xf32, #tpu.memory_space<vmem>>, vector<1x32xf32>
    %12 = vector.shape_cast %11 : vector<1x32xf32> to vector<32xf32>
    %c0_13 = arith.constant 0 : index
    %c0_14 = arith.constant 0 : index
    %13 = vector.load %arg10[%c0_13, %c0_14] : memref<1x128xf32, #tpu.memory_space<vmem>>, vector<1x128xf32>
    %14 = vector.shape_cast %13 : vector<1x128xf32> to vector<128xf32>
    %c0_15 = arith.constant 0 : index
    %c0_16 = arith.constant 0 : index
    %15 = vector.load %arg12[%c0_15, %c0_16] : memref<1x32xf32, #tpu.memory_space<vmem>>, vector<1x32xf32>
    %16 = vector.shape_cast %15 : vector<1x32xf32> to vector<32xf32>
    %c0_17 = arith.constant 0 : index
    %c0_18 = arith.constant 0 : index
    %17 = vector.load %arg14[%c0_17, %c0_18] : memref<1x32xf32, #tpu.memory_space<vmem>>, vector<1x32xf32>
    %18 = vector.shape_cast %17 : vector<1x32xf32> to vector<32xf32>
    %c0_19 = arith.constant 0 : index
    %c0_20 = arith.constant 0 : index
    %19 = vector.load %arg16[%c0_19, %c0_20] : memref<1x32xf32, #tpu.memory_space<vmem>>, vector<1x32xf32>
    %20 = vector.shape_cast %19 : vector<1x32xf32> to vector<32xf32>
    %cst = arith.constant dense<0.000000e+00> : vector<8xf32>
    %21 = vector.multi_reduction <add>, %1, %cst [1] : vector<8x32xf32> to vector<8xf32>
    %22 = vector.shape_cast %21 : vector<8xf32> to vector<8x1xf32>
    %cst_21 = arith.constant 3.200000e+01 : f32
    %23 = vector.broadcast %cst_21 : f32 to vector<8x1xf32>
    %24 = arith.divf %22, %23 : vector<8x1xf32>
    %25 = vector.broadcast %24 : vector<8x1xf32> to vector<8x32xf32>
    %26 = arith.subf %1, %25 : vector<8x32xf32>
    %27 = arith.mulf %26, %26 : vector<8x32xf32>
    %cst_22 = arith.constant dense<0.000000e+00> : vector<8xf32>
    %28 = vector.multi_reduction <add>, %27, %cst_22 [1] : vector<8x32xf32> to vector<8xf32>
    %29 = vector.shape_cast %28 : vector<8xf32> to vector<8x1xf32>
    %cst_23 = arith.constant 3.200000e+01 : f32
    %30 = vector.broadcast %cst_23 : f32 to vector<8x1xf32>
    %31 = arith.divf %29, %30 : vector<8x1xf32>
    %32 = vector.broadcast %24 : vector<8x1xf32> to vector<8x32xf32>
    %33 = arith.subf %1, %32 : vector<8x32xf32>
    %cst_24 = arith.constant 9.99999974E-6 : f32
    %34 = vector.broadcast %cst_24 : f32 to vector<8x1xf32>
    %35 = arith.addf %31, %34 : vector<8x1xf32>
    %36 = math.rsqrt %35 : vector<8x1xf32>
    %37 = vector.broadcast %36 : vector<8x1xf32> to vector<8x32xf32>
    %38 = arith.mulf %33, %37 : vector<8x32xf32>
    %39 = vector.shape_cast %6 : vector<32xf32> to vector<1x32xf32>
    %40 = vector.broadcast %39 : vector<1x32xf32> to vector<8x32xf32>
    %41 = arith.mulf %38, %40 : vector<8x32xf32>
    %42 = vector.shape_cast %8 : vector<32xf32> to vector<1x32xf32>
    %43 = vector.broadcast %42 : vector<1x32xf32> to vector<8x32xf32>
    %44 = arith.addf %41, %43 : vector<8x32xf32>
    %45 = arith.truncf %44 : vector<8x32xf32> to vector<8x32xbf16>
    %c0_25 = arith.constant 0 : index
    %c0_26 = arith.constant 0 : index
    %46 = vector.load %arg5[%c0_25, %c0_26] : memref<32x64xbf16, #tpu.memory_space<vmem>>, vector<32x64xbf16>
    %cst_27 = arith.constant dense<0.000000e+00> : vector<8x64xf32>
    %47 = tpu.matmul %45, %46, %cst_27 {dimension_numbers = #tpu.dot_dimension_numbers<[1], [0], [0], [1], [0, 0, 1, 1], [], []>} : vector<8x32xbf16>, vector<32x64xbf16>, vector<8x64xf32> -> vector<8x64xf32>
    %48 = vector.shape_cast %10 : vector<64xf32> to vector<1x64xf32>
    %49 = vector.broadcast %48 : vector<1x64xf32> to vector<8x64xf32>
    %50 = arith.addf %47, %49 : vector<8x64xf32>
    %51 = arith.negf %50 : vector<8x64xf32>
    %52 = math.exp %51 : vector<8x64xf32>
    %cst_28 = arith.constant 1.000000e+00 : f32
    %53 = vector.broadcast %cst_28 : f32 to vector<8x64xf32>
    %54 = arith.addf %53, %52 : vector<8x64xf32>
    %55 = arith.divf %53, %54 : vector<8x64xf32>
    %56 = arith.mulf %50, %55 : vector<8x64xf32>
    %57 = arith.truncf %56 : vector<8x64xf32> to vector<8x64xbf16>
    %c0_29 = arith.constant 0 : index
    %c0_30 = arith.constant 0 : index
    %58 = vector.load %arg7[%c0_29, %c0_30] : memref<64x32xbf16, #tpu.memory_space<vmem>>, vector<64x32xbf16>
    %cst_31 = arith.constant dense<0.000000e+00> : vector<8x32xf32>
    %59 = tpu.matmul %57, %58, %cst_31 {dimension_numbers = #tpu.dot_dimension_numbers<[1], [0], [0], [1], [0, 0, 1, 1], [], []>} : vector<8x64xbf16>, vector<64x32xbf16>, vector<8x32xf32> -> vector<8x32xf32>
    %60 = vector.shape_cast %12 : vector<32xf32> to vector<1x32xf32>
    %61 = vector.broadcast %60 : vector<1x32xf32> to vector<8x32xf32>
    %62 = arith.addf %59, %61 : vector<8x32xf32>
    %cst_32 = arith.constant 0.353553385 : f32
    %63 = vector.broadcast %cst_32 : f32 to vector<8x32xf32>
    %64 = arith.mulf %62, %63 : vector<8x32xf32>
    %c0_33 = arith.constant 0 : index
    %c0_34 = arith.constant 0 : index
    %65 = vector.load %arg9[%c0_33, %c0_34] : memref<32x128xbf16, #tpu.memory_space<vmem>>, vector<32x128xbf16>
    %cst_35 = arith.constant dense<0.000000e+00> : vector<8x128xf32>
    %66 = tpu.matmul %4, %65, %cst_35 {dimension_numbers = #tpu.dot_dimension_numbers<[1], [0], [0], [1], [0, 0, 1, 1], [], []>} : vector<8x32xbf16>, vector<32x128xbf16>, vector<8x128xf32> -> vector<8x128xf32>
    %67 = vector.shape_cast %14 : vector<128xf32> to vector<1x128xf32>
    %68 = vector.broadcast %67 : vector<1x128xf32> to vector<8x128xf32>
    %69 = arith.addf %66, %68 : vector<8x128xf32>
    %70 = arith.negf %69 : vector<8x128xf32>
    %71 = math.exp %70 : vector<8x128xf32>
    %cst_36 = arith.constant 1.000000e+00 : f32
    %72 = vector.broadcast %cst_36 : f32 to vector<8x128xf32>
    %73 = arith.addf %72, %71 : vector<8x128xf32>
    %74 = arith.divf %72, %73 : vector<8x128xf32>
    %75 = arith.mulf %69, %74 : vector<8x128xf32>
    %76 = arith.truncf %75 : vector<8x128xf32> to vector<8x128xbf16>
    %77 = vector.extract_strided_slice %76 {offsets = [0, 0], sizes = [8, 64], strides = [1, 1]} : vector<8x128xbf16> to vector<8x64xbf16>
    %c0_37 = arith.constant 0 : index
    %c0_38 = arith.constant 0 : index
    %78 = vector.load %arg11[%c0_37, %c0_38] : memref<64x32xbf16, #tpu.memory_space<vmem>>, vector<64x32xbf16>
    %cst_39 = arith.constant dense<0.000000e+00> : vector<8x32xf32>
    %79 = tpu.matmul %77, %78, %cst_39 {dimension_numbers = #tpu.dot_dimension_numbers<[1], [0], [0], [1], [0, 0, 1, 1], [], []>} : vector<8x64xbf16>, vector<64x32xbf16>, vector<8x32xf32> -> vector<8x32xf32>
    %80 = vector.shape_cast %16 : vector<32xf32> to vector<1x32xf32>
    %81 = vector.broadcast %80 : vector<1x32xf32> to vector<8x32xf32>
    %82 = arith.addf %79, %81 : vector<8x32xf32>
    %83 = vector.extract_strided_slice %76 {offsets = [0, 64], sizes = [8, 64], strides = [1, 1]} : vector<8x128xbf16> to vector<8x64xbf16>
    %c0_40 = arith.constant 0 : index
    %c0_41 = arith.constant 0 : index
    %84 = vector.load %arg13[%c0_40, %c0_41] : memref<64x32xbf16, #tpu.memory_space<vmem>>, vector<64x32xbf16>
    %cst_42 = arith.constant dense<0.000000e+00> : vector<8x32xf32>
    %85 = tpu.matmul %83, %84, %cst_42 {dimension_numbers = #tpu.dot_dimension_numbers<[1], [0], [0], [1], [0, 0, 1, 1], [], []>} : vector<8x64xbf16>, vector<64x32xbf16>, vector<8x32xf32> -> vector<8x32xf32>
    %86 = vector.shape_cast %18 : vector<32xf32> to vector<1x32xf32>
    %87 = vector.broadcast %86 : vector<1x32xf32> to vector<8x32xf32>
    %88 = arith.addf %85, %87 : vector<8x32xf32>
    %89 = arith.truncf %64 : vector<8x32xf32> to vector<8x32xbf16>
    %90 = vector.shape_cast %89 : vector<8x32xbf16> to vector<1x8x32xbf16>
    %91 = arith.truncf %82 : vector<8x32xf32> to vector<8x32xbf16>
    %92 = vector.shape_cast %91 : vector<8x32xbf16> to vector<1x8x32xbf16>
    %93 = arith.truncf %88 : vector<8x32xf32> to vector<8x32xbf16>
    %94 = vector.shape_cast %93 : vector<8x32xbf16> to vector<1x8x32xbf16>
    %95 = vector.extract_strided_slice %90 {offsets = [0, 0, 0], sizes = [1, 8, 8], strides = [1, 1, 1]} : vector<1x8x32xbf16> to vector<1x8x8xbf16>
    %96 = vector.extract_strided_slice %92 {offsets = [0, 0, 0], sizes = [1, 8, 8], strides = [1, 1, 1]} : vector<1x8x32xbf16> to vector<1x8x8xbf16>
    "tpu.trace_start"() <{level = 10 : i32, message = "bqd,bkd->bqk"}> : () -> ()
    %cst_43 = arith.constant dense<0.000000e+00> : vector<1x8x8xf32>
    %97 = tpu.matmul %95, %96, %cst_43 {dimension_numbers = #tpu.dot_dimension_numbers<[2], [2], [1], [1], [0, 0, 0, 1, 1, 1], [0], [0]>} : vector<1x8x8xbf16>, vector<1x8x8xbf16>, vector<1x8x8xf32> -> vector<1x8x8xf32>
    "tpu.trace_stop"() : () -> ()
    %cst_44 = arith.constant dense<0xFF800000> : vector<1x8xf32>
    %98 = vector.multi_reduction <maximumf>, %97, %cst_44 [2] : vector<1x8x8xf32> to vector<1x8xf32>
    %99 = vector.shape_cast %98 : vector<1x8xf32> to vector<1x8x1xf32>
    %100 = vector.broadcast %99 : vector<1x8x1xf32> to vector<1x8x8xf32>
    %101 = arith.subf %97, %100 : vector<1x8x8xf32>
    %102 = math.exp %101 : vector<1x8x8xf32>
    %cst_45 = arith.constant dense<0.000000e+00> : vector<1x8xf32>
    %103 = vector.multi_reduction <add>, %102, %cst_45 [2] : vector<1x8x8xf32> to vector<1x8xf32>
    %104 = vector.shape_cast %103 : vector<1x8xf32> to vector<1x8x1xf32>
    %105 = tpu.reciprocal %104 {approx = true} : vector<1x8x1xf32> -> vector<1x8x1xf32>
    %106 = vector.broadcast %105 : vector<1x8x1xf32> to vector<1x8x8xf32>
    %107 = arith.mulf %102, %106 : vector<1x8x8xf32>
    %108 = arith.truncf %107 : vector<1x8x8xf32> to vector<1x8x8xbf16>
    %109 = vector.extract_strided_slice %94 {offsets = [0, 0, 0], sizes = [1, 8, 8], strides = [1, 1, 1]} : vector<1x8x32xbf16> to vector<1x8x8xbf16>
    "tpu.trace_start"() <{level = 10 : i32, message = "bqk,bkd->bqd"}> : () -> ()
    %cst_46 = arith.constant dense<0.000000e+00> : vector<1x8x8xf32>
    %110 = tpu.matmul %108, %109, %cst_46 {dimension_numbers = #tpu.dot_dimension_numbers<[2], [1], [1], [2], [0, 0, 0, 1, 1, 2], [0], [0]>} : vector<1x8x8xbf16>, vector<1x8x8xbf16>, vector<1x8x8xf32> -> vector<1x8x8xf32>
    "tpu.trace_stop"() : () -> ()
    %111 = vector.extract_strided_slice %90 {offsets = [0, 0, 8], sizes = [1, 8, 8], strides = [1, 1, 1]} : vector<1x8x32xbf16> to vector<1x8x8xbf16>
    %112 = vector.extract_strided_slice %92 {offsets = [0, 0, 8], sizes = [1, 8, 8], strides = [1, 1, 1]} : vector<1x8x32xbf16> to vector<1x8x8xbf16>
    "tpu.trace_start"() <{level = 10 : i32, message = "bqd,bkd->bqk"}> : () -> ()
    %cst_47 = arith.constant dense<0.000000e+00> : vector<1x8x8xf32>
    %113 = tpu.matmul %111, %112, %cst_47 {dimension_numbers = #tpu.dot_dimension_numbers<[2], [2], [1], [1], [0, 0, 0, 1, 1, 1], [0], [0]>} : vector<1x8x8xbf16>, vector<1x8x8xbf16>, vector<1x8x8xf32> -> vector<1x8x8xf32>
    "tpu.trace_stop"() : () -> ()
    %cst_48 = arith.constant dense<0xFF800000> : vector<1x8xf32>
    %114 = vector.multi_reduction <maximumf>, %113, %cst_48 [2] : vector<1x8x8xf32> to vector<1x8xf32>
    %115 = vector.shape_cast %114 : vector<1x8xf32> to vector<1x8x1xf32>
    %116 = vector.broadcast %115 : vector<1x8x1xf32> to vector<1x8x8xf32>
    %117 = arith.subf %113, %116 : vector<1x8x8xf32>
    %118 = math.exp %117 : vector<1x8x8xf32>
    %cst_49 = arith.constant dense<0.000000e+00> : vector<1x8xf32>
    %119 = vector.multi_reduction <add>, %118, %cst_49 [2] : vector<1x8x8xf32> to vector<1x8xf32>
    %120 = vector.shape_cast %119 : vector<1x8xf32> to vector<1x8x1xf32>
    %121 = tpu.reciprocal %120 {approx = true} : vector<1x8x1xf32> -> vector<1x8x1xf32>
    %122 = vector.broadcast %121 : vector<1x8x1xf32> to vector<1x8x8xf32>
    %123 = arith.mulf %118, %122 : vector<1x8x8xf32>
    %124 = arith.truncf %123 : vector<1x8x8xf32> to vector<1x8x8xbf16>
    %125 = vector.extract_strided_slice %94 {offsets = [0, 0, 8], sizes = [1, 8, 8], strides = [1, 1, 1]} : vector<1x8x32xbf16> to vector<1x8x8xbf16>
    "tpu.trace_start"() <{level = 10 : i32, message = "bqk,bkd->bqd"}> : () -> ()
    %cst_50 = arith.constant dense<0.000000e+00> : vector<1x8x8xf32>
    %126 = tpu.matmul %124, %125, %cst_50 {dimension_numbers = #tpu.dot_dimension_numbers<[2], [1], [1], [2], [0, 0, 0, 1, 1, 2], [0], [0]>} : vector<1x8x8xbf16>, vector<1x8x8xbf16>, vector<1x8x8xf32> -> vector<1x8x8xf32>
    "tpu.trace_stop"() : () -> ()
    %127 = vector.extract_strided_slice %90 {offsets = [0, 0, 16], sizes = [1, 8, 8], strides = [1, 1, 1]} : vector<1x8x32xbf16> to vector<1x8x8xbf16>
    %128 = vector.extract_strided_slice %92 {offsets = [0, 0, 16], sizes = [1, 8, 8], strides = [1, 1, 1]} : vector<1x8x32xbf16> to vector<1x8x8xbf16>
    "tpu.trace_start"() <{level = 10 : i32, message = "bqd,bkd->bqk"}> : () -> ()
    %cst_51 = arith.constant dense<0.000000e+00> : vector<1x8x8xf32>
    %129 = tpu.matmul %127, %128, %cst_51 {dimension_numbers = #tpu.dot_dimension_numbers<[2], [2], [1], [1], [0, 0, 0, 1, 1, 1], [0], [0]>} : vector<1x8x8xbf16>, vector<1x8x8xbf16>, vector<1x8x8xf32> -> vector<1x8x8xf32>
    "tpu.trace_stop"() : () -> ()
    %cst_52 = arith.constant dense<0xFF800000> : vector<1x8xf32>
    %130 = vector.multi_reduction <maximumf>, %129, %cst_52 [2] : vector<1x8x8xf32> to vector<1x8xf32>
    %131 = vector.shape_cast %130 : vector<1x8xf32> to vector<1x8x1xf32>
    %132 = vector.broadcast %131 : vector<1x8x1xf32> to vector<1x8x8xf32>
    %133 = arith.subf %129, %132 : vector<1x8x8xf32>
    %134 = math.exp %133 : vector<1x8x8xf32>
    %cst_53 = arith.constant dense<0.000000e+00> : vector<1x8xf32>
    %135 = vector.multi_reduction <add>, %134, %cst_53 [2] : vector<1x8x8xf32> to vector<1x8xf32>
    %136 = vector.shape_cast %135 : vector<1x8xf32> to vector<1x8x1xf32>
    %137 = tpu.reciprocal %136 {approx = true} : vector<1x8x1xf32> -> vector<1x8x1xf32>
    %138 = vector.broadcast %137 : vector<1x8x1xf32> to vector<1x8x8xf32>
    %139 = arith.mulf %134, %138 : vector<1x8x8xf32>
    %140 = arith.truncf %139 : vector<1x8x8xf32> to vector<1x8x8xbf16>
    %141 = vector.extract_strided_slice %94 {offsets = [0, 0, 16], sizes = [1, 8, 8], strides = [1, 1, 1]} : vector<1x8x32xbf16> to vector<1x8x8xbf16>
    "tpu.trace_start"() <{level = 10 : i32, message = "bqk,bkd->bqd"}> : () -> ()
    %cst_54 = arith.constant dense<0.000000e+00> : vector<1x8x8xf32>
    %142 = tpu.matmul %140, %141, %cst_54 {dimension_numbers = #tpu.dot_dimension_numbers<[2], [1], [1], [2], [0, 0, 0, 1, 1, 2], [0], [0]>} : vector<1x8x8xbf16>, vector<1x8x8xbf16>, vector<1x8x8xf32> -> vector<1x8x8xf32>
    "tpu.trace_stop"() : () -> ()
    %143 = vector.extract_strided_slice %90 {offsets = [0, 0, 24], sizes = [1, 8, 8], strides = [1, 1, 1]} : vector<1x8x32xbf16> to vector<1x8x8xbf16>
    %144 = vector.extract_strided_slice %92 {offsets = [0, 0, 24], sizes = [1, 8, 8], strides = [1, 1, 1]} : vector<1x8x32xbf16> to vector<1x8x8xbf16>
    "tpu.trace_start"() <{level = 10 : i32, message = "bqd,bkd->bqk"}> : () -> ()
    %cst_55 = arith.constant dense<0.000000e+00> : vector<1x8x8xf32>
    %145 = tpu.matmul %143, %144, %cst_55 {dimension_numbers = #tpu.dot_dimension_numbers<[2], [2], [1], [1], [0, 0, 0, 1, 1, 1], [0], [0]>} : vector<1x8x8xbf16>, vector<1x8x8xbf16>, vector<1x8x8xf32> -> vector<1x8x8xf32>
    "tpu.trace_stop"() : () -> ()
    %cst_56 = arith.constant dense<0xFF800000> : vector<1x8xf32>
    %146 = vector.multi_reduction <maximumf>, %145, %cst_56 [2] : vector<1x8x8xf32> to vector<1x8xf32>
    %147 = vector.shape_cast %146 : vector<1x8xf32> to vector<1x8x1xf32>
    %148 = vector.broadcast %147 : vector<1x8x1xf32> to vector<1x8x8xf32>
    %149 = arith.subf %145, %148 : vector<1x8x8xf32>
    %150 = math.exp %149 : vector<1x8x8xf32>
    %cst_57 = arith.constant dense<0.000000e+00> : vector<1x8xf32>
    %151 = vector.multi_reduction <add>, %150, %cst_57 [2] : vector<1x8x8xf32> to vector<1x8xf32>
    %152 = vector.shape_cast %151 : vector<1x8xf32> to vector<1x8x1xf32>
    %153 = tpu.reciprocal %152 {approx = true} : vector<1x8x1xf32> -> vector<1x8x1xf32>
    %154 = vector.broadcast %153 : vector<1x8x1xf32> to vector<1x8x8xf32>
    %155 = arith.mulf %150, %154 : vector<1x8x8xf32>
    %156 = arith.truncf %155 : vector<1x8x8xf32> to vector<1x8x8xbf16>
    %157 = vector.extract_strided_slice %94 {offsets = [0, 0, 24], sizes = [1, 8, 8], strides = [1, 1, 1]} : vector<1x8x32xbf16> to vector<1x8x8xbf16>
    "tpu.trace_start"() <{level = 10 : i32, message = "bqk,bkd->bqd"}> : () -> ()
    %cst_58 = arith.constant dense<0.000000e+00> : vector<1x8x8xf32>
    %158 = tpu.matmul %156, %157, %cst_58 {dimension_numbers = #tpu.dot_dimension_numbers<[2], [1], [1], [2], [0, 0, 0, 1, 1, 2], [0], [0]>} : vector<1x8x8xbf16>, vector<1x8x8xbf16>, vector<1x8x8xf32> -> vector<1x8x8xf32>
    "tpu.trace_stop"() : () -> ()
    %159 = tpu.concatenate %110, %126, %142, %158 in 2 : vector<1x8x8xf32>, vector<1x8x8xf32>, vector<1x8x8xf32>, vector<1x8x8xf32> -> vector<1x8x32xf32>
    %160 = vector.shape_cast %159 : vector<1x8x32xf32> to vector<8x32xf32>
    %161 = arith.truncf %160 : vector<8x32xf32> to vector<8x32xbf16>
    %c0_59 = arith.constant 0 : index
    %c0_60 = arith.constant 0 : index
    %162 = vector.load %arg15[%c0_59, %c0_60] : memref<32x32xbf16, #tpu.memory_space<vmem>>, vector<32x32xbf16>
    %cst_61 = arith.constant dense<0.000000e+00> : vector<8x32xf32>
    %163 = tpu.matmul %161, %162, %cst_61 {dimension_numbers = #tpu.dot_dimension_numbers<[1], [0], [0], [1], [0, 0, 1, 1], [], []>} : vector<8x32xbf16>, vector<32x32xbf16>, vector<8x32xf32> -> vector<8x32xf32>
    %164 = vector.shape_cast %20 : vector<32xf32> to vector<1x32xf32>
    %165 = vector.broadcast %164 : vector<1x32xf32> to vector<8x32xf32>
    %166 = arith.addf %163, %165 : vector<8x32xf32>
    %167 = arith.addf %166, %1 : vector<8x32xf32>
    %168 = arith.negf %167 : vector<8x32xf32>
    %169 = math.exp %168 : vector<8x32xf32>
    %cst_62 = arith.constant 1.000000e+00 : f32
    %170 = vector.broadcast %cst_62 : f32 to vector<8x32xf32>
    %171 = arith.addf %170, %169 : vector<8x32xf32>
    %172 = arith.divf %170, %171 : vector<8x32xf32>
    %173 = arith.mulf %167, %172 : vector<8x32xf32>
    %174 = vector.shape_cast %173 : vector<8x32xf32> to vector<1x8x32xf32>
    %c0_63 = arith.constant 0 : index
    %c0_64 = arith.constant 0 : index
    %c0_65 = arith.constant 0 : index
    %175 = vector.load %arg17[%c0_63, %c0_64, %c0_65] : memref<1x8x32xf32, #tpu.memory_space<vmem>>, vector<1x8x32xf32>
    tpu.vector_store %arg17[%c0_63, %c0_64, %c0_65], %174 {strides = array<i32>} : memref<1x8x32xf32, #tpu.memory_space<vmem>>, vector<1x8x32xf32>,
    return
  }
  func.func @transform_0(%arg0: i32) -> (i32, i32, i32) {
    %c0_i32 = arith.constant 0 : i32
    %c0_i32_0 = arith.constant 0 : i32
    %c0_i32_1 = arith.constant 0 : i32
    return %arg0, %c0_i32, %c0_i32_0 : i32, i32, i32
  }
  func.func @transform_1(%arg0: i32) -> (i32, i32, i32) {
    %c0_i32 = arith.constant 0 : i32
    %c0_i32_0 = arith.constant 0 : i32
    %c0_i32_1 = arith.constant 0 : i32
    return %arg0, %c0_i32, %c0_i32_0 : i32, i32, i32
  }
  func.func @transform_2(%arg0: i32) -> (i32, i32) {
    %c0_i32 = arith.constant 0 : i32
    %c0_i32_0 = arith.constant 0 : i32
    %c0_i32_1 = arith.constant 0 : i32
    return %c0_i32, %c0_i32_0 : i32, i32
  }
  func.func @transform_3(%arg0: i32) -> (i32, i32) {
    %c0_i32 = arith.constant 0 : i32
    %c0_i32_0 = arith.constant 0 : i32
    %c0_i32_1 = arith.constant 0 : i32
    return %c0_i32, %c0_i32_0 : i32, i32
  }
  func.func @transform_4(%arg0: i32) -> (i32, i32) {
    %c0_i32 = arith.constant 0 : i32
    %c0_i32_0 = arith.constant 0 : i32
    %c0_i32_1 = arith.constant 0 : i32
    return %c0_i32, %c0_i32_0 : i32, i32
  }
  func.func @transform_5(%arg0: i32) -> (i32, i32) {
    %c0_i32 = arith.constant 0 : i32
    %c0_i32_0 = arith.constant 0 : i32
    %c0_i32_1 = arith.constant 0 : i32
    return %c0_i32, %c0_i32_0 : i32, i32
  }
  func.func @transform_6(%arg0: i32) -> (i32, i32) {
    %c0_i32 = arith.constant 0 : i32
    %c0_i32_0 = arith.constant 0 : i32
    %c0_i32_1 = arith.constant 0 : i32
    return %c0_i32, %c0_i32_0 : i32, i32
  }
  func.func @transform_7(%arg0: i32) -> (i32, i32) {
    %c0_i32 = arith.constant 0 : i32
    %c0_i32_0 = arith.constant 0 : i32
    %c0_i32_1 = arith.constant 0 : i32
    return %c0_i32, %c0_i32_0 : i32, i32
  }
  func.func @transform_8(%arg0: i32) -> (i32, i32) {
    %c0_i32 = arith.constant 0 : i32
    %c0_i32_0 = arith.constant 0 : i32
    %c0_i32_1 = arith.constant 0 : i32
    return %c0_i32, %c0_i32_0 : i32, i32
  }
  func.func @transform_9(%arg0: i32) -> (i32, i32) {
    %c0_i32 = arith.constant 0 : i32
    %c0_i32_0 = arith.constant 0 : i32
    %c0_i32_1 = arith.constant 0 : i32
    return %c0_i32, %c0_i32_0 : i32, i32
  }
  func.func @transform_10(%arg0: i32) -> (i32, i32) {
    %c0_i32 = arith.constant 0 : i32
    %c0_i32_0 = arith.constant 0 : i32
    %c0_i32_1 = arith.constant 0 : i32
    return %c0_i32, %c0_i32_0 : i32, i32
  }
  func.func @transform_11(%arg0: i32) -> (i32, i32) {
    %c0_i32 = arith.constant 0 : i32
    %c0_i32_0 = arith.constant 0 : i32
    %c0_i32_1 = arith.constant 0 : i32
    return %c0_i32, %c0_i32_0 : i32, i32
  }
  func.func @transform_12(%arg0: i32) -> (i32, i32) {
    %c0_i32 = arith.constant 0 : i32
    %c0_i32_0 = arith.constant 0 : i32
    %c0_i32_1 = arith.constant 0 : i32
    return %c0_i32, %c0_i32_0 : i32, i32
  }
  func.func @transform_13(%arg0: i32) -> (i32, i32) {
    %c0_i32 = arith.constant 0 : i32
    %c0_i32_0 = arith.constant 0 : i32
    %c0_i32_1 = arith.constant 0 : i32
    return %c0_i32, %c0_i32_0 : i32, i32
  }
  func.func @transform_14(%arg0: i32) -> (i32, i32) {
    %c0_i32 = arith.constant 0 : i32
    %c0_i32_0 = arith.constant 0 : i32
    %c0_i32_1 = arith.constant 0 : i32
    return %c0_i32, %c0_i32_0 : i32, i32
  }
  func.func @transform_15(%arg0: i32) -> (i32, i32) {
    %c0_i32 = arith.constant 0 : i32
    %c0_i32_0 = arith.constant 0 : i32
    %c0_i32_1 = arith.constant 0 : i32
    return %c0_i32, %c0_i32_0 : i32, i32
  }
  func.func @transform_16(%arg0: i32) -> (i32, i32, i32) {
    %c0_i32 = arith.constant 0 : i32
    %c0_i32_0 = arith.constant 0 : i32
    %c0_i32_1 = arith.constant 0 : i32
    return %arg0, %c0_i32, %c0_i32_0 : i32, i32, i32
  }
}

module attributes {stable_mosaic.version = 11 : i64} {
  func.func @_cross_attn_kernel(%arg0: i32, %arg1: memref<1x8x32xf32, #tpu.memory_space<vmem>>, %arg2: memref<1x8x32xf32, #tpu.memory_space<vmem>>, %arg3: memref<1x32xf32, #tpu.memory_space<vmem>>, %arg4: memref<1x32xf32, #tpu.memory_space<vmem>>, %arg5: memref<32x64xbf16, #tpu.memory_space<vmem>>, %arg6: memref<1x64xf32, #tpu.memory_space<vmem>>, %arg7: memref<64x32xbf16, #tpu.memory_space<vmem>>, %arg8: memref<1x32xf32, #tpu.memory_space<vmem>>, %arg9: memref<32x128xbf16, #tpu.memory_space<vmem>>, %arg10: memref<1x128xf32, #tpu.memory_space<vmem>>, %arg11: memref<64x32xbf16, #tpu.memory_space<vmem>>, %arg12: memref<1x32xf32, #tpu.memory_space<vmem>>, %arg13: memref<64x32xbf16, #tpu.memory_space<vmem>>, %arg14: memref<1x32xf32, #tpu.memory_space<vmem>>, %arg15: memref<32x32xbf16, #tpu.memory_space<vmem>>, %arg16: memref<1x32xf32, #tpu.memory_space<vmem>>, %arg17: memref<1x8x32xf32, #tpu.memory_space<vmem>>) attributes {dimension_semantics = [#tpu.dimension_semantics<parallel>], iteration_bounds = array<i64: 2>, scalar_prefetch = 0 : i64, scratch_operands = 0 : i64, tpu.core_type = #tpu.core_type<tc>, window_params = [{transform_indices = @transform_0, window_bounds = array<i64: 1, 8, 32>}, {transform_indices = @transform_1, window_bounds = array<i64: 1, 8, 32>}, {pipeline_mode = #tpu.pipeline_mode<synchronous>, transform_indices = @transform_2, window_bounds = array<i64: 1, 32>}, {pipeline_mode = #tpu.pipeline_mode<synchronous>, transform_indices = @transform_3, window_bounds = array<i64: 1, 32>}, {pipeline_mode = #tpu.pipeline_mode<synchronous>, transform_indices = @transform_4, window_bounds = array<i64: 32, 64>}, {pipeline_mode = #tpu.pipeline_mode<synchronous>, transform_indices = @transform_5, window_bounds = array<i64: 1, 64>}, {pipeline_mode = #tpu.pipeline_mode<synchronous>, transform_indices = @transform_6, window_bounds = array<i64: 64, 32>}, {pipeline_mode = #tpu.pipeline_mode<synchronous>, transform_indices = @transform_7, window_bounds = array<i64: 1, 32>}, {pipeline_mode = #tpu.pipeline_mode<synchronous>, transform_indices = @transform_8, window_bounds = array<i64: 32, 128>}, {pipeline_mode = #tpu.pipeline_mode<synchronous>, transform_indices = @transform_9, window_bounds = array<i64: 1, 128>}, {pipeline_mode = #tpu.pipeline_mode<synchronous>, transform_indices = @transform_10, window_bounds = array<i64: 64, 32>}, {pipeline_mode = #tpu.pipeline_mode<synchronous>, transform_indices = @transform_11, window_bounds = array<i64: 1, 32>}, {pipeline_mode = #tpu.pipeline_mode<synchronous>, transform_indices = @transform_12, window_bounds = array<i64: 64, 32>}, {pipeline_mode = #tpu.pipeline_mode<synchronous>, transform_indices = @transform_13, window_bounds = array<i64: 1, 32>}, {pipeline_mode = #tpu.pipeline_mode<synchronous>, transform_indices = @transform_14, window_bounds = array<i64: 32, 32>}, {pipeline_mode = #tpu.pipeline_mode<synchronous>, transform_indices = @transform_15, window_bounds = array<i64: 1, 32>}, {transform_indices = @transform_16, window_bounds = array<i64: 1, 8, 32>}]} {
    %c0 = arith.constant 0 : index
    %c0_0 = arith.constant 0 : index
    %c0_1 = arith.constant 0 : index
    %0 = vector.load %arg1[%c0, %c0_0, %c0_1] : memref<1x8x32xf32, #tpu.memory_space<vmem>>, vector<1x8x32xf32>
    %1 = vector.shape_cast %0 : vector<1x8x32xf32> to vector<8x32xf32>
    %c0_2 = arith.constant 0 : index
    %c0_3 = arith.constant 0 : index
    %c0_4 = arith.constant 0 : index
    %2 = vector.load %arg2[%c0_2, %c0_3, %c0_4] : memref<1x8x32xf32, #tpu.memory_space<vmem>>, vector<1x8x32xf32>
    %3 = vector.shape_cast %2 : vector<1x8x32xf32> to vector<8x32xf32>
    %4 = arith.truncf %3 : vector<8x32xf32> to vector<8x32xbf16>
    %c0_5 = arith.constant 0 : index
    %c0_6 = arith.constant 0 : index
    %5 = vector.load %arg3[%c0_5, %c0_6] : memref<1x32xf32, #tpu.memory_space<vmem>>, vector<1x32xf32>
    %6 = vector.shape_cast %5 : vector<1x32xf32> to vector<32xf32>
    %c0_7 = arith.constant 0 : index
    %c0_8 = arith.constant 0 : index
    %7 = vector.load %arg4[%c0_7, %c0_8] : memref<1x32xf32, #tpu.memory_space<vmem>>, vector<1x32xf32>
    %8 = vector.shape_cast %7 : vector<1x32xf32> to vector<32xf32>
    %c0_9 = arith.constant 0 : index
    %c0_10 = arith.constant 0 : index
    %9 = vector.load %arg6[%c0_9, %c0_10] : memref<1x64xf32, #tpu.memory_space<vmem>>, vector<1x64xf32>
    %10 = vector.shape_cast %9 : vector<1x64xf32> to vector<64xf32>
    %c0_11 = arith.constant 0 : index
    %c0_12 = arith.constant 0 : index
    %11 = vector.load %arg8[%c0_11, %c0_12] : memref<1x32xf32, #tpu.memory_space<vmem>>, vector<1x32xf32>
    %12 = vector.shape_cast %11 : vector<1x32xf32> to vector<32xf32>
    %c0_13 = arith.constant 0 : index
    %c0_14 = arith.constant 0 : index
    %13 = vector.load %arg10[%c0_13, %c0_14] : memref<1x128xf32, #tpu.memory_space<vmem>>, vector<1x128xf32>
    %14 = vector.shape_cast %13 : vector<1x128xf32> to vector<128xf32>
    %c0_15 = arith.constant 0 : index
    %c0_16 = arith.constant 0 : index
    %15 = vector.load %arg12[%c0_15, %c0_16] : memref<1x32xf32, #tpu.memory_space<vmem>>, vector<1x32xf32>
    %16 = vector.shape_cast %15 : vector<1x32xf32> to vector<32xf32>
    %c0_17 = arith.constant 0 : index
    %c0_18 = arith.constant 0 : index
    %17 = vector.load %arg14[%c0_17, %c0_18] : memref<1x32xf32, #tpu.memory_space<vmem>>, vector<1x32xf32>
    %18 = vector.shape_cast %17 : vector<1x32xf32> to vector<32xf32>
    %c0_19 = arith.constant 0 : index
    %c0_20 = arith.constant 0 : index
    %19 = vector.load %arg16[%c0_19, %c0_20] : memref<1x32xf32, #tpu.memory_space<vmem>>, vector<1x32xf32>
    %20 = vector.shape_cast %19 : vector<1x32xf32> to vector<32xf32>
    %cst = arith.constant dense<0.000000e+00> : vector<8xf32>
    %21 = vector.multi_reduction <add>, %1, %cst [1] : vector<8x32xf32> to vector<8xf32>
    %22 = vector.shape_cast %21 : vector<8xf32> to vector<8x1xf32>
    %cst_21 = arith.constant 3.200000e+01 : f32
    %23 = vector.broadcast %cst_21 : f32 to vector<8x1xf32>
    %24 = arith.divf %22, %23 : vector<8x1xf32>
    %25 = vector.broadcast %24 : vector<8x1xf32> to vector<8x32xf32>
    %26 = arith.subf %1, %25 : vector<8x32xf32>
    %27 = arith.mulf %26, %26 : vector<8x32xf32>
    %cst_22 = arith.constant dense<0.000000e+00> : vector<8xf32>
    %28 = vector.multi_reduction <add>, %27, %cst_22 [1] : vector<8x32xf32> to vector<8xf32>
    %29 = vector.shape_cast %28 : vector<8xf32> to vector<8x1xf32>
    %cst_23 = arith.constant 3.200000e+01 : f32
    %30 = vector.broadcast %cst_23 : f32 to vector<8x1xf32>
    %31 = arith.divf %29, %30 : vector<8x1xf32>
    %32 = vector.broadcast %24 : vector<8x1xf32> to vector<8x32xf32>
    %33 = arith.subf %1, %32 : vector<8x32xf32>
    %cst_24 = arith.constant 9.99999974E-6 : f32
    %34 = vector.broadcast %cst_24 : f32 to vector<8x1xf32>
    %35 = arith.addf %31, %34 : vector<8x1xf32>
    %36 = math.rsqrt %35 : vector<8x1xf32>
    %37 = vector.broadcast %36 : vector<8x1xf32> to vector<8x32xf32>
    %38 = arith.mulf %33, %37 : vector<8x32xf32>
    %39 = vector.shape_cast %6 : vector<32xf32> to vector<1x32xf32>
    %40 = vector.broadcast %39 : vector<1x32xf32> to vector<8x32xf32>
    %41 = arith.mulf %38, %40 : vector<8x32xf32>
    %42 = vector.shape_cast %8 : vector<32xf32> to vector<1x32xf32>
    %43 = vector.broadcast %42 : vector<1x32xf32> to vector<8x32xf32>
    %44 = arith.addf %41, %43 : vector<8x32xf32>
    %45 = arith.truncf %44 : vector<8x32xf32> to vector<8x32xbf16>
    %c0_25 = arith.constant 0 : index
    %c0_26 = arith.constant 0 : index
    %46 = vector.load %arg5[%c0_25, %c0_26] : memref<32x64xbf16, #tpu.memory_space<vmem>>, vector<32x64xbf16>
    %cst_27 = arith.constant dense<0.000000e+00> : vector<8x64xf32>
    %47 = tpu.matmul %45, %46, %cst_27 {dimension_numbers = #tpu.dot_dimension_numbers<[1], [0], [0], [1], [0, 0, 1, 1], [], []>} : vector<8x32xbf16>, vector<32x64xbf16>, vector<8x64xf32> -> vector<8x64xf32>
    %48 = vector.shape_cast %10 : vector<64xf32> to vector<1x64xf32>
    %49 = vector.broadcast %48 : vector<1x64xf32> to vector<8x64xf32>
    %50 = arith.addf %47, %49 : vector<8x64xf32>
    %51 = arith.negf %50 : vector<8x64xf32>
    %52 = math.exp %51 : vector<8x64xf32>
    %cst_28 = arith.constant 1.000000e+00 : f32
    %53 = vector.broadcast %cst_28 : f32 to vector<8x64xf32>
    %54 = arith.addf %53, %52 : vector<8x64xf32>
    %55 = arith.divf %53, %54 : vector<8x64xf32>
    %56 = arith.mulf %50, %55 : vector<8x64xf32>
    %57 = arith.truncf %56 : vector<8x64xf32> to vector<8x64xbf16>
    %c0_29 = arith.constant 0 : index
    %c0_30 = arith.constant 0 : index
    %58 = vector.load %arg7[%c0_29, %c0_30] : memref<64x32xbf16, #tpu.memory_space<vmem>>, vector<64x32xbf16>
    %cst_31 = arith.constant dense<0.000000e+00> : vector<8x32xf32>
    %59 = tpu.matmul %57, %58, %cst_31 {dimension_numbers = #tpu.dot_dimension_numbers<[1], [0], [0], [1], [0, 0, 1, 1], [], []>} : vector<8x64xbf16>, vector<64x32xbf16>, vector<8x32xf32> -> vector<8x32xf32>
    %60 = vector.shape_cast %12 : vector<32xf32> to vector<1x32xf32>
    %61 = vector.broadcast %60 : vector<1x32xf32> to vector<8x32xf32>
    %62 = arith.addf %59, %61 : vector<8x32xf32>
    %cst_32 = arith.constant 0.353553385 : f32
    %63 = vector.broadcast %cst_32 : f32 to vector<8x32xf32>
    %64 = arith.mulf %62, %63 : vector<8x32xf32>
    %c0_33 = arith.constant 0 : index
    %c0_34 = arith.constant 0 : index
    %65 = vector.load %arg9[%c0_33, %c0_34] : memref<32x128xbf16, #tpu.memory_space<vmem>>, vector<32x128xbf16>
    %cst_35 = arith.constant dense<0.000000e+00> : vector<8x128xf32>
    %66 = tpu.matmul %4, %65, %cst_35 {dimension_numbers = #tpu.dot_dimension_numbers<[1], [0], [0], [1], [0, 0, 1, 1], [], []>} : vector<8x32xbf16>, vector<32x128xbf16>, vector<8x128xf32> -> vector<8x128xf32>
    %67 = vector.shape_cast %14 : vector<128xf32> to vector<1x128xf32>
    %68 = vector.broadcast %67 : vector<1x128xf32> to vector<8x128xf32>
    %69 = arith.addf %66, %68 : vector<8x128xf32>
    %70 = arith.negf %69 : vector<8x128xf32>
    %71 = math.exp %70 : vector<8x128xf32>
    %cst_36 = arith.constant 1.000000e+00 : f32
    %72 = vector.broadcast %cst_36 : f32 to vector<8x128xf32>
    %73 = arith.addf %72, %71 : vector<8x128xf32>
    %74 = arith.divf %72, %73 : vector<8x128xf32>
    %75 = arith.mulf %69, %74 : vector<8x128xf32>
    %76 = arith.truncf %75 : vector<8x128xf32> to vector<8x128xbf16>
    %77 = vector.extract_strided_slice %76 {offsets = [0, 0], sizes = [8, 64], strides = [1, 1]} : vector<8x128xbf16> to vector<8x64xbf16>
    %c0_37 = arith.constant 0 : index
    %c0_38 = arith.constant 0 : index
    %78 = vector.load %arg11[%c0_37, %c0_38] : memref<64x32xbf16, #tpu.memory_space<vmem>>, vector<64x32xbf16>
    %cst_39 = arith.constant dense<0.000000e+00> : vector<8x32xf32>
    %79 = tpu.matmul %77, %78, %cst_39 {dimension_numbers = #tpu.dot_dimension_numbers<[1], [0], [0], [1], [0, 0, 1, 1], [], []>} : vector<8x64xbf16>, vector<64x32xbf16>, vector<8x32xf32> -> vector<8x32xf32>
    %80 = vector.shape_cast %16 : vector<32xf32> to vector<1x32xf32>
    %81 = vector.broadcast %80 : vector<1x32xf32> to vector<8x32xf32>
    %82 = arith.addf %79, %81 : vector<8x32xf32>
    %83 = vector.extract_strided_slice %76 {offsets = [0, 64], sizes = [8, 64], strides = [1, 1]} : vector<8x128xbf16> to vector<8x64xbf16>
    %c0_40 = arith.constant 0 : index
    %c0_41 = arith.constant 0 : index
    %84 = vector.load %arg13[%c0_40, %c0_41] : memref<64x32xbf16, #tpu.memory_space<vmem>>, vector<64x32xbf16>
    %cst_42 = arith.constant dense<0.000000e+00> : vector<8x32xf32>
    %85 = tpu.matmul %83, %84, %cst_42 {dimension_numbers = #tpu.dot_dimension_numbers<[1], [0], [0], [1], [0, 0, 1, 1], [], []>} : vector<8x64xbf16>, vector<64x32xbf16>, vector<8x32xf32> -> vector<8x32xf32>
    %86 = vector.shape_cast %18 : vector<32xf32> to vector<1x32xf32>
    %87 = vector.broadcast %86 : vector<1x32xf32> to vector<8x32xf32>
    %88 = arith.addf %85, %87 : vector<8x32xf32>
    %89 = arith.truncf %64 : vector<8x32xf32> to vector<8x32xbf16>
    %90 = vector.shape_cast %89 : vector<8x32xbf16> to vector<1x8x32xbf16>
    %91 = arith.truncf %82 : vector<8x32xf32> to vector<8x32xbf16>
    %92 = vector.shape_cast %91 : vector<8x32xbf16> to vector<1x8x32xbf16>
    %93 = arith.truncf %88 : vector<8x32xf32> to vector<8x32xbf16>
    %94 = vector.shape_cast %93 : vector<8x32xbf16> to vector<1x8x32xbf16>
    %95 = vector.extract_strided_slice %90 {offsets = [0, 0, 0], sizes = [1, 8, 8], strides = [1, 1, 1]} : vector<1x8x32xbf16> to vector<1x8x8xbf16>
    %96 = vector.extract_strided_slice %92 {offsets = [0, 0, 0], sizes = [1, 8, 8], strides = [1, 1, 1]} : vector<1x8x32xbf16> to vector<1x8x8xbf16>
    "tpu.trace_start"() <{level = 10 : i32, message = "bqd,bkd->bqk"}> : () -> ()
    %cst_43 = arith.constant dense<0.000000e+00> : vector<1x8x8xf32>
    %97 = tpu.matmul %95, %96, %cst_43 {dimension_numbers = #tpu.dot_dimension_numbers<[2], [2], [1], [1], [0, 0, 0, 1, 1, 1], [0], [0]>} : vector<1x8x8xbf16>, vector<1x8x8xbf16>, vector<1x8x8xf32> -> vector<1x8x8xf32>
    "tpu.trace_stop"() : () -> ()
    %cst_44 = arith.constant dense<0xFF800000> : vector<1x8xf32>
    %98 = vector.multi_reduction <maximumf>, %97, %cst_44 [2] : vector<1x8x8xf32> to vector<1x8xf32>
    %99 = vector.shape_cast %98 : vector<1x8xf32> to vector<1x8x1xf32>
    %100 = vector.broadcast %99 : vector<1x8x1xf32> to vector<1x8x8xf32>
    %101 = arith.subf %97, %100 : vector<1x8x8xf32>
    %102 = math.exp %101 : vector<1x8x8xf32>
    %cst_45 = arith.constant dense<0.000000e+00> : vector<1x8xf32>
    %103 = vector.multi_reduction <add>, %102, %cst_45 [2] : vector<1x8x8xf32> to vector<1x8xf32>
    %104 = vector.shape_cast %103 : vector<1x8xf32> to vector<1x8x1xf32>
    %105 = tpu.reciprocal %104 {approx = true} : vector<1x8x1xf32> -> vector<1x8x1xf32>
    %106 = vector.broadcast %105 : vector<1x8x1xf32> to vector<1x8x8xf32>
    %107 = arith.mulf %102, %106 : vector<1x8x8xf32>
    %108 = arith.truncf %107 : vector<1x8x8xf32> to vector<1x8x8xbf16>
    %109 = vector.extract_strided_slice %94 {offsets = [0, 0, 0], sizes = [1, 8, 8], strides = [1, 1, 1]} : vector<1x8x32xbf16> to vector<1x8x8xbf16>
    "tpu.trace_start"() <{level = 10 : i32, message = "bqk,bkd->bqd"}> : () -> ()
    %cst_46 = arith.constant dense<0.000000e+00> : vector<1x8x8xf32>
    %110 = tpu.matmul %108, %109, %cst_46 {dimension_numbers = #tpu.dot_dimension_numbers<[2], [1], [1], [2], [0, 0, 0, 1, 1, 2], [0], [0]>} : vector<1x8x8xbf16>, vector<1x8x8xbf16>, vector<1x8x8xf32> -> vector<1x8x8xf32>
    "tpu.trace_stop"() : () -> ()
    %111 = vector.extract_strided_slice %90 {offsets = [0, 0, 8], sizes = [1, 8, 8], strides = [1, 1, 1]} : vector<1x8x32xbf16> to vector<1x8x8xbf16>
    %112 = vector.extract_strided_slice %92 {offsets = [0, 0, 8], sizes = [1, 8, 8], strides = [1, 1, 1]} : vector<1x8x32xbf16> to vector<1x8x8xbf16>
    "tpu.trace_start"() <{level = 10 : i32, message = "bqd,bkd->bqk"}> : () -> ()
    %cst_47 = arith.constant dense<0.000000e+00> : vector<1x8x8xf32>
    %113 = tpu.matmul %111, %112, %cst_47 {dimension_numbers = #tpu.dot_dimension_numbers<[2], [2], [1], [1], [0, 0, 0, 1, 1, 1], [0], [0]>} : vector<1x8x8xbf16>, vector<1x8x8xbf16>, vector<1x8x8xf32> -> vector<1x8x8xf32>
    "tpu.trace_stop"() : () -> ()
    %cst_48 = arith.constant dense<0xFF800000> : vector<1x8xf32>
    %114 = vector.multi_reduction <maximumf>, %113, %cst_48 [2] : vector<1x8x8xf32> to vector<1x8xf32>
    %115 = vector.shape_cast %114 : vector<1x8xf32> to vector<1x8x1xf32>
    %116 = vector.broadcast %115 : vector<1x8x1xf32> to vector<1x8x8xf32>
    %117 = arith.subf %113, %116 : vector<1x8x8xf32>
    %118 = math.exp %117 : vector<1x8x8xf32>
    %cst_49 = arith.constant dense<0.000000e+00> : vector<1x8xf32>
    %119 = vector.multi_reduction <add>, %118, %cst_49 [2] : vector<1x8x8xf32> to vector<1x8xf32>
    %120 = vector.shape_cast %119 : vector<1x8xf32> to vector<1x8x1xf32>
    %121 = tpu.reciprocal %120 {approx = true} : vector<1x8x1xf32> -> vector<1x8x1xf32>
    %122 = vector.broadcast %121 : vector<1x8x1xf32> to vector<1x8x8xf32>
    %123 = arith.mulf %118, %122 : vector<1x8x8xf32>
    %124 = arith.truncf %123 : vector<1x8x8xf32> to vector<1x8x8xbf16>
    %125 = vector.extract_strided_slice %94 {offsets = [0, 0, 8], sizes = [1, 8, 8], strides = [1, 1, 1]} : vector<1x8x32xbf16> to vector<1x8x8xbf16>
    "tpu.trace_start"() <{level = 10 : i32, message = "bqk,bkd->bqd"}> : () -> ()
    %cst_50 = arith.constant dense<0.000000e+00> : vector<1x8x8xf32>
    %126 = tpu.matmul %124, %125, %cst_50 {dimension_numbers = #tpu.dot_dimension_numbers<[2], [1], [1], [2], [0, 0, 0, 1, 1, 2], [0], [0]>} : vector<1x8x8xbf16>, vector<1x8x8xbf16>, vector<1x8x8xf32> -> vector<1x8x8xf32>
    "tpu.trace_stop"() : () -> ()
    %127 = vector.extract_strided_slice %90 {offsets = [0, 0, 16], sizes = [1, 8, 8], strides = [1, 1, 1]} : vector<1x8x32xbf16> to vector<1x8x8xbf16>
    %128 = vector.extract_strided_slice %92 {offsets = [0, 0, 16], sizes = [1, 8, 8], strides = [1, 1, 1]} : vector<1x8x32xbf16> to vector<1x8x8xbf16>
    "tpu.trace_start"() <{level = 10 : i32, message = "bqd,bkd->bqk"}> : () -> ()
    %cst_51 = arith.constant dense<0.000000e+00> : vector<1x8x8xf32>
    %129 = tpu.matmul %127, %128, %cst_51 {dimension_numbers = #tpu.dot_dimension_numbers<[2], [2], [1], [1], [0, 0, 0, 1, 1, 1], [0], [0]>} : vector<1x8x8xbf16>, vector<1x8x8xbf16>, vector<1x8x8xf32> -> vector<1x8x8xf32>
    "tpu.trace_stop"() : () -> ()
    %cst_52 = arith.constant dense<0xFF800000> : vector<1x8xf32>
    %130 = vector.multi_reduction <maximumf>, %129, %cst_52 [2] : vector<1x8x8xf32> to vector<1x8xf32>
    %131 = vector.shape_cast %130 : vector<1x8xf32> to vector<1x8x1xf32>
    %132 = vector.broadcast %131 : vector<1x8x1xf32> to vector<1x8x8xf32>
    %133 = arith.subf %129, %132 : vector<1x8x8xf32>
    %134 = math.exp %133 : vector<1x8x8xf32>
    %cst_53 = arith.constant dense<0.000000e+00> : vector<1x8xf32>
    %135 = vector.multi_reduction <add>, %134, %cst_53 [2] : vector<1x8x8xf32> to vector<1x8xf32>
    %136 = vector.shape_cast %135 : vector<1x8xf32> to vector<1x8x1xf32>
    %137 = tpu.reciprocal %136 {approx = true} : vector<1x8x1xf32> -> vector<1x8x1xf32>
    %138 = vector.broadcast %137 : vector<1x8x1xf32> to vector<1x8x8xf32>
    %139 = arith.mulf %134, %138 : vector<1x8x8xf32>
    %140 = arith.truncf %139 : vector<1x8x8xf32> to vector<1x8x8xbf16>
    %141 = vector.extract_strided_slice %94 {offsets = [0, 0, 16], sizes = [1, 8, 8], strides = [1, 1, 1]} : vector<1x8x32xbf16> to vector<1x8x8xbf16>
    "tpu.trace_start"() <{level = 10 : i32, message = "bqk,bkd->bqd"}> : () -> ()
    %cst_54 = arith.constant dense<0.000000e+00> : vector<1x8x8xf32>
    %142 = tpu.matmul %140, %141, %cst_54 {dimension_numbers = #tpu.dot_dimension_numbers<[2], [1], [1], [2], [0, 0, 0, 1, 1, 2], [0], [0]>} : vector<1x8x8xbf16>, vector<1x8x8xbf16>, vector<1x8x8xf32> -> vector<1x8x8xf32>
    "tpu.trace_stop"() : () -> ()
    %143 = vector.extract_strided_slice %90 {offsets = [0, 0, 24], sizes = [1, 8, 8], strides = [1, 1, 1]} : vector<1x8x32xbf16> to vector<1x8x8xbf16>
    %144 = vector.extract_strided_slice %92 {offsets = [0, 0, 24], sizes = [1, 8, 8], strides = [1, 1, 1]} : vector<1x8x32xbf16> to vector<1x8x8xbf16>
    "tpu.trace_start"() <{level = 10 : i32, message = "bqd,bkd->bqk"}> : () -> ()
    %cst_55 = arith.constant dense<0.000000e+00> : vector<1x8x8xf32>
    %145 = tpu.matmul %143, %144, %cst_55 {dimension_numbers = #tpu.dot_dimension_numbers<[2], [2], [1], [1], [0, 0, 0, 1, 1, 1], [0], [0]>} : vector<1x8x8xbf16>, vector<1x8x8xbf16>, vector<1x8x8xf32> -> vector<1x8x8xf32>
    "tpu.trace_stop"() : () -> ()
    %cst_56 = arith.constant dense<0xFF800000> : vector<1x8xf32>
    %146 = vector.multi_reduction <maximumf>, %145, %cst_56 [2] : vector<1x8x8xf32> to vector<1x8xf32>
    %147 = vector.shape_cast %146 : vector<1x8xf32> to vector<1x8x1xf32>
    %148 = vector.broadcast %147 : vector<1x8x1xf32> to vector<1x8x8xf32>
    %149 = arith.subf %145, %148 : vector<1x8x8xf32>
    %150 = math.exp %149 : vector<1x8x8xf32>
    %cst_57 = arith.constant dense<0.000000e+00> : vector<1x8xf32>
    %151 = vector.multi_reduction <add>, %150, %cst_57 [2] : vector<1x8x8xf32> to vector<1x8xf32>
    %152 = vector.shape_cast %151 : vector<1x8xf32> to vector<1x8x1xf32>
    %153 = tpu.reciprocal %152 {approx = true} : vector<1x8x1xf32> -> vector<1x8x1xf32>
    %154 = vector.broadcast %153 : vector<1x8x1xf32> to vector<1x8x8xf32>
    %155 = arith.mulf %150, %154 : vector<1x8x8xf32>
    %156 = arith.truncf %155 : vector<1x8x8xf32> to vector<1x8x8xbf16>
    %157 = vector.extract_strided_slice %94 {offsets = [0, 0, 24], sizes = [1, 8, 8], strides = [1, 1, 1]} : vector<1x8x32xbf16> to vector<1x8x8xbf16>
    "tpu.trace_start"() <{level = 10 : i32, message = "bqk,bkd->bqd"}> : () -> ()
    %cst_58 = arith.constant dense<0.000000e+00> : vector<1x8x8xf32>
    %158 = tpu.matmul %156, %157, %cst_58 {dimension_numbers = #tpu.dot_dimension_numbers<[2], [1], [1], [2], [0, 0, 0, 1, 1, 2], [0], [0]>} : vector<1x8x8xbf16>, vector<1x8x8xbf16>, vector<1x8x8xf32> -> vector<1x8x8xf32>
    %cst_59 = arith.constant 0.000000e+00 : f32
    "tpu.trace_stop"() : () -> ()
    %159 = vector.broadcast %cst_59 : f32 to vector<8x32xf32>
    %160 = vector.shape_cast %110 : vector<1x8x8xf32> to vector<8x8xf32>
    %161 = arith.truncf %160 : vector<8x8xf32> to vector<8x8xbf16>
    %c0_60 = arith.constant 0 : index
    %c0_61 = arith.constant 0 : index
    %162 = vector.load %arg15[%c0_60, %c0_61] : memref<32x32xbf16, #tpu.memory_space<vmem>>, vector<8x32xbf16>
    %cst_62 = arith.constant dense<0.000000e+00> : vector<8x32xf32>
    %163 = tpu.matmul %161, %162, %cst_62 {dimension_numbers = #tpu.dot_dimension_numbers<[1], [0], [0], [1], [0, 0, 1, 1], [], []>} : vector<8x8xbf16>, vector<8x32xbf16>, vector<8x32xf32> -> vector<8x32xf32>
    %164 = arith.addf %159, %163 : vector<8x32xf32>
    %165 = vector.shape_cast %126 : vector<1x8x8xf32> to vector<8x8xf32>
    %166 = arith.truncf %165 : vector<8x8xf32> to vector<8x8xbf16>
    %c8 = arith.constant 8 : index
    %c0_63 = arith.constant 0 : index
    %167 = vector.load %arg15[%c8, %c0_63] : memref<32x32xbf16, #tpu.memory_space<vmem>>, vector<8x32xbf16>
    %cst_64 = arith.constant dense<0.000000e+00> : vector<8x32xf32>
    %168 = tpu.matmul %166, %167, %cst_64 {dimension_numbers = #tpu.dot_dimension_numbers<[1], [0], [0], [1], [0, 0, 1, 1], [], []>} : vector<8x8xbf16>, vector<8x32xbf16>, vector<8x32xf32> -> vector<8x32xf32>
    %169 = arith.addf %164, %168 : vector<8x32xf32>
    %170 = vector.shape_cast %142 : vector<1x8x8xf32> to vector<8x8xf32>
    %171 = arith.truncf %170 : vector<8x8xf32> to vector<8x8xbf16>
    %c16 = arith.constant 16 : index
    %c0_65 = arith.constant 0 : index
    %172 = vector.load %arg15[%c16, %c0_65] : memref<32x32xbf16, #tpu.memory_space<vmem>>, vector<8x32xbf16>
    %cst_66 = arith.constant dense<0.000000e+00> : vector<8x32xf32>
    %173 = tpu.matmul %171, %172, %cst_66 {dimension_numbers = #tpu.dot_dimension_numbers<[1], [0], [0], [1], [0, 0, 1, 1], [], []>} : vector<8x8xbf16>, vector<8x32xbf16>, vector<8x32xf32> -> vector<8x32xf32>
    %174 = arith.addf %169, %173 : vector<8x32xf32>
    %175 = vector.shape_cast %158 : vector<1x8x8xf32> to vector<8x8xf32>
    %176 = arith.truncf %175 : vector<8x8xf32> to vector<8x8xbf16>
    %c24 = arith.constant 24 : index
    %c0_67 = arith.constant 0 : index
    %177 = vector.load %arg15[%c24, %c0_67] : memref<32x32xbf16, #tpu.memory_space<vmem>>, vector<8x32xbf16>
    %cst_68 = arith.constant dense<0.000000e+00> : vector<8x32xf32>
    %178 = tpu.matmul %176, %177, %cst_68 {dimension_numbers = #tpu.dot_dimension_numbers<[1], [0], [0], [1], [0, 0, 1, 1], [], []>} : vector<8x8xbf16>, vector<8x32xbf16>, vector<8x32xf32> -> vector<8x32xf32>
    %179 = arith.addf %174, %178 : vector<8x32xf32>
    %180 = vector.shape_cast %20 : vector<32xf32> to vector<1x32xf32>
    %181 = vector.broadcast %180 : vector<1x32xf32> to vector<8x32xf32>
    %182 = arith.addf %179, %181 : vector<8x32xf32>
    %183 = arith.addf %182, %1 : vector<8x32xf32>
    %184 = arith.negf %183 : vector<8x32xf32>
    %185 = math.exp %184 : vector<8x32xf32>
    %cst_69 = arith.constant 1.000000e+00 : f32
    %186 = vector.broadcast %cst_69 : f32 to vector<8x32xf32>
    %187 = arith.addf %186, %185 : vector<8x32xf32>
    %188 = arith.divf %186, %187 : vector<8x32xf32>
    %189 = arith.mulf %183, %188 : vector<8x32xf32>
    %190 = vector.shape_cast %189 : vector<8x32xf32> to vector<1x8x32xf32>
    %c0_70 = arith.constant 0 : index
    %c0_71 = arith.constant 0 : index
    %c0_72 = arith.constant 0 : index
    %191 = vector.load %arg17[%c0_70, %c0_71, %c0_72] : memref<1x8x32xf32, #tpu.memory_space<vmem>>, vector<1x8x32xf32>
    tpu.vector_store %arg17[%c0_70, %c0_71, %c0_72], %190 {strides = array<i32>} : memref<1x8x32xf32, #tpu.memory_space<vmem>>, vector<1x8x32xf32>,
    return
  }
  func.func @transform_0(%arg0: i32) -> (i32, i32, i32) {
    %c0_i32 = arith.constant 0 : i32
    %c0_i32_0 = arith.constant 0 : i32
    %c0_i32_1 = arith.constant 0 : i32
    return %arg0, %c0_i32, %c0_i32_0 : i32, i32, i32
  }
  func.func @transform_1(%arg0: i32) -> (i32, i32, i32) {
    %c0_i32 = arith.constant 0 : i32
    %c0_i32_0 = arith.constant 0 : i32
    %c0_i32_1 = arith.constant 0 : i32
    return %arg0, %c0_i32, %c0_i32_0 : i32, i32, i32
  }
  func.func @transform_2(%arg0: i32) -> (i32, i32) {
    %c0_i32 = arith.constant 0 : i32
    %c0_i32_0 = arith.constant 0 : i32
    %c0_i32_1 = arith.constant 0 : i32
    return %c0_i32, %c0_i32_0 : i32, i32
  }
  func.func @transform_3(%arg0: i32) -> (i32, i32) {
    %c0_i32 = arith.constant 0 : i32
    %c0_i32_0 = arith.constant 0 : i32
    %c0_i32_1 = arith.constant 0 : i32
    return %c0_i32, %c0_i32_0 : i32, i32
  }
  func.func @transform_4(%arg0: i32) -> (i32, i32) {
    %c0_i32 = arith.constant 0 : i32
    %c0_i32_0 = arith.constant 0 : i32
    %c0_i32_1 = arith.constant 0 : i32
    return %c0_i32, %c0_i32_0 : i32, i32
  }
  func.func @transform_5(%arg0: i32) -> (i32, i32) {
    %c0_i32 = arith.constant 0 : i32
    %c0_i32_0 = arith.constant 0 : i32
    %c0_i32_1 = arith.constant 0 : i32
    return %c0_i32, %c0_i32_0 : i32, i32
  }
  func.func @transform_6(%arg0: i32) -> (i32, i32) {
    %c0_i32 = arith.constant 0 : i32
    %c0_i32_0 = arith.constant 0 : i32
    %c0_i32_1 = arith.constant 0 : i32
    return %c0_i32, %c0_i32_0 : i32, i32
  }
  func.func @transform_7(%arg0: i32) -> (i32, i32) {
    %c0_i32 = arith.constant 0 : i32
    %c0_i32_0 = arith.constant 0 : i32
    %c0_i32_1 = arith.constant 0 : i32
    return %c0_i32, %c0_i32_0 : i32, i32
  }
  func.func @transform_8(%arg0: i32) -> (i32, i32) {
    %c0_i32 = arith.constant 0 : i32
    %c0_i32_0 = arith.constant 0 : i32
    %c0_i32_1 = arith.constant 0 : i32
    return %c0_i32, %c0_i32_0 : i32, i32
  }
  func.func @transform_9(%arg0: i32) -> (i32, i32) {
    %c0_i32 = arith.constant 0 : i32
    %c0_i32_0 = arith.constant 0 : i32
    %c0_i32_1 = arith.constant 0 : i32
    return %c0_i32, %c0_i32_0 : i32, i32
  }
  func.func @transform_10(%arg0: i32) -> (i32, i32) {
    %c0_i32 = arith.constant 0 : i32
    %c0_i32_0 = arith.constant 0 : i32
    %c0_i32_1 = arith.constant 0 : i32
    return %c0_i32, %c0_i32_0 : i32, i32
  }
  func.func @transform_11(%arg0: i32) -> (i32, i32) {
    %c0_i32 = arith.constant 0 : i32
    %c0_i32_0 = arith.constant 0 : i32
    %c0_i32_1 = arith.constant 0 : i32
    return %c0_i32, %c0_i32_0 : i32, i32
  }
  func.func @transform_12(%arg0: i32) -> (i32, i32) {
    %c0_i32 = arith.constant 0 : i32
    %c0_i32_0 = arith.constant 0 : i32
    %c0_i32_1 = arith.constant 0 : i32
    return %c0_i32, %c0_i32_0 : i32, i32
  }
  func.func @transform_13(%arg0: i32) -> (i32, i32) {
    %c0_i32 = arith.constant 0 : i32
    %c0_i32_0 = arith.constant 0 : i32
    %c0_i32_1 = arith.constant 0 : i32
    return %c0_i32, %c0_i32_0 : i32, i32
  }
  func.func @transform_14(%arg0: i32) -> (i32, i32) {
    %c0_i32 = arith.constant 0 : i32
    %c0_i32_0 = arith.constant 0 : i32
    %c0_i32_1 = arith.constant 0 : i32
    return %c0_i32, %c0_i32_0 : i32, i32
  }
  func.func @transform_15(%arg0: i32) -> (i32, i32) {
    %c0_i32 = arith.constant 0 : i32
    %c0_i32_0 = arith.constant 0 : i32
    %c0_i32_1 = arith.constant 0 : i32
    return %c0_i32, %c0_i32_0 : i32, i32
  }
  func.func @transform_16(%arg0: i32) -> (i32, i32, i32) {
    %c0_i32 = arith.constant 0 : i32
    %c0_i32_0 = arith.constant 0 : i32
    %c0_i32_1 = arith.constant 0 : i32
    return %arg0, %c0_i32, %c0_i32_0 : i32, i32, i32
  }
}

</mosaic_0001>

<bundles_post_ra>
// kernel: tpu_custom_call.1
= control target key start
LH: loop header
LB: loop body
LE: loop exit
PB: predicated region body
PF: predicated region fallthrough
CT: control target
= control target key end

     0   :  { %s2336_s0 = inlined_call_operand.vmem [shape: f32[2,8,32], index: 0, kind: input, shape index: {}]   ;;  %s2337_s1 = inlined_call_operand.vmem [shape: f32[2,8,32], index: 1, kind: input, shape index: {}]   ;;  %s2338_s2 = inlined_call_operand.vmem [shape: f32[1,32], index: 2, kind: input, shape index: {}]   ;;  %s2339_s3 = inlined_call_operand.vmem [shape: f32[1,32], index: 3, kind: input, shape index: {}]   ;;  %s2340_s4 = inlined_call_operand.vmem [shape: bf16[32,64], index: 4, kind: input, shape index: {}]   ;;  %s2341_s5 = inlined_call_operand.vmem [shape: f32[1,64], index: 5, kind: input, shape index: {}]   ;;  %s2342_s6 = inlined_call_operand.vmem [shape: bf16[64,32], index: 6, kind: input, shape index: {}]   ;;  %s2343_s7 = inlined_call_operand.vmem [shape: f32[1,32], index: 7, kind: input, shape index: {}]   ;;  %s2344_s8 = inlined_call_operand.vmem [shape: bf16[32,128], index: 8, kind: input, shape index: {}]   ;;  %s2345_s9 = inlined_call_operand.vmem [shape: f32[1,128], index: 9, kind: input, shape index: {}]   ;;  %s2346_s10 = inlined_call_operand.vmem [shape: bf16[64,32], index: 10, kind: input, shape index: {}]   ;;  %s2347_s11 = inlined_call_operand.vmem [shape: f32[1,32], index: 11, kind: input, shape index: {}]   ;;  %s2348_s12 = inlined_call_operand.vmem [shape: bf16[64,32], index: 12, kind: input, shape index: {}]   ;;  %s2349_s13 = inlined_call_operand.vmem [shape: f32[1,32], index: 13, kind: input, shape index: {}]   ;;  %s2350_s14 = inlined_call_operand.vmem [shape: bf16[32,32], index: 14, kind: input, shape index: {}]   ;;  %s2351_s15 = inlined_call_operand.vmem [shape: f32[1,32], index: 15, kind: input, shape index: {}]   ;;  %s2352_s16 = inlined_call_operand.hbm [shape: f32[2,8,32], index: 16, kind: output, shape index: {}]  }
   0x1   :  { %2357 = sst [smem:[#allocation9_spill]] %s2336_s0 }
   0x2   :  { %2358 = sst [smem:[#allocation10_spill]] %s2340_s4 }
   0x3   :  { %21 = vsyncpa [#allocation3], 0 }
   0x4   :  { %23 = vsyncpa [#allocation3 + $0x1], 0  ;;  %s2046_s21 = smov 0   ;;  %s2048_s22 = smov 0  }
   0x5   :  { %s2050_s23 = smov 0   ;;  %s2052_s24 = smov 0  }
   0x6 LB: > { %2359 = sst [smem:[#allocation5_spill]] %s1945_s23  ;;  %s2067_s25 = sadd.s32 4294967295, %s1949_s24   ;;  %s1949_s24 = sphi %s2052_s24, %s2368_s24   ;;  %s1945_s23 = sphi %s2050_s23, %s2370_s23   ;;  %s1941_s22 = sphi %s2048_s22, %s2372_s22   ;;  %s1937_s21 = sphi %s2046_s21, %s2371_s21  }
   0x7   : > { %s1589_s26 = sadd.s32 4294967294, %s1949_s24   ;;  %s2071_s27 = sadd.s32 1, %s1949_s24  }
   0x8   : > { %2360 = sst [smem:[#allocation6_spill]] %s2071_s27  ;;  %s382_s28 = sadd.s32 1, %s1945_s23 }
   0x9   : > { %s379_s29 = ssub.s32 %s1949_s24, %s2071_s27  ;;  %p392_p0 = scmp.ne.s32.totalorder %s1945_s23, %s1941_s22 }
   0xa   : > { %p380_p1 = scmp.eq.s32.totalorder %s379_s29, 0  ;;  %p393_p2 = scmp.eq.s32.totalorder %s2067_s25, 1 }
   0xb   : > { %p398_p3 = scmp.ne.s32.totalorder %s1941_s22, %s1937_s21  ;;  %p399_p4 = scmp.eq.s32.totalorder %s1589_s26, 1 }
   0xc   : > { %s2082_s30 = scalar_select %p380_p1, %s1945_s23, %s382_s28  }
   0xd   : > { %p2084_p5 = por %p393_p2, %p392_p0  ;;  %p2088_p6 = por %p399_p4, %p398_p3 }
   0xe   : > { %2361 = sst [smem:[#allocation7_spill]] %s2082_s30  ;;  %p1592_p7 = scmp.ge.s32.totalorder %s1949_s24, 1 }
   0xf   : > { %s2363_s17 = scalar_select %p2088_p6, 1, 0 }
  0x10   : > { %p473_p8 = scmp.lt.s32.totalorder %s1949_s24, 3 }
  0x11   : > { %2364 = sst [smem:[#allocation8_spill]] %s2363_s17 }
  0x12   : > { %p474_p9 = pnand %p1592_p7, %p473_p8 }
  0x13   : > { %p526_p10 = scmp.lt.s32.totalorder (!%p474_p9), %s2067_s25, 1  ;;  %vm546_vm0 = vcmask (!%p474_p9), 261120   ;;  %s2365_s28 = sld [smem:[#allocation9_spill]] (!%p474_p9)  ;;  %v1951_v8 = vmov (!%p474_p9), 0.0   ;;  %vm1952_vm1 = vmmov (!%p474_p9), 0   ;;  %v1841_v19 = vld [vmem:[%s2344_s8] sm:$0xff] (!%p474_p9)  }
  0x14   : > { %477 = sbr.rel (%p474_p9) target bundleno = 2071 (0x817), region = 84  ;;  %s2366_s4 = sld [smem:[#allocation10_spill]] (!%p474_p9)  ;;  %1683 = vmatprep.subr.bf16.mxu0 (!%p474_p9), %v1951_v8  ;;  %1687 = vmatprep.mubr.msk.bf16.mxu0 (!%p474_p9), %vm1952_vm1, %v1951_v8  ;;  %v1596_v14 = vld [vmem:[%s2338_s2] ss:$0 sm:$0xff] (!%p474_p9)  ;;  %v1842_v22 = vld [vmem:[%s2344_s8 + $0x8] sm:$0xff] (!%p474_p9)   ;;  %v1845_v26 = vld [vmem:[%s2342_s6 + $0x10] sm:$0xff] (!%p474_p9)  }
  0x15   : > { %1691 = vmatprep.subr.bf16.mxu1 (!%p474_p9), %v1951_v8  ;;  %1699 = vmatprep.mubr.msk.bf16.mxu1 (!%p474_p9), %vm1952_vm1, %v1951_v8  ;;  %v1597_v16 = vld [vmem:[%s2339_s3] ss:$0 sm:$0xff] (!%p474_p9)  ;;  %v1844_v25 = vld [vmem:[%s2342_s6 + $0x8] sm:$0xff] (!%p474_p9)   ;;  %v1847_v28 = vld [vmem:[%s2342_s6 + $0x18] sm:$0xff] (!%p474_p9)   ;;  %vm687_vm2 = vcmask (!%p474_p9), 523264   ;;  %vm973_vm3 = vcmask (!%p474_p9), 64512  }
  0x16   : > { %v1843_v24 = vld [vmem:[%s2342_s6] sm:$0xff] (!%p474_p9)   ;;  %v1848_v29 = vld [vmem:[%s2346_s10 + $0x8] sm:$0xff] (!%p474_p9)   ;;  %v1849_v30 = vld [vmem:[%s2346_s10 + $0x10] sm:$0xff] (!%p474_p9)   ;;  %s1953_s26 = smov (!%p474_p9), 112   ;;  %s1954_s23 = smov (!%p474_p9), 120   ;;  %vm1035_vm4 = vcmask (!%p474_p9), 1043456  }
  0x17   : > { %1692 = vmatpush3.bf16.msra.mxu1 (!%p474_p9), %v1843_v24  ;;  %v1846_v27 = vld [vmem:[%s2346_s10] sm:$0xff] (!%p474_p9)   ;;  %v1850_v31 = vld [vmem:[%s2346_s10 + $0x18] sm:$0xff] (!%p474_p9)   ;;  %s1955_s27 = smov (!%p474_p9), 104   ;;  %s1957_s20 = smov (!%p474_p9), 8   ;;  %vm1425_vm5 = vcmask (!%p474_p9), 130048   ;;  %vm1427_vm6 = vcmask (!%p474_p9), 195584  }
  0x18   : > { %1693 = vmatprep.subr.bf16.mxu1 (!%p474_p9), %v1951_v8  ;;  %v1598_v32 = vld [vmem:[%s2341_s5] ss:$0 sm:$0xff] (!%p474_p9)  ;;  %s1958_s30 = smov (!%p474_p9), 16  }
  0x19   : > { %v1609_v39 = vld [vmem:[%s2345_s9] ss:$0 sm:$0xff] (!%p474_p9) }
  0x1a   : > { %v1839_v7 = vld [vmem:[%s2366_s4] sm:$0xff] (!%p474_p9)   ;;  %v1840_v9 = vld [vmem:[%s2366_s4 + $0x8] sm:$0xff] (!%p474_p9)   ;;  %s1959_s4 = smov (!%p474_p9), 24  }
  0x1b   : > { %s2096_s18 = scalar_select %p526_p10, %s2067_s25, 1  ;;  %1684 = vmatpush3.bf16.msra.mxu0 %v1839_v7  ;;  %1694 = vmatpush3.bf16.msra.mxu1 %v1844_v25  ;;  %v1851_v60 = vld [vmem:[%s2348_s12] sm:$0xff]  }
  0x1c   : > { %1685 = vmatprep.subr.bf16.mxu0 %v1951_v8  ;;  %1695 = vmatprep.subr.bf16.mxu1 %v1951_v8  ;;  %v1603_v61 = vld [vmem:[%s2343_s7] ss:$0 sm:$0xff] }
  0x1d   : > { %s1594_s19 = sshll.u32 %s2096_s18, 3  ;;  %v1614_v62 = vld [vmem:[%s2347_s11] ss:$0 sm:$0xff]  ;;  %s523_s18 = sand.u32 1, %s1941_s22  }
  0x1e   : > { %s529_s29 = scalar_lea.vmem %s2365_s28, %s1594_s19  ;;  %s533_s17 = scalar_lea.vmem %s2337_s1, %s1594_s19 }
  0x1f   : > { %v2104_v0 = vld [vmem:[%s529_s29] sm:$0xff]  ;;  %1686 = vmatpush3.bf16.msra.mxu0 %v1840_v9  ;;  %1696 = vmatpush3.bf16.msra.mxu1 %v1845_v26  ;;  %s1593_s19 = sshll.u32 %s523_s18, 3  ;;  %s1640_s28 = sshll.u32 %s2067_s25, 7 }
  0x20   : > { %v547_v1 = vsel %vm546_vm0, %v2104_v0, 0.0  ;;  %1703 = vmatprep.subr.bf16.mxu0 %v1951_v8  ;;  %v536_v21 = vld [vmem:[%s533_s17] sm:$0xff]  ;;  %1697 = vmatprep.subr.bf16.mxu1 %v1951_v8  ;;  %s1956_s17 = smov 64   ;;  %s525_s29 = scalar_lea.vmem [#allocation2], %s1593_s19 }
  0x21   : > { %548 = vadd.xlane.f32.xlu0 %v547_v1  ;;  %v537_v23 = vpack.c.bf16 %v536_v21, %v536_v21  ;;  %v1852_v1 = vld [vmem:[%s2348_s12 + $0x8] sm:$0xff]   ;;  %s1960_s25 = smov [#allocation2]  }
  0x23   : > { %1698 = vmatpush3.bf16.msra.mxu1 %v1847_v28 }
  0x24   : > { %1723 = vmatprep.subr.bf16.mxu1 %v1951_v8 }
  0xae   : > { %v549_v2 = vpop.xlane.xlu0 %548 }
  0xaf   : > { %v551_v3 = vmul.f32 0.03125, %v549_v2 }
  0xb1   : > { %v552_v4 = vsub.f32 %v2104_v0, %v551_v3 }
  0xb3   : > { %v553_v5 = vmul.f32 %v552_v4, %v552_v4 }
  0xb5   : > { %v554_v6 = vsel %vm546_vm0, %v553_v5, 0.0 }
  0xb6   : > { %555 = vadd.xlane.f32.xlu0 %v554_v6 }
 0x143   : > { %v556_v10 = vpop.xlane.xlu0 %555 }
 0x144   : > { %v557_v11 = vmul.f32 0.03125, %v556_v10  ;;  %v1853_v10 = vld [vmem:[%s2348_s12 + $0x10] sm:$0xff]  }
 0x146   : > { %v558_v12 = vadd.f32 1e-05, %v557_v11 }
 0x148   : > { %1857 = vrsqrt.f32 %v558_v12 }
 0x152   : > { %v1858_v13 = vpop.eup %1857 }
 0x153   : > { %v560_v15 = vmul.f32 %v1858_v13, %v552_v4  ;;  %v1854_v13 = vld [vmem:[%s2348_s12 + $0x18] sm:$0xff]  }
 0x155   : > { %v567_v17 = vmul.f32 %v1596_v14, %v560_v15 }
 0x157   : > { %v574_v18 = vadd.f32 %v1597_v16, %v567_v17 }
 0x159   : > { %v575_v20 = vpack.c.bf16 %v574_v18, %v574_v18 }
 0x15b   : > { %1688 = vmatmul.mubr.msk.bf16.vlgmr.msra.gmra.mrb[0].mxu0 %vm546_vm0, %v575_v20 }
 0x15c   : > { %1704 = vmatpush3.bf16.msra.mxu0 %v1841_v19  ;;  %1707 = vmatprep.mubr.msk.bf16.mxu0 %vm1952_vm1, %v1951_v8 }
 0x15d   : > { %1705 = vmatprep.subr.bf16.mxu0 %v1951_v8 }
 0x160   : > { %1706 = vmatpush3.bf16.msra.mxu0 %v1842_v22 }
 0x161   : > { %1711 = vmatprep.subr.bf16.mxu0 %v1951_v8 }
 0x163   : > { %1708 = vmatmul.mubr.msk.bf16.vlgmr.msra.gmra.mrb[4].mxu0 %vm546_vm0, %v537_v23 }
 0x164   : > { %1719 = vmatprep.mubr.msk.bf16.mxu0 %vm1952_vm1, %v1951_v8  ;;  %1712 = vmatpush3.bf16.msra.mxu0 %v1846_v27 }
 0x165   : > { %1713 = vmatprep.subr.bf16.mxu0 %v1951_v8 }
 0x168   : > { %1714 = vmatpush3.bf16.msra.mxu0 %v1848_v29 }
 0x169   : > { %1715 = vmatprep.subr.bf16.mxu0 %v1951_v8 }
 0x16c   : > { %1716 = vmatpush3.bf16.msra.mxu0 %v1849_v30 }
 0x16d   : > { %1717 = vmatprep.subr.bf16.mxu0 %v1951_v8 }
 0x170   : > { %1718 = vmatpush3.bf16.msra.mxu0 %v1850_v31 }
 0x171   : > { %1735 = vmatprep.subr.bf16.mxu0 %v1951_v8 }
 0x22e   : > { %v635_v33 = vpop.f32.mrb[0].mxu0 }
 0x22f   : > { %v636_v34 = vadd.f32 %v1598_v32, %v635_v33  ;;  %v1689_v35 = vpop.f32.mrb[1].mxu0 }
 0x230   : > { %v638_v36 = vpop.f32.mrb[2].mxu0 }
 0x231   : > { %v1602_v37 = vmul.f32 -1.442695, %v636_v34  ;;  %v1690_v38 = vpop.f32.mrb[3].mxu0 }
 0x232   : > { %v1620_v38 = vld [vmem:[%s2349_s13] ss:$0 sm:$0xff] }
 0x233   : > { %1859 = vpow2.f32 %v1602_v37 }
 0x236   : > { %v791_v40 = vpop.f32.mrb[4].mxu0 }
 0x237   : > { %v792_v41 = vadd.f32 %v1609_v39, %v791_v40  ;;  %v1709_v42 = vpop.f32.mrb[5].mxu0 }
 0x238   : > { %v794_v43 = vpop.f32.mrb[6].mxu0 }
 0x239   : > { %v1613_v44 = vmul.f32 -1.442695, %v792_v41  ;;  %v1710_v45 = vpop.f32.mrb[7].mxu0 }
 0x23b   : > { %1861 = vpow2.f32 %v1613_v44 }
 0x23d   : > { %v1860_v46 = vpop.eup %1859 }
 0x23e   : > { %v644_v47 = vadd.f32 1.0, %v1860_v46 }
 0x240   : > { %1863 = vrcp.f32 %v644_v47 }
 0x245   : > { %v1862_v48 = vpop.eup %1861 }
 0x246   : > { %v800_v49 = vadd.f32 1.0, %v1862_v48 }
 0x248   : > { %1865 = vrcp.f32 %v800_v49 }
 0x24a   : > { %v1864_v50 = vpop.eup %1863 }
 0x24b   : > { %v647_v51 = vmul.f32 %v1864_v50, %v636_v34 }
 0x24d   : > { %v648_v52 = vpack.c.bf16 %v647_v51, %v647_v51 }
 0x24f   : > { %1700 = vmatmul.mubr.msk.bf16.vlgmr.msra.gmra.mrb[0].mxu1 %vm687_vm2, %v648_v52 }
 0x250   : > { %1731 = vmatprep.mubr.msk.bf16.mxu1 %vm1952_vm1, %v1951_v8  ;;  %1724 = vmatpush3.bf16.msra.mxu1 %v1851_v60 }
 0x251   : > { %1725 = vmatprep.subr.bf16.mxu1 %v1951_v8 }
 0x252   : > { %v1866_v53 = vpop.eup %1865 }
 0x253   : > { %v803_v54 = vmul.f32 %v1866_v53, %v792_v41 }
 0x254   : > { %1726 = vmatpush3.bf16.msra.mxu1 %v1852_v1 }
 0x255   : > { %v804_v55 = vpack.c.bf16 %v803_v54, %v803_v54  ;;  %1727 = vmatprep.subr.bf16.mxu1 %v1951_v8 }
 0x257   : > { %1720 = vmatmul.mubr.msk.bf16.vlgmr.msra.gmra.mrb[8].mxu0 %vm687_vm2, %v804_v55 }
 0x258   : > { %1737 = vmatprep.mubr.msk.bf16.mxu0 %vm1952_vm1, %v1951_v8  ;;  %1728 = vmatpush3.bf16.msra.mxu1 %v1853_v10 }
 0x259   : > { %1729 = vmatprep.subr.bf16.mxu1 %v1951_v8 }
 0x25c   : > { %1730 = vmatpush3.bf16.msra.mxu1 %v1854_v13 }
 0x25d   : > { %1741 = vmatprep.subr.bf16.mxu1 %v1951_v8 }
 0x322   : > { %v725_v56 = vpop.f32.mrb[0].mxu1 }
 0x323   : > { %v1701_v57 = vpop.f32.mrb[1].mxu1  ;;  %v726_v63 = vadd.f32 %v1603_v61, %v725_v56 }
 0x324   : > { %v728_v58 = vpop.f32.mrb[2].mxu1 }
 0x325   : > { %v1702_v59 = vpop.f32.mrb[3].mxu1  ;;  %v731_v6 = vmul.f32 0.35355338, %v726_v63 }
 0x327   : > { %v970_v12 = vpack.c.bf16 %v731_v6, %v731_v6 }
 0x32a   : > { %v880_v2 = vpop.f32.mrb[8].mxu0 }
 0x32b   : > { %v881_v3 = vadd.f32 %v1614_v62, %v880_v2  ;;  %v1721_v4 = vpop.f32.mrb[9].mxu0 }
 0x32c   : > { %v883_v5 = vpop.f32.mrb[10].mxu0 }
 0x32d   : > { %v971_v7 = vpack.c.bf16 %v881_v3, %v881_v3  ;;  %v1722_v9 = vpop.f32.mrb[11].mxu0 }
 0x32f   : > { %1194 = vrot.lane.b32.xlu0 %v971_v7, %s1953_s26  ;;  %1083 = vrot.lane.b32.xlu1 %v971_v7, %s1954_s23  ;;  %v978_v11 = vsel %vm973_vm3, %v971_v7, 0 }
 0x330   : > { %1736 = vmatpush3.bf16.xpose.msra.mxu0 %v978_v11 }
 0x331   : > { %1747 = vmatprep.subr.bf16.mxu0 %v1951_v8 }
 0x333   : > { %1080 = vrot.lane.b32.xlu1 %v970_v12, %s1954_s23 }
 0x337   : > { %1192 = vrot.lane.b32.xlu1 %v970_v12, %s1953_s26  ;;  %1738 = vmatmul.mubr.msk.bf16.vlgmr.msra.gmra.mrb[12].mxu0 %vm973_vm3, %v970_v12 }
 0x338   : > { %1749 = vmatprep.mubr.msk.bf16.mxu0 %vm1952_vm1, %v1951_v8 }
 0x33b   : > { %1304 = vrot.lane.b32.xlu1 %v971_v7, %s1955_s27 }
 0x33f   : > { %1302 = vrot.lane.b32.xlu1 %v970_v12, %s1955_s27 }
 0x343   : > { %901 = vrot.lane.b32.xlu1 %v804_v55, %s1956_s17  ;;  %s1891_s17 = sshll.u32 %s1960_s25, 4  ;;  %s1892_s17 = int_to_ptr.vmem [resolvable:$false] %s1891_s17 }
 0x344   : > { %s1893_s19 = scalar_lea.vmem %s1892_s17, 256 }
 0x3a1   : > { %v1084_v14 = vpop.permute.xlu1 %1083  ;;  %v1195_v17 = vpop.permute.xlu0 %1194 }
 0x3a2   : > { %v1089_v15 = vsel %vm973_vm3, %v1084_v14, 0  ;;  %v1200_v19 = vsel %vm973_vm3, %v1195_v17, 0 }
 0x3a3   : > { %1748 = vmatpush3.bf16.xpose.msra.mxu0 %v1089_v15 }
 0x3a4   : > { %1759 = vmatprep.subr.bf16.mxu0 %v1951_v8 }
 0x3a5   : > { %v1081_v16 = vpop.permute.xlu1 %1080 }
 0x3a9   : > { %v1193_v18 = vpop.permute.xlu1 %1192 }
 0x3aa   : > { %1750 = vmatmul.mubr.msk.bf16.vlgmr.msra.gmra.mrb[16].mxu0 %vm973_vm3, %v1081_v16 }
 0x3ab   : > { %1760 = vmatpush3.bf16.xpose.msra.mxu0 %v1200_v19  ;;  %1761 = vmatprep.mubr.msk.bf16.mxu0 %vm1952_vm1, %v1951_v8 }
 0x3ac   : > { %1771 = vmatprep.subr.bf16.mxu0 %v1951_v8 }
 0x3ad   : > { %v1305_v20 = vpop.permute.xlu1 %1304 }
 0x3ae   : > { %v1310_v22 = vsel %vm973_vm3, %v1305_v20, 0 }
 0x3b1   : > { %v1303_v21 = vpop.permute.xlu1 %1302 }
 0x3b2   : > { %1762 = vmatmul.mubr.msk.bf16.vlgmr.msra.gmra.mrb[20].mxu0 %vm973_vm3, %v1193_v18 }
 0x3b3   : > { %1772 = vmatpush3.bf16.xpose.msra.mxu0 %v1310_v22  ;;  %1773 = vmatprep.mubr.msk.bf16.mxu0 %vm1952_vm1, %v1951_v8 }
 0x3b4   : > { %1783 = vmatprep.subr.bf16.mxu0 %v1951_v8 }
 0x3b5   : > { %v902_v23 = vpop.permute.xlu1 %901 }
 0x3b6   : > { %1732 = vmatmul.mubr.msk.bf16.vlgmr.msra.gmra.mrb[4].mxu1 %vm687_vm2, %v902_v23 }
 0x3b7   : > { %1743 = vmatprep.mubr.msk.bf16.mxu1 %vm1952_vm1, %v1951_v8 }
 0x3ba   : > { %1774 = vmatmul.mubr.msk.bf16.vlgmr.msra.gmra.mrb[24].mxu0 %vm973_vm3, %v1303_v21 }
 0x3bb   : > { %1787 = vmatprep.mubr.msk.bf16.mxu0 %vm1952_vm1, %v1951_v8 }
 0x40a   : > { %v1014_v24 = vpop.f32.mrb[12].mxu0 }
 0x40b   : > { %v1739_v25 = vpop.f32.mrb[13].mxu0  ;;  %v1020_v26 = vsel %vm973_vm3, %v1014_v24, -inf }
 0x40c   : > { %1021 = vmax.xlane.f32.xlu1 %v1020_v26  ;;  %v1017_v27 = vpop.f32.mrb[14].mxu0 }
 0x40d   : > { %v1740_v28 = vpop.f32.mrb[15].mxu0 }
 0x47d   : > { %v1125_v29 = vpop.f32.mrb[16].mxu0 }
 0x47e   : > { %v1751_v30 = vpop.f32.mrb[17].mxu0  ;;  %v1131_v31 = vsel %vm973_vm3, %v1125_v29, -inf }
 0x47f   : > { %1132 = vmax.xlane.f32.xlu0 %v1131_v31  ;;  %v1128_v32 = vpop.f32.mrb[18].mxu0 }
 0x480   : > { %v1752_v33 = vpop.f32.mrb[19].mxu0 }
 0x485   : > { %v1236_v34 = vpop.f32.mrb[20].mxu0 }
 0x486   : > { %v1763_v35 = vpop.f32.mrb[21].mxu0  ;;  %v1242_v36 = vsel %vm973_vm3, %v1236_v34, -inf }
 0x487   : > { %1243 = vmax.xlane.f32.xlu1 %v1242_v36  ;;  %v1239_v37 = vpop.f32.mrb[22].mxu0  ;;  %v1855_v36 = vld [vmem:[%s2350_s14] sm:$0xff]  }
 0x488   : > { %v1764_v39 = vpop.f32.mrb[23].mxu0  ;;  %1784 = vmatpush3.bf16.msra.mxu0 %v1855_v36 }
 0x489   : > { %v964_v40 = vpop.f32.mrb[4].mxu1  ;;  %1785 = vmatprep.subr.bf16.mxu0 %v1951_v8 }
 0x48a   : > { %v965_v41 = vadd.f32 %v1620_v38, %v964_v40  ;;  %v1733_v42 = vpop.f32.mrb[5].mxu1 }
 0x48b   : > { %v967_v43 = vpop.f32.mrb[6].mxu1 }
 0x48c   : > { %v972_v44 = vpack.c.bf16 %v965_v41, %v965_v41  ;;  %v1734_v45 = vpop.f32.mrb[7].mxu1  ;;  %v1856_v41 = vld [vmem:[%s2350_s14 + $0x8] sm:$0xff]  }
 0x48d   : > { %v1346_v46 = vpop.f32.mrb[24].mxu0  ;;  %1786 = vmatpush3.bf16.msra.mxu0 %v1856_v41 }
 0x48e   : > { %v1775_v47 = vpop.f32.mrb[25].mxu0  ;;  %v1037_v48 = vsel %vm1035_vm4, %v972_v44, 0  ;;  %v1352_v49 = vsel %vm973_vm3, %v1346_v46, -inf }
 0x48f   : > { %1742 = vmatpush3.bf16.msra.mxu1 %v1037_v48  ;;  %1353 = vmax.xlane.f32.xlu0 %v1352_v49  ;;  %v1349_v50 = vpop.f32.mrb[26].mxu0 }
 0x490   : > { %v1776_v51 = vpop.f32.mrb[27].mxu0  ;;  %1753 = vmatprep.subr.bf16.mxu1 %v1951_v8 }
 0x499   : > { %v1022_v52 = vpop.xlane.xlu1 %1021 }
 0x49a   : > { %v1023_v53 = vsub.f32 %v1014_v24, %v1022_v52 }
 0x49c   : > { %v1024_v54 = vmul.f32 1.442695, %v1023_v53 }
 0x49e   : > { %1867 = vpow2.f32 %v1024_v54 }
 0x4a8   : > { %v1868_v55 = vpop.eup %1867 }
 0x4a9   : > { %v1026_v56 = vsel %vm973_vm3, %v1868_v55, 0.0 }
 0x4aa   : > { %1027 = vadd.xlane.f32.xlu1 %v1026_v56  ;;  %v1634_v56 = vld [vmem:[%s2351_s15] ss:$0 sm:$0xff] }
 0x4bb   : > { %1144 = vrot.lane.b32.xlu1 %v972_v44, %s1954_s23 }
 0x50c   : > { %v1133_v57 = vpop.xlane.xlu0 %1132 }
 0x50d   : > { %v1134_v58 = vsub.f32 %v1125_v29, %v1133_v57 }
 0x50f   : > { %v1135_v59 = vmul.f32 1.442695, %v1134_v58 }
 0x511   : > { %1869 = vpow2.f32 %v1135_v59 }
 0x514   : > { %v1244_v60 = vpop.xlane.xlu1 %1243 }
 0x515   : > { %v1245_v61 = vsub.f32 %v1236_v34, %v1244_v60 }
 0x517   : > { %v1246_v62 = vmul.f32 1.442695, %v1245_v61 }
 0x519   : > { %1871 = vpow2.f32 %v1246_v62 }
 0x51b   : > { %v1870_v63 = vpop.eup %1869 }
 0x51c   : > { %v1354_v1 = vpop.xlane.xlu0 %1353  ;;  %v1137_v2 = vsel %vm973_vm3, %v1870_v63, 0.0 }
 0x51d   : > { %v1355_v3 = vsub.f32 %v1346_v46, %v1354_v1  ;;  %1138 = vadd.xlane.f32.xlu0 %v1137_v2 }
 0x51f   : > { %v1356_v4 = vmul.f32 1.442695, %v1355_v3 }
 0x521   : > { %1873 = vpow2.f32 %v1356_v4 }
 0x523   : > { %v1872_v5 = vpop.eup %1871 }
 0x524   : > { %v1248_v6 = vsel %vm973_vm3, %v1872_v5, 0.0 }
 0x525   : > { %1249 = vadd.xlane.f32.xlu1 %v1248_v6 }
 0x52b   : > { %v1874_v7 = vpop.eup %1873 }
 0x52c   : > { %v1358_v9 = vsel %vm973_vm3, %v1874_v7, 0.0 }
 0x52d   : > { %1359 = vadd.xlane.f32.xlu0 %v1358_v9 }
 0x536   : > { %1364 = vrot.lane.b32.xlu1 %v972_v44, %s1955_s27 }
 0x537   : > { %v1028_v10 = vpop.xlane.xlu1 %1027 }
 0x538   : > { %1875 = vrcp.f32 %v1028_v10 }
 0x53b   : > { %v1145_v13 = vpop.permute.xlu1 %1144 }
 0x53c   : > { %v1150_v15 = vsel %vm1035_vm4, %v1145_v13, 0 }
 0x542   : > { %v1876_v11 = vpop.eup %1875 }
 0x543   : > { %v1030_v12 = vmul.f32 %v1876_v11, %v1868_v55  ;;  %1254 = vrot.lane.b32.xlu0 %v972_v44, %s1953_s26 }
 0x545   : > { %v1031_v14 = vpack.c.bf16 %v1030_v12, %v1030_v12 }
 0x547   : > { %1744 = vmatmul.mubr.msk.bf16.vlgmr.msra.gmra.mrb[8].mxu1 %vm973_vm3, %v1031_v14 }
 0x548   : > { %1754 = vmatpush3.bf16.msra.mxu1 %v1150_v15  ;;  %1755 = vmatprep.mubr.msk.bf16.mxu1 %vm1952_vm1, %v1951_v8 }
 0x549   : > { %1765 = vmatprep.subr.bf16.mxu1 %v1951_v8 }
 0x5aa   : > { %v1139_v16 = vpop.xlane.xlu0 %1138 }
 0x5ab   : > { %1877 = vrcp.f32 %v1139_v16 }
 0x5b2   : > { %v1250_v17 = vpop.xlane.xlu1 %1249 }
 0x5b3   : > { %1879 = vrcp.f32 %v1250_v17 }
 0x5b5   : > { %v1878_v18 = vpop.eup %1877 }
 0x5b6   : > { %v1141_v19 = vmul.f32 %v1878_v18, %v1870_v63  ;;  %v1365_v26 = vpop.permute.xlu1 %1364 }
 0x5b7   : > { %v1370_v28 = vsel %vm1035_vm4, %v1365_v26, 0 }
 0x5b8   : > { %v1142_v20 = vpack.c.bf16 %v1141_v19, %v1141_v19 }
 0x5ba   : > { %1756 = vmatmul.mubr.msk.bf16.vlgmr.msra.gmra.mrb[12].mxu1 %vm973_vm3, %v1142_v20  ;;  %v1360_v21 = vpop.xlane.xlu0 %1359 }
 0x5bb   : > { %1881 = vrcp.f32 %v1360_v21  ;;  %1767 = vmatprep.mubr.msk.bf16.mxu1 %vm1952_vm1, %v1951_v8 }
 0x5bd   : > { %v1880_v22 = vpop.eup %1879 }
 0x5be   : > { %v1252_v23 = vmul.f32 %v1880_v22, %v1872_v5  ;;  %v1255_v24 = vpop.permute.xlu0 %1254 }
 0x5bf   : > { %v1260_v25 = vsel %vm1035_vm4, %v1255_v24, 0 }
 0x5c0   : > { %1766 = vmatpush3.bf16.msra.mxu1 %v1260_v25  ;;  %v1253_v27 = vpack.c.bf16 %v1252_v23, %v1252_v23 }
 0x5c1   : > { %1777 = vmatprep.subr.bf16.mxu1 %v1951_v8 }
 0x5c3   : > { %1768 = vmatmul.mubr.msk.bf16.vlgmr.msra.gmra.mrb[16].mxu1 %vm973_vm3, %v1253_v27 }
 0x5c4   : > { %1778 = vmatpush3.bf16.msra.mxu1 %v1370_v28  ;;  %1779 = vmatprep.mubr.msk.bf16.mxu1 %vm1952_vm1, %v1951_v8 }
 0x5c5   : > { %v1882_v29 = vpop.eup %1881 }
 0x5c6   : > { %v1362_v30 = vmul.f32 %v1882_v29, %v1874_v7 }
 0x5c8   : > { %v1363_v31 = vpack.c.bf16 %v1362_v30, %v1362_v30 }
 0x5cb   : > { %1780 = vmatmul.mubr.msk.bf16.vlgmr.msra.gmra.mrb[20].mxu1 %vm973_vm3, %v1363_v31 }
 0x61a   : > { %v1073_v32 = vpop.f32.mrb[8].mxu1 }
 0x61b   : > { %v1745_v33 = vpop.f32.mrb[9].mxu1 }
 0x61c   : > { %v1076_v34 = vpop.f32.mrb[10].mxu1 }
 0x61d   : > { %v1746_v35 = vpop.f32.mrb[11].mxu1 }
 0x68d   : > { %v1186_v37 = vpop.f32.mrb[12].mxu1 }
 0x68e   : > { %1413 = vrot.lane.b32.xlu1 %v1186_v37, %s1957_s20  ;;  %v1757_v38 = vpop.f32.mrb[13].mxu1  ;;  %s1518_s20 = sshll.u32 %s525_s29, 4  ;;  %s2295_s20 = int_to_ptr.vmem [resolvable:$true] %s1518_s20 }
 0x68f   : > { %v1189_v39 = vpop.f32.mrb[14].mxu1  ;;  %s1887_s27 = scalar_lea.vmem %s2295_s20, 128  ;;  %p1894_p0 = scmp.lt.s32.totalorder %s2295_s20, %s1892_s17 }
 0x690   : > { %v1758_v40 = vpop.f32.mrb[15].mxu1  ;;  %p1888_p11 = scmp.ne.s32.totalorder %s2295_s20, %s1887_s27  ;;  %p1895_p1 = scmp.lt.s32.totalorder %s1893_s19, %s1887_s27 }
 0x692   : > { %p1889_p12 = pnand %p1888_p11, %p2084_p5  ;;  %p1896_p2 = por %p1895_p1, %p1894_p0 }
 0x694   : > { %p1890_p13 = pneg %p1889_p12 }
 0x696   : > { %v1296_v42 = vpop.f32.mrb[16].mxu1  ;;  %p1897_p3 = pnand %p1896_p2, %p1890_p13 }
 0x697   : > { %1417 = vrot.lane.b32.xlu0 %v1296_v42, %s1958_s30  ;;  %v1769_v43 = vpop.f32.mrb[17].mxu1  ;;  %s2293_s30 = scalar_lea.hbm %s2352_s16, %s1640_s28 }
 0x698   : > { %v1299_v44 = vpop.f32.mrb[18].mxu1 }
 0x699   : > { %v1770_v45 = vpop.f32.mrb[19].mxu1 }
 0x69e   : > { %v1406_v46 = vpop.f32.mrb[20].mxu1 }
 0x69f   : > { %1421 = vrot.lane.b32.xlu1 %v1406_v46, %s1959_s4  ;;  %v1781_v8 = vpop.f32.mrb[21].mxu1  ;;  %s1505_s4 = scalar_lea.sflag [#allocation3], %s523_s18 }
 0x6a0   : > { %v1409_v47 = vpop.f32.mrb[22].mxu1 }
 0x6a1   : > { %v1782_v48 = vpop.f32.mrb[23].mxu1 }
 0x700   : > { %v1414_v49 = vpop.permute.xlu1 %1413 }
 0x701   : > { %v1424_v51 = vsel %vm973_vm3, %v1073_v32, %v1414_v49 }
 0x709   : > { %v1418_v50 = vpop.permute.xlu0 %1417 }
 0x70a   : > { %v1426_v52 = vsel %vm1425_vm5, %v1424_v51, %v1418_v50 }
 0x711   : > { %v1422_v53 = vpop.permute.xlu1 %1421 }
 0x712   : > { %v1428_v54 = vsel %vm1427_vm6, %v1426_v52, %v1422_v53 }
 0x713   : > { %v1429_v55 = vpack.c.bf16 %v1428_v54, %v1428_v54 }
 0x715   : > { %1788 = vmatmul.mubr.msk.bf16.vlgmr.msra.gmra.mrb[28].mxu0 %vm546_vm0, %v1429_v55 }
 0x7e8   : > { %v1489_v57 = vpop.f32.mrb[28].mxu0 }
 0x7e9   : > { %v1490_v58 = vadd.f32 %v1634_v56, %v1489_v57  ;;  %v1789_v59 = vpop.f32.mrb[29].mxu0 }
 0x7ea   : > { %v1492_v60 = vpop.f32.mrb[30].mxu0 }
 0x7eb   : > { %v1495_v61 = vadd.f32 %v1490_v58, %v2104_v0  ;;  %v1790_v62 = vpop.f32.mrb[31].mxu0 }
 0x7ed   : > { %v1638_v63 = vmul.f32 -1.442695, %v1495_v61 }
 0x7ef   : > { %1883 = vpow2.f32 %v1638_v63 }
 0x7f9   : > { %v1884_v1 = vpop.eup %1883 }
 0x7fa   : > { %v1499_v2 = vadd.f32 1.0, %v1884_v1 }
 0x7fc   : > { %1885 = vrcp.f32 %v1499_v2 }
 0x806   : > { %v1886_v3 = vpop.eup %1885 }
 0x807   : > { %v1502_v4 = vmul.f32 %v1886_v3, %v1495_v61 }
 0x809   : > { %1503 = vst.msk [vmem:[%s525_s29] sm:$0xff] %vm546_vm0, %v1502_v4 }
 0x80a   : > { %1900 = shalt.err (!%p1897_p3)
}
 0x80b   : > { %s1901_s18 = scalar_lea.hbm %s2293_s30, 128  ;;  %s1905_s26 = scalar_lea.hbm %s2352_s16, 256 }
 0x80c   : > { %p1902_p4 = scmp.ne.s32.totalorder %s2293_s30, %s1901_s18  ;;  %p1906_p9 = scmp.lt.u32.totalorder %s2293_s30, %s2352_s16 }
 0x80d   : > { %p1907_p10 = scmp.lt.u32.totalorder %s1905_s26, %s1901_s18  ;;  %p1909_p12 = scmp.lt.u32.totalorder %s1901_s18, %s2293_s30 }
 0x80e   : > { %p1903_p7 = pnand %p1902_p4, %p2084_p5 }
 0x80f   : > { %p1908_p11 = por %p1907_p10, %p1906_p9 }
 0x810   : > { %p1904_p8 = pneg %p1903_p7 }
 0x811   : > { %p1910_p13 = por %p1909_p12, %p1908_p11 }
 0x813   : > { %p1911_p0 = pnand %p1910_p13, %p1904_p8 }
 0x815   : > { %1914 = shalt.err (!%p1911_p0)
}
 0x816   : > { %1791 = dma.vmem_to_hbm [thread:$0]  (%p2084_p5), %s2295_s20, 128, %s2293_s30, %s1505_s4  }
 0x817 PF: > { %p1797_p1 = scmp.ge.s32.totalorder %s1949_s24, 2  ;;  %s1530_s17 = sand.u32 1, %s1937_s21  }
 0x818   : > { %s1531_s19 = scalar_lea.sflag [#allocation3], %s1530_s17 }
 0x819   : > { %p1794_p2 = pnand %p1797_p1, %p2088_p6 }
 0x81b   : > { %1932 = dma.done.wait (!%p1794_p2), %s1531_s19, 128  }
 0x81c   : > { %1934 = vsyncadd (!%p1794_p2), %s1531_s19, 4294967168  ;;  %s2368_s24 = sld [smem:[#allocation6_spill]]  ;;  %s2369_s18 = sld [smem:[#allocation5_spill]] }
 0x81d   : > { %s2370_s23 = sld [smem:[#allocation7_spill]]  ;;  %s2371_s21 = smov %s1941_s22 }
 0x822   : > { %p26_p3 = scmp.ge.s32.totalorder %s2368_s24, 4   ;;  %s2372_s22 = smov %s2369_s18 }
 0x824   :  { %28 = sbr.rel (!%p26_p3) target bundleno = 6 (0x6), region = 122 }
 0x82b   :  { %1536 = vsyncpa [#allocation3], 1 }
 0x82c   :  { %1538 = vsyncpa [#allocation3 + $0x1], 1 }

// kernel: tpu_custom_call.1
= control target key start
LH: loop header
LB: loop body
LE: loop exit
PB: predicated region body
PF: predicated region fallthrough
CT: control target
= control target key end

     0   :  { %s2336_s0 = inlined_call_operand.vmem [shape: f32[2,8,32], index: 0, kind: input, shape index: {}]   ;;  %s2337_s1 = inlined_call_operand.vmem [shape: f32[2,8,32], index: 1, kind: input, shape index: {}]   ;;  %s2338_s2 = inlined_call_operand.vmem [shape: f32[1,32], index: 2, kind: input, shape index: {}]   ;;  %s2339_s3 = inlined_call_operand.vmem [shape: f32[1,32], index: 3, kind: input, shape index: {}]   ;;  %s2340_s4 = inlined_call_operand.vmem [shape: bf16[32,64], index: 4, kind: input, shape index: {}]   ;;  %s2341_s5 = inlined_call_operand.vmem [shape: f32[1,64], index: 5, kind: input, shape index: {}]   ;;  %s2342_s6 = inlined_call_operand.vmem [shape: bf16[64,32], index: 6, kind: input, shape index: {}]   ;;  %s2343_s7 = inlined_call_operand.vmem [shape: f32[1,32], index: 7, kind: input, shape index: {}]   ;;  %s2344_s8 = inlined_call_operand.vmem [shape: bf16[32,128], index: 8, kind: input, shape index: {}]   ;;  %s2345_s9 = inlined_call_operand.vmem [shape: f32[1,128], index: 9, kind: input, shape index: {}]   ;;  %s2346_s10 = inlined_call_operand.vmem [shape: bf16[64,32], index: 10, kind: input, shape index: {}]   ;;  %s2347_s11 = inlined_call_operand.vmem [shape: f32[1,32], index: 11, kind: input, shape index: {}]   ;;  %s2348_s12 = inlined_call_operand.vmem [shape: bf16[64,32], index: 12, kind: input, shape index: {}]   ;;  %s2349_s13 = inlined_call_operand.vmem [shape: f32[1,32], index: 13, kind: input, shape index: {}]   ;;  %s2350_s14 = inlined_call_operand.vmem [shape: bf16[32,32], index: 14, kind: input, shape index: {}]   ;;  %s2351_s15 = inlined_call_operand.vmem [shape: f32[1,32], index: 15, kind: input, shape index: {}]   ;;  %s2352_s16 = inlined_call_operand.hbm [shape: f32[2,8,32], index: 16, kind: output, shape index: {}]  }
   0x1   :  { %2357 = sst [smem:[#allocation9_spill]] %s2336_s0 }
   0x2   :  { %2358 = sst [smem:[#allocation10_spill]] %s2340_s4 }
   0x3   :  { %21 = vsyncpa [#allocation3], 0 }
   0x4   :  { %23 = vsyncpa [#allocation3 + $0x1], 0  ;;  %s2046_s21 = smov 0   ;;  %s2048_s22 = smov 0  }
   0x5   :  { %s2050_s23 = smov 0   ;;  %s2052_s24 = smov 0  }
   0x6 LB: > { %2359 = sst [smem:[#allocation5_spill]] %s1945_s23  ;;  %s2067_s25 = sadd.s32 4294967295, %s1949_s24   ;;  %s1949_s24 = sphi %s2052_s24, %s2368_s24   ;;  %s1945_s23 = sphi %s2050_s23, %s2370_s23   ;;  %s1941_s22 = sphi %s2048_s22, %s2372_s22   ;;  %s1937_s21 = sphi %s2046_s21, %s2371_s21  }
   0x7   : > { %s1589_s26 = sadd.s32 4294967294, %s1949_s24   ;;  %s2071_s27 = sadd.s32 1, %s1949_s24  }
   0x8   : > { %2360 = sst [smem:[#allocation6_spill]] %s2071_s27  ;;  %s382_s28 = sadd.s32 1, %s1945_s23 }
   0x9   : > { %s379_s29 = ssub.s32 %s1949_s24, %s2071_s27  ;;  %p392_p0 = scmp.ne.s32.totalorder %s1945_s23, %s1941_s22 }
   0xa   : > { %p380_p1 = scmp.eq.s32.totalorder %s379_s29, 0  ;;  %p393_p2 = scmp.eq.s32.totalorder %s2067_s25, 1 }
   0xb   : > { %p398_p3 = scmp.ne.s32.totalorder %s1941_s22, %s1937_s21  ;;  %p399_p4 = scmp.eq.s32.totalorder %s1589_s26, 1 }
   0xc   : > { %s2082_s30 = scalar_select %p380_p1, %s1945_s23, %s382_s28  }
   0xd   : > { %p2084_p5 = por %p393_p2, %p392_p0  ;;  %p2088_p6 = por %p399_p4, %p398_p3 }
   0xe   : > { %2361 = sst [smem:[#allocation7_spill]] %s2082_s30  ;;  %p1592_p7 = scmp.ge.s32.totalorder %s1949_s24, 1 }
   0xf   : > { %s2363_s17 = scalar_select %p2088_p6, 1, 0 }
  0x10   : > { %p473_p8 = scmp.lt.s32.totalorder %s1949_s24, 3 }
  0x11   : > { %2364 = sst [smem:[#allocation8_spill]] %s2363_s17 }
  0x12   : > { %p474_p9 = pnand %p1592_p7, %p473_p8 }
  0x13   : > { %p526_p10 = scmp.lt.s32.totalorder (!%p474_p9), %s2067_s25, 1  ;;  %vm546_vm0 = vcmask (!%p474_p9), 261120   ;;  %s2365_s28 = sld [smem:[#allocation9_spill]] (!%p474_p9)  ;;  %v1951_v8 = vmov (!%p474_p9), 0.0   ;;  %vm1952_vm1 = vmmov (!%p474_p9), 0   ;;  %v1841_v19 = vld [vmem:[%s2344_s8] sm:$0xff] (!%p474_p9)  }
  0x14   : > { %477 = sbr.rel (%p474_p9) target bundleno = 2071 (0x817), region = 84  ;;  %s2366_s4 = sld [smem:[#allocation10_spill]] (!%p474_p9)  ;;  %1683 = vmatprep.subr.bf16.mxu0 (!%p474_p9), %v1951_v8  ;;  %1687 = vmatprep.mubr.msk.bf16.mxu0 (!%p474_p9), %vm1952_vm1, %v1951_v8  ;;  %v1596_v14 = vld [vmem:[%s2338_s2] ss:$0 sm:$0xff] (!%p474_p9)  ;;  %v1842_v22 = vld [vmem:[%s2344_s8 + $0x8] sm:$0xff] (!%p474_p9)   ;;  %v1845_v26 = vld [vmem:[%s2342_s6 + $0x10] sm:$0xff] (!%p474_p9)  }
  0x15   : > { %1691 = vmatprep.subr.bf16.mxu1 (!%p474_p9), %v1951_v8  ;;  %1699 = vmatprep.mubr.msk.bf16.mxu1 (!%p474_p9), %vm1952_vm1, %v1951_v8  ;;  %v1597_v16 = vld [vmem:[%s2339_s3] ss:$0 sm:$0xff] (!%p474_p9)  ;;  %v1844_v25 = vld [vmem:[%s2342_s6 + $0x8] sm:$0xff] (!%p474_p9)   ;;  %v1847_v28 = vld [vmem:[%s2342_s6 + $0x18] sm:$0xff] (!%p474_p9)   ;;  %vm687_vm2 = vcmask (!%p474_p9), 523264   ;;  %vm973_vm3 = vcmask (!%p474_p9), 64512  }
  0x16   : > { %v1843_v24 = vld [vmem:[%s2342_s6] sm:$0xff] (!%p474_p9)   ;;  %v1848_v29 = vld [vmem:[%s2346_s10 + $0x8] sm:$0xff] (!%p474_p9)   ;;  %v1849_v30 = vld [vmem:[%s2346_s10 + $0x10] sm:$0xff] (!%p474_p9)   ;;  %s1953_s26 = smov (!%p474_p9), 112   ;;  %s1954_s23 = smov (!%p474_p9), 120   ;;  %vm1035_vm4 = vcmask (!%p474_p9), 1043456  }
  0x17   : > { %1692 = vmatpush3.bf16.msra.mxu1 (!%p474_p9), %v1843_v24  ;;  %v1846_v27 = vld [vmem:[%s2346_s10] sm:$0xff] (!%p474_p9)   ;;  %v1850_v31 = vld [vmem:[%s2346_s10 + $0x18] sm:$0xff] (!%p474_p9)   ;;  %s1955_s27 = smov (!%p474_p9), 104   ;;  %s1957_s20 = smov (!%p474_p9), 8   ;;  %vm1425_vm5 = vcmask (!%p474_p9), 130048   ;;  %vm1427_vm6 = vcmask (!%p474_p9), 195584  }
  0x18   : > { %1693 = vmatprep.subr.bf16.mxu1 (!%p474_p9), %v1951_v8  ;;  %v1598_v32 = vld [vmem:[%s2341_s5] ss:$0 sm:$0xff] (!%p474_p9)  ;;  %s1958_s30 = smov (!%p474_p9), 16  }
  0x19   : > { %v1609_v39 = vld [vmem:[%s2345_s9] ss:$0 sm:$0xff] (!%p474_p9) }
  0x1a   : > { %v1839_v7 = vld [vmem:[%s2366_s4] sm:$0xff] (!%p474_p9)   ;;  %v1840_v9 = vld [vmem:[%s2366_s4 + $0x8] sm:$0xff] (!%p474_p9)   ;;  %s1959_s4 = smov (!%p474_p9), 24  }
  0x1b   : > { %s2096_s18 = scalar_select %p526_p10, %s2067_s25, 1  ;;  %1684 = vmatpush3.bf16.msra.mxu0 %v1839_v7  ;;  %1694 = vmatpush3.bf16.msra.mxu1 %v1844_v25  ;;  %v1851_v60 = vld [vmem:[%s2348_s12] sm:$0xff]  }
  0x1c   : > { %1685 = vmatprep.subr.bf16.mxu0 %v1951_v8  ;;  %1695 = vmatprep.subr.bf16.mxu1 %v1951_v8  ;;  %v1603_v61 = vld [vmem:[%s2343_s7] ss:$0 sm:$0xff] }
  0x1d   : > { %s1594_s19 = sshll.u32 %s2096_s18, 3  ;;  %v1614_v62 = vld [vmem:[%s2347_s11] ss:$0 sm:$0xff]  ;;  %s523_s18 = sand.u32 1, %s1941_s22  }
  0x1e   : > { %s529_s29 = scalar_lea.vmem %s2365_s28, %s1594_s19  ;;  %s533_s17 = scalar_lea.vmem %s2337_s1, %s1594_s19 }
  0x1f   : > { %v2104_v0 = vld [vmem:[%s529_s29] sm:$0xff]  ;;  %1686 = vmatpush3.bf16.msra.mxu0 %v1840_v9  ;;  %1696 = vmatpush3.bf16.msra.mxu1 %v1845_v26  ;;  %s1593_s19 = sshll.u32 %s523_s18, 3  ;;  %s1640_s28 = sshll.u32 %s2067_s25, 7 }
  0x20   : > { %v547_v1 = vsel %vm546_vm0, %v2104_v0, 0.0  ;;  %1703 = vmatprep.subr.bf16.mxu0 %v1951_v8  ;;  %v536_v21 = vld [vmem:[%s533_s17] sm:$0xff]  ;;  %1697 = vmatprep.subr.bf16.mxu1 %v1951_v8  ;;  %s1956_s17 = smov 64   ;;  %s525_s29 = scalar_lea.vmem [#allocation2], %s1593_s19 }
  0x21   : > { %548 = vadd.xlane.f32.xlu0 %v547_v1  ;;  %v537_v23 = vpack.c.bf16 %v536_v21, %v536_v21  ;;  %v1852_v1 = vld [vmem:[%s2348_s12 + $0x8] sm:$0xff]   ;;  %s1960_s25 = smov [#allocation2]  }
  0x23   : > { %1698 = vmatpush3.bf16.msra.mxu1 %v1847_v28 }
  0x24   : > { %1723 = vmatprep.subr.bf16.mxu1 %v1951_v8 }
  0xae   : > { %v549_v2 = vpop.xlane.xlu0 %548 }
  0xaf   : > { %v551_v3 = vmul.f32 0.03125, %v549_v2 }
  0xb1   : > { %v552_v4 = vsub.f32 %v2104_v0, %v551_v3 }
  0xb3   : > { %v553_v5 = vmul.f32 %v552_v4, %v552_v4 }
  0xb5   : > { %v554_v6 = vsel %vm546_vm0, %v553_v5, 0.0 }
  0xb6   : > { %555 = vadd.xlane.f32.xlu0 %v554_v6 }
 0x143   : > { %v556_v10 = vpop.xlane.xlu0 %555 }
 0x144   : > { %v557_v11 = vmul.f32 0.03125, %v556_v10  ;;  %v1853_v10 = vld [vmem:[%s2348_s12 + $0x10] sm:$0xff]  }
 0x146   : > { %v558_v12 = vadd.f32 1e-05, %v557_v11 }
 0x148   : > { %1857 = vrsqrt.f32 %v558_v12 }
 0x152   : > { %v1858_v13 = vpop.eup %1857 }
 0x153   : > { %v560_v15 = vmul.f32 %v1858_v13, %v552_v4  ;;  %v1854_v13 = vld [vmem:[%s2348_s12 + $0x18] sm:$0xff]  }
 0x155   : > { %v567_v17 = vmul.f32 %v1596_v14, %v560_v15 }
 0x157   : > { %v574_v18 = vadd.f32 %v1597_v16, %v567_v17 }
 0x159   : > { %v575_v20 = vpack.c.bf16 %v574_v18, %v574_v18 }
 0x15b   : > { %1688 = vmatmul.mubr.msk.bf16.vlgmr.msra.gmra.mrb[0].mxu0 %vm546_vm0, %v575_v20 }
 0x15c   : > { %1704 = vmatpush3.bf16.msra.mxu0 %v1841_v19  ;;  %1707 = vmatprep.mubr.msk.bf16.mxu0 %vm1952_vm1, %v1951_v8 }
 0x15d   : > { %1705 = vmatprep.subr.bf16.mxu0 %v1951_v8 }
 0x160   : > { %1706 = vmatpush3.bf16.msra.mxu0 %v1842_v22 }
 0x161   : > { %1711 = vmatprep.subr.bf16.mxu0 %v1951_v8 }
 0x163   : > { %1708 = vmatmul.mubr.msk.bf16.vlgmr.msra.gmra.mrb[4].mxu0 %vm546_vm0, %v537_v23 }
 0x164   : > { %1719 = vmatprep.mubr.msk.bf16.mxu0 %vm1952_vm1, %v1951_v8  ;;  %1712 = vmatpush3.bf16.msra.mxu0 %v1846_v27 }
 0x165   : > { %1713 = vmatprep.subr.bf16.mxu0 %v1951_v8 }
 0x168   : > { %1714 = vmatpush3.bf16.msra.mxu0 %v1848_v29 }
 0x169   : > { %1715 = vmatprep.subr.bf16.mxu0 %v1951_v8 }
 0x16c   : > { %1716 = vmatpush3.bf16.msra.mxu0 %v1849_v30 }
 0x16d   : > { %1717 = vmatprep.subr.bf16.mxu0 %v1951_v8 }
 0x170   : > { %1718 = vmatpush3.bf16.msra.mxu0 %v1850_v31 }
 0x171   : > { %1735 = vmatprep.subr.bf16.mxu0 %v1951_v8 }
 0x22e   : > { %v635_v33 = vpop.f32.mrb[0].mxu0 }
 0x22f   : > { %v636_v34 = vadd.f32 %v1598_v32, %v635_v33  ;;  %v1689_v35 = vpop.f32.mrb[1].mxu0 }
 0x230   : > { %v638_v36 = vpop.f32.mrb[2].mxu0 }
 0x231   : > { %v1602_v37 = vmul.f32 -1.442695, %v636_v34  ;;  %v1690_v38 = vpop.f32.mrb[3].mxu0 }
 0x232   : > { %v1620_v38 = vld [vmem:[%s2349_s13] ss:$0 sm:$0xff] }
 0x233   : > { %1859 = vpow2.f32 %v1602_v37 }
 0x236   : > { %v791_v40 = vpop.f32.mrb[4].mxu0 }
 0x237   : > { %v792_v41 = vadd.f32 %v1609_v39, %v791_v40  ;;  %v1709_v42 = vpop.f32.mrb[5].mxu0 }
 0x238   : > { %v794_v43 = vpop.f32.mrb[6].mxu0 }
 0x239   : > { %v1613_v44 = vmul.f32 -1.442695, %v792_v41  ;;  %v1710_v45 = vpop.f32.mrb[7].mxu0 }
 0x23b   : > { %1861 = vpow2.f32 %v1613_v44 }
 0x23d   : > { %v1860_v46 = vpop.eup %1859 }
 0x23e   : > { %v644_v47 = vadd.f32 1.0, %v1860_v46 }
 0x240   : > { %1863 = vrcp.f32 %v644_v47 }
 0x245   : > { %v1862_v48 = vpop.eup %1861 }
 0x246   : > { %v800_v49 = vadd.f32 1.0, %v1862_v48 }
 0x248   : > { %1865 = vrcp.f32 %v800_v49 }
 0x24a   : > { %v1864_v50 = vpop.eup %1863 }
 0x24b   : > { %v647_v51 = vmul.f32 %v1864_v50, %v636_v34 }
 0x24d   : > { %v648_v52 = vpack.c.bf16 %v647_v51, %v647_v51 }
 0x24f   : > { %1700 = vmatmul.mubr.msk.bf16.vlgmr.msra.gmra.mrb[0].mxu1 %vm687_vm2, %v648_v52 }
 0x250   : > { %1731 = vmatprep.mubr.msk.bf16.mxu1 %vm1952_vm1, %v1951_v8  ;;  %1724 = vmatpush3.bf16.msra.mxu1 %v1851_v60 }
 0x251   : > { %1725 = vmatprep.subr.bf16.mxu1 %v1951_v8 }
 0x252   : > { %v1866_v53 = vpop.eup %1865 }
 0x253   : > { %v803_v54 = vmul.f32 %v1866_v53, %v792_v41 }
 0x254   : > { %1726 = vmatpush3.bf16.msra.mxu1 %v1852_v1 }
 0x255   : > { %v804_v55 = vpack.c.bf16 %v803_v54, %v803_v54  ;;  %1727 = vmatprep.subr.bf16.mxu1 %v1951_v8 }
 0x257   : > { %1720 = vmatmul.mubr.msk.bf16.vlgmr.msra.gmra.mrb[8].mxu0 %vm687_vm2, %v804_v55 }
 0x258   : > { %1737 = vmatprep.mubr.msk.bf16.mxu0 %vm1952_vm1, %v1951_v8  ;;  %1728 = vmatpush3.bf16.msra.mxu1 %v1853_v10 }
 0x259   : > { %1729 = vmatprep.subr.bf16.mxu1 %v1951_v8 }
 0x25c   : > { %1730 = vmatpush3.bf16.msra.mxu1 %v1854_v13 }
 0x25d   : > { %1741 = vmatprep.subr.bf16.mxu1 %v1951_v8 }
 0x322   : > { %v725_v56 = vpop.f32.mrb[0].mxu1 }
 0x323   : > { %v1701_v57 = vpop.f32.mrb[1].mxu1  ;;  %v726_v63 = vadd.f32 %v1603_v61, %v725_v56 }
 0x324   : > { %v728_v58 = vpop.f32.mrb[2].mxu1 }
 0x325   : > { %v1702_v59 = vpop.f32.mrb[3].mxu1  ;;  %v731_v6 = vmul.f32 0.35355338, %v726_v63 }
 0x327   : > { %v970_v12 = vpack.c.bf16 %v731_v6, %v731_v6 }
 0x32a   : > { %v880_v2 = vpop.f32.mrb[8].mxu0 }
 0x32b   : > { %v881_v3 = vadd.f32 %v1614_v62, %v880_v2  ;;  %v1721_v4 = vpop.f32.mrb[9].mxu0 }
 0x32c   : > { %v883_v5 = vpop.f32.mrb[10].mxu0 }
 0x32d   : > { %v971_v7 = vpack.c.bf16 %v881_v3, %v881_v3  ;;  %v1722_v9 = vpop.f32.mrb[11].mxu0 }
 0x32f   : > { %1194 = vrot.lane.b32.xlu0 %v971_v7, %s1953_s26  ;;  %1083 = vrot.lane.b32.xlu1 %v971_v7, %s1954_s23  ;;  %v978_v11 = vsel %vm973_vm3, %v971_v7, 0 }
 0x330   : > { %1736 = vmatpush3.bf16.xpose.msra.mxu0 %v978_v11 }
 0x331   : > { %1747 = vmatprep.subr.bf16.mxu0 %v1951_v8 }
 0x333   : > { %1080 = vrot.lane.b32.xlu1 %v970_v12, %s1954_s23 }
 0x337   : > { %1192 = vrot.lane.b32.xlu1 %v970_v12, %s1953_s26  ;;  %1738 = vmatmul.mubr.msk.bf16.vlgmr.msra.gmra.mrb[12].mxu0 %vm973_vm3, %v970_v12 }
 0x338   : > { %1749 = vmatprep.mubr.msk.bf16.mxu0 %vm1952_vm1, %v1951_v8 }
 0x33b   : > { %1304 = vrot.lane.b32.xlu1 %v971_v7, %s1955_s27 }
 0x33f   : > { %1302 = vrot.lane.b32.xlu1 %v970_v12, %s1955_s27 }
 0x343   : > { %901 = vrot.lane.b32.xlu1 %v804_v55, %s1956_s17  ;;  %s1891_s17 = sshll.u32 %s1960_s25, 4  ;;  %s1892_s17 = int_to_ptr.vmem [resolvable:$false] %s1891_s17 }
 0x344   : > { %s1893_s19 = scalar_lea.vmem %s1892_s17, 256 }
 0x3a1   : > { %v1084_v14 = vpop.permute.xlu1 %1083  ;;  %v1195_v17 = vpop.permute.xlu0 %1194 }
 0x3a2   : > { %v1089_v15 = vsel %vm973_vm3, %v1084_v14, 0  ;;  %v1200_v19 = vsel %vm973_vm3, %v1195_v17, 0 }
 0x3a3   : > { %1748 = vmatpush3.bf16.xpose.msra.mxu0 %v1089_v15 }
 0x3a4   : > { %1759 = vmatprep.subr.bf16.mxu0 %v1951_v8 }
 0x3a5   : > { %v1081_v16 = vpop.permute.xlu1 %1080 }
 0x3a9   : > { %v1193_v18 = vpop.permute.xlu1 %1192 }
 0x3aa   : > { %1750 = vmatmul.mubr.msk.bf16.vlgmr.msra.gmra.mrb[16].mxu0 %vm973_vm3, %v1081_v16 }
 0x3ab   : > { %1760 = vmatpush3.bf16.xpose.msra.mxu0 %v1200_v19  ;;  %1761 = vmatprep.mubr.msk.bf16.mxu0 %vm1952_vm1, %v1951_v8 }
 0x3ac   : > { %1771 = vmatprep.subr.bf16.mxu0 %v1951_v8 }
 0x3ad   : > { %v1305_v20 = vpop.permute.xlu1 %1304 }
 0x3ae   : > { %v1310_v22 = vsel %vm973_vm3, %v1305_v20, 0 }
 0x3b1   : > { %v1303_v21 = vpop.permute.xlu1 %1302 }
 0x3b2   : > { %1762 = vmatmul.mubr.msk.bf16.vlgmr.msra.gmra.mrb[20].mxu0 %vm973_vm3, %v1193_v18 }
 0x3b3   : > { %1772 = vmatpush3.bf16.xpose.msra.mxu0 %v1310_v22  ;;  %1773 = vmatprep.mubr.msk.bf16.mxu0 %vm1952_vm1, %v1951_v8 }
 0x3b4   : > { %1783 = vmatprep.subr.bf16.mxu0 %v1951_v8 }
 0x3b5   : > { %v902_v23 = vpop.permute.xlu1 %901 }
 0x3b6   : > { %1732 = vmatmul.mubr.msk.bf16.vlgmr.msra.gmra.mrb[4].mxu1 %vm687_vm2, %v902_v23 }
 0x3b7   : > { %1743 = vmatprep.mubr.msk.bf16.mxu1 %vm1952_vm1, %v1951_v8 }
 0x3ba   : > { %1774 = vmatmul.mubr.msk.bf16.vlgmr.msra.gmra.mrb[24].mxu0 %vm973_vm3, %v1303_v21 }
 0x3bb   : > { %1787 = vmatprep.mubr.msk.bf16.mxu0 %vm1952_vm1, %v1951_v8 }
 0x40a   : > { %v1014_v24 = vpop.f32.mrb[12].mxu0 }
 0x40b   : > { %v1739_v25 = vpop.f32.mrb[13].mxu0  ;;  %v1020_v26 = vsel %vm973_vm3, %v1014_v24, -inf }
 0x40c   : > { %1021 = vmax.xlane.f32.xlu1 %v1020_v26  ;;  %v1017_v27 = vpop.f32.mrb[14].mxu0 }
 0x40d   : > { %v1740_v28 = vpop.f32.mrb[15].mxu0 }
 0x47d   : > { %v1125_v29 = vpop.f32.mrb[16].mxu0 }
 0x47e   : > { %v1751_v30 = vpop.f32.mrb[17].mxu0  ;;  %v1131_v31 = vsel %vm973_vm3, %v1125_v29, -inf }
 0x47f   : > { %1132 = vmax.xlane.f32.xlu0 %v1131_v31  ;;  %v1128_v32 = vpop.f32.mrb[18].mxu0 }
 0x480   : > { %v1752_v33 = vpop.f32.mrb[19].mxu0 }
 0x485   : > { %v1236_v34 = vpop.f32.mrb[20].mxu0 }
 0x486   : > { %v1763_v35 = vpop.f32.mrb[21].mxu0  ;;  %v1242_v36 = vsel %vm973_vm3, %v1236_v34, -inf }
 0x487   : > { %1243 = vmax.xlane.f32.xlu1 %v1242_v36  ;;  %v1239_v37 = vpop.f32.mrb[22].mxu0  ;;  %v1855_v36 = vld [vmem:[%s2350_s14] sm:$0xff]  }
 0x488   : > { %v1764_v39 = vpop.f32.mrb[23].mxu0  ;;  %1784 = vmatpush3.bf16.msra.mxu0 %v1855_v36 }
 0x489   : > { %v964_v40 = vpop.f32.mrb[4].mxu1  ;;  %1785 = vmatprep.subr.bf16.mxu0 %v1951_v8 }
 0x48a   : > { %v965_v41 = vadd.f32 %v1620_v38, %v964_v40  ;;  %v1733_v42 = vpop.f32.mrb[5].mxu1 }
 0x48b   : > { %v967_v43 = vpop.f32.mrb[6].mxu1 }
 0x48c   : > { %v972_v44 = vpack.c.bf16 %v965_v41, %v965_v41  ;;  %v1734_v45 = vpop.f32.mrb[7].mxu1  ;;  %v1856_v41 = vld [vmem:[%s2350_s14 + $0x8] sm:$0xff]  }
 0x48d   : > { %v1346_v46 = vpop.f32.mrb[24].mxu0  ;;  %1786 = vmatpush3.bf16.msra.mxu0 %v1856_v41 }
 0x48e   : > { %v1775_v47 = vpop.f32.mrb[25].mxu0  ;;  %v1037_v48 = vsel %vm1035_vm4, %v972_v44, 0  ;;  %v1352_v49 = vsel %vm973_vm3, %v1346_v46, -inf }
 0x48f   : > { %1742 = vmatpush3.bf16.msra.mxu1 %v1037_v48  ;;  %1353 = vmax.xlane.f32.xlu0 %v1352_v49  ;;  %v1349_v50 = vpop.f32.mrb[26].mxu0 }
 0x490   : > { %v1776_v51 = vpop.f32.mrb[27].mxu0  ;;  %1753 = vmatprep.subr.bf16.mxu1 %v1951_v8 }
 0x499   : > { %v1022_v52 = vpop.xlane.xlu1 %1021 }
 0x49a   : > { %v1023_v53 = vsub.f32 %v1014_v24, %v1022_v52 }
 0x49c   : > { %v1024_v54 = vmul.f32 1.442695, %v1023_v53 }
 0x49e   : > { %1867 = vpow2.f32 %v1024_v54 }
 0x4a8   : > { %v1868_v55 = vpop.eup %1867 }
 0x4a9   : > { %v1026_v56 = vsel %vm973_vm3, %v1868_v55, 0.0 }
 0x4aa   : > { %1027 = vadd.xlane.f32.xlu1 %v1026_v56  ;;  %v1634_v56 = vld [vmem:[%s2351_s15] ss:$0 sm:$0xff] }
 0x4bb   : > { %1144 = vrot.lane.b32.xlu1 %v972_v44, %s1954_s23 }
 0x50c   : > { %v1133_v57 = vpop.xlane.xlu0 %1132 }
 0x50d   : > { %v1134_v58 = vsub.f32 %v1125_v29, %v1133_v57 }
 0x50f   : > { %v1135_v59 = vmul.f32 1.442695, %v1134_v58 }
 0x511   : > { %1869 = vpow2.f32 %v1135_v59 }
 0x514   : > { %v1244_v60 = vpop.xlane.xlu1 %1243 }
 0x515   : > { %v1245_v61 = vsub.f32 %v1236_v34, %v1244_v60 }
 0x517   : > { %v1246_v62 = vmul.f32 1.442695, %v1245_v61 }
 0x519   : > { %1871 = vpow2.f32 %v1246_v62 }
 0x51b   : > { %v1870_v63 = vpop.eup %1869 }
 0x51c   : > { %v1354_v1 = vpop.xlane.xlu0 %1353  ;;  %v1137_v2 = vsel %vm973_vm3, %v1870_v63, 0.0 }
 0x51d   : > { %v1355_v3 = vsub.f32 %v1346_v46, %v1354_v1  ;;  %1138 = vadd.xlane.f32.xlu0 %v1137_v2 }
 0x51f   : > { %v1356_v4 = vmul.f32 1.442695, %v1355_v3 }
 0x521   : > { %1873 = vpow2.f32 %v1356_v4 }
 0x523   : > { %v1872_v5 = vpop.eup %1871 }
 0x524   : > { %v1248_v6 = vsel %vm973_vm3, %v1872_v5, 0.0 }
 0x525   : > { %1249 = vadd.xlane.f32.xlu1 %v1248_v6 }
 0x52b   : > { %v1874_v7 = vpop.eup %1873 }
 0x52c   : > { %v1358_v9 = vsel %vm973_vm3, %v1874_v7, 0.0 }
 0x52d   : > { %1359 = vadd.xlane.f32.xlu0 %v1358_v9 }
 0x536   : > { %1364 = vrot.lane.b32.xlu1 %v972_v44, %s1955_s27 }
 0x537   : > { %v1028_v10 = vpop.xlane.xlu1 %1027 }
 0x538   : > { %1875 = vrcp.f32 %v1028_v10 }
 0x53b   : > { %v1145_v13 = vpop.permute.xlu1 %1144 }
 0x53c   : > { %v1150_v15 = vsel %vm1035_vm4, %v1145_v13, 0 }
 0x542   : > { %v1876_v11 = vpop.eup %1875 }
 0x543   : > { %v1030_v12 = vmul.f32 %v1876_v11, %v1868_v55  ;;  %1254 = vrot.lane.b32.xlu0 %v972_v44, %s1953_s26 }
 0x545   : > { %v1031_v14 = vpack.c.bf16 %v1030_v12, %v1030_v12 }
 0x547   : > { %1744 = vmatmul.mubr.msk.bf16.vlgmr.msra.gmra.mrb[8].mxu1 %vm973_vm3, %v1031_v14 }
 0x548   : > { %1754 = vmatpush3.bf16.msra.mxu1 %v1150_v15  ;;  %1755 = vmatprep.mubr.msk.bf16.mxu1 %vm1952_vm1, %v1951_v8 }
 0x549   : > { %1765 = vmatprep.subr.bf16.mxu1 %v1951_v8 }
 0x5aa   : > { %v1139_v16 = vpop.xlane.xlu0 %1138 }
 0x5ab   : > { %1877 = vrcp.f32 %v1139_v16 }
 0x5b2   : > { %v1250_v17 = vpop.xlane.xlu1 %1249 }
 0x5b3   : > { %1879 = vrcp.f32 %v1250_v17 }
 0x5b5   : > { %v1878_v18 = vpop.eup %1877 }
 0x5b6   : > { %v1141_v19 = vmul.f32 %v1878_v18, %v1870_v63  ;;  %v1365_v26 = vpop.permute.xlu1 %1364 }
 0x5b7   : > { %v1370_v28 = vsel %vm1035_vm4, %v1365_v26, 0 }
 0x5b8   : > { %v1142_v20 = vpack.c.bf16 %v1141_v19, %v1141_v19 }
 0x5ba   : > { %1756 = vmatmul.mubr.msk.bf16.vlgmr.msra.gmra.mrb[12].mxu1 %vm973_vm3, %v1142_v20  ;;  %v1360_v21 = vpop.xlane.xlu0 %1359 }
 0x5bb   : > { %1881 = vrcp.f32 %v1360_v21  ;;  %1767 = vmatprep.mubr.msk.bf16.mxu1 %vm1952_vm1, %v1951_v8 }
 0x5bd   : > { %v1880_v22 = vpop.eup %1879 }
 0x5be   : > { %v1252_v23 = vmul.f32 %v1880_v22, %v1872_v5  ;;  %v1255_v24 = vpop.permute.xlu0 %1254 }
 0x5bf   : > { %v1260_v25 = vsel %vm1035_vm4, %v1255_v24, 0 }
 0x5c0   : > { %1766 = vmatpush3.bf16.msra.mxu1 %v1260_v25  ;;  %v1253_v27 = vpack.c.bf16 %v1252_v23, %v1252_v23 }
 0x5c1   : > { %1777 = vmatprep.subr.bf16.mxu1 %v1951_v8 }
 0x5c3   : > { %1768 = vmatmul.mubr.msk.bf16.vlgmr.msra.gmra.mrb[16].mxu1 %vm973_vm3, %v1253_v27 }
 0x5c4   : > { %1778 = vmatpush3.bf16.msra.mxu1 %v1370_v28  ;;  %1779 = vmatprep.mubr.msk.bf16.mxu1 %vm1952_vm1, %v1951_v8 }
 0x5c5   : > { %v1882_v29 = vpop.eup %1881 }
 0x5c6   : > { %v1362_v30 = vmul.f32 %v1882_v29, %v1874_v7 }
 0x5c8   : > { %v1363_v31 = vpack.c.bf16 %v1362_v30, %v1362_v30 }
 0x5cb   : > { %1780 = vmatmul.mubr.msk.bf16.vlgmr.msra.gmra.mrb[20].mxu1 %vm973_vm3, %v1363_v31 }
 0x61a   : > { %v1073_v32 = vpop.f32.mrb[8].mxu1 }
 0x61b   : > { %v1745_v33 = vpop.f32.mrb[9].mxu1 }
 0x61c   : > { %v1076_v34 = vpop.f32.mrb[10].mxu1 }
 0x61d   : > { %v1746_v35 = vpop.f32.mrb[11].mxu1 }
 0x68d   : > { %v1186_v37 = vpop.f32.mrb[12].mxu1 }
 0x68e   : > { %1413 = vrot.lane.b32.xlu1 %v1186_v37, %s1957_s20  ;;  %v1757_v38 = vpop.f32.mrb[13].mxu1  ;;  %s1518_s20 = sshll.u32 %s525_s29, 4  ;;  %s2295_s20 = int_to_ptr.vmem [resolvable:$true] %s1518_s20 }
 0x68f   : > { %v1189_v39 = vpop.f32.mrb[14].mxu1  ;;  %s1887_s27 = scalar_lea.vmem %s2295_s20, 128  ;;  %p1894_p0 = scmp.lt.s32.totalorder %s2295_s20, %s1892_s17 }
 0x690   : > { %v1758_v40 = vpop.f32.mrb[15].mxu1  ;;  %p1888_p11 = scmp.ne.s32.totalorder %s2295_s20, %s1887_s27  ;;  %p1895_p1 = scmp.lt.s32.totalorder %s1893_s19, %s1887_s27 }
 0x692   : > { %p1889_p12 = pnand %p1888_p11, %p2084_p5  ;;  %p1896_p2 = por %p1895_p1, %p1894_p0 }
 0x694   : > { %p1890_p13 = pneg %p1889_p12 }
 0x696   : > { %v1296_v42 = vpop.f32.mrb[16].mxu1  ;;  %p1897_p3 = pnand %p1896_p2, %p1890_p13 }
 0x697   : > { %1417 = vrot.lane.b32.xlu0 %v1296_v42, %s1958_s30  ;;  %v1769_v43 = vpop.f32.mrb[17].mxu1  ;;  %s2293_s30 = scalar_lea.hbm %s2352_s16, %s1640_s28 }
 0x698   : > { %v1299_v44 = vpop.f32.mrb[18].mxu1 }
 0x699   : > { %v1770_v45 = vpop.f32.mrb[19].mxu1 }
 0x69e   : > { %v1406_v46 = vpop.f32.mrb[20].mxu1 }
 0x69f   : > { %1421 = vrot.lane.b32.xlu1 %v1406_v46, %s1959_s4  ;;  %v1781_v8 = vpop.f32.mrb[21].mxu1  ;;  %s1505_s4 = scalar_lea.sflag [#allocation3], %s523_s18 }
 0x6a0   : > { %v1409_v47 = vpop.f32.mrb[22].mxu1 }
 0x6a1   : > { %v1782_v48 = vpop.f32.mrb[23].mxu1 }
 0x700   : > { %v1414_v49 = vpop.permute.xlu1 %1413 }
 0x701   : > { %v1424_v51 = vsel %vm973_vm3, %v1073_v32, %v1414_v49 }
 0x709   : > { %v1418_v50 = vpop.permute.xlu0 %1417 }
 0x70a   : > { %v1426_v52 = vsel %vm1425_vm5, %v1424_v51, %v1418_v50 }
 0x711   : > { %v1422_v53 = vpop.permute.xlu1 %1421 }
 0x712   : > { %v1428_v54 = vsel %vm1427_vm6, %v1426_v52, %v1422_v53 }
 0x713   : > { %v1429_v55 = vpack.c.bf16 %v1428_v54, %v1428_v54 }
 0x715   : > { %1788 = vmatmul.mubr.msk.bf16.vlgmr.msra.gmra.mrb[28].mxu0 %vm546_vm0, %v1429_v55 }
 0x7e8   : > { %v1489_v57 = vpop.f32.mrb[28].mxu0 }
 0x7e9   : > { %v1490_v58 = vadd.f32 %v1634_v56, %v1489_v57  ;;  %v1789_v59 = vpop.f32.mrb[29].mxu0 }
 0x7ea   : > { %v1492_v60 = vpop.f32.mrb[30].mxu0 }
 0x7eb   : > { %v1495_v61 = vadd.f32 %v1490_v58, %v2104_v0  ;;  %v1790_v62 = vpop.f32.mrb[31].mxu0 }
 0x7ed   : > { %v1638_v63 = vmul.f32 -1.442695, %v1495_v61 }
 0x7ef   : > { %1883 = vpow2.f32 %v1638_v63 }
 0x7f9   : > { %v1884_v1 = vpop.eup %1883 }
 0x7fa   : > { %v1499_v2 = vadd.f32 1.0, %v1884_v1 }
 0x7fc   : > { %1885 = vrcp.f32 %v1499_v2 }
 0x806   : > { %v1886_v3 = vpop.eup %1885 }
 0x807   : > { %v1502_v4 = vmul.f32 %v1886_v3, %v1495_v61 }
 0x809   : > { %1503 = vst.msk [vmem:[%s525_s29] sm:$0xff] %vm546_vm0, %v1502_v4 }
 0x80a   : > { %1900 = shalt.err (!%p1897_p3)
}
 0x80b   : > { %s1901_s18 = scalar_lea.hbm %s2293_s30, 128  ;;  %s1905_s26 = scalar_lea.hbm %s2352_s16, 256 }
 0x80c   : > { %p1902_p4 = scmp.ne.s32.totalorder %s2293_s30, %s1901_s18  ;;  %p1906_p9 = scmp.lt.u32.totalorder %s2293_s30, %s2352_s16 }
 0x80d   : > { %p1907_p10 = scmp.lt.u32.totalorder %s1905_s26, %s1901_s18  ;;  %p1909_p12 = scmp.lt.u32.totalorder %s1901_s18, %s2293_s30 }
 0x80e   : > { %p1903_p7 = pnand %p1902_p4, %p2084_p5 }
 0x80f   : > { %p1908_p11 = por %p1907_p10, %p1906_p9 }
 0x810   : > { %p1904_p8 = pneg %p1903_p7 }
 0x811   : > { %p1910_p13 = por %p1909_p12, %p1908_p11 }
 0x813   : > { %p1911_p0 = pnand %p1910_p13, %p1904_p8 }
 0x815   : > { %1914 = shalt.err (!%p1911_p0)
}
 0x816   : > { %1791 = dma.vmem_to_hbm [thread:$0]  (%p2084_p5), %s2295_s20, 128, %s2293_s30, %s1505_s4  }
 0x817 PF: > { %p1797_p1 = scmp.ge.s32.totalorder %s1949_s24, 2  ;;  %s1530_s17 = sand.u32 1, %s1937_s21  }
 0x818   : > { %s1531_s19 = scalar_lea.sflag [#allocation3], %s1530_s17 }
 0x819   : > { %p1794_p2 = pnand %p1797_p1, %p2088_p6 }
 0x81b   : > { %1932 = dma.done.wait (!%p1794_p2), %s1531_s19, 128  }
 0x81c   : > { %1934 = vsyncadd (!%p1794_p2), %s1531_s19, 4294967168  ;;  %s2368_s24 = sld [smem:[#allocation6_spill]]  ;;  %s2369_s18 = sld [smem:[#allocation5_spill]] }
 0x81d   : > { %s2370_s23 = sld [smem:[#allocation7_spill]]  ;;  %s2371_s21 = smov %s1941_s22 }
 0x822   : > { %p26_p3 = scmp.ge.s32.totalorder %s2368_s24, 4   ;;  %s2372_s22 = smov %s2369_s18 }
 0x824   :  { %28 = sbr.rel (!%p26_p3) target bundleno = 6 (0x6), region = 122 }
 0x82b   :  { %1536 = vsyncpa [#allocation3], 1 }
 0x82c   :  { %1538 = vsyncpa [#allocation3 + $0x1], 1 }

// kernel: tpu_custom_call.1
= control target key start
LH: loop header
LB: loop body
LE: loop exit
PB: predicated region body
PF: predicated region fallthrough
CT: control target
= control target key end

     0   :  { %s2488_s0 = inlined_call_operand.vmem [shape: f32[2,8,32], index: 0, kind: input, shape index: {}]   ;;  %s2489_s1 = inlined_call_operand.vmem [shape: f32[2,8,32], index: 1, kind: input, shape index: {}]   ;;  %s2490_s2 = inlined_call_operand.vmem [shape: f32[1,32], index: 2, kind: input, shape index: {}]   ;;  %s2491_s3 = inlined_call_operand.vmem [shape: f32[1,32], index: 3, kind: input, shape index: {}]   ;;  %s2492_s4 = inlined_call_operand.vmem [shape: bf16[32,64], index: 4, kind: input, shape index: {}]   ;;  %s2493_s5 = inlined_call_operand.vmem [shape: f32[1,64], index: 5, kind: input, shape index: {}]   ;;  %s2494_s6 = inlined_call_operand.vmem [shape: bf16[64,32], index: 6, kind: input, shape index: {}]   ;;  %s2495_s7 = inlined_call_operand.vmem [shape: f32[1,32], index: 7, kind: input, shape index: {}]   ;;  %s2496_s8 = inlined_call_operand.vmem [shape: bf16[32,128], index: 8, kind: input, shape index: {}]   ;;  %s2497_s9 = inlined_call_operand.vmem [shape: f32[1,128], index: 9, kind: input, shape index: {}]   ;;  %s2498_s10 = inlined_call_operand.vmem [shape: bf16[64,32], index: 10, kind: input, shape index: {}]   ;;  %s2499_s11 = inlined_call_operand.vmem [shape: f32[1,32], index: 11, kind: input, shape index: {}]   ;;  %s2500_s12 = inlined_call_operand.vmem [shape: bf16[64,32], index: 12, kind: input, shape index: {}]   ;;  %s2501_s13 = inlined_call_operand.vmem [shape: f32[1,32], index: 13, kind: input, shape index: {}]   ;;  %s2502_s14 = inlined_call_operand.vmem [shape: bf16[32,32], index: 14, kind: input, shape index: {}]   ;;  %s2503_s15 = inlined_call_operand.vmem [shape: f32[1,32], index: 15, kind: input, shape index: {}]   ;;  %s2504_s16 = inlined_call_operand.hbm [shape: f32[2,8,32], index: 16, kind: output, shape index: {}]  }
   0x1   :  { %2509 = sst [smem:[#allocation9_spill]] %s2488_s0 }
   0x2   :  { %2510 = sst [smem:[#allocation10_spill]] %s2492_s4 }
   0x3   :  { %21 = vsyncpa [#allocation3], 0 }
   0x4   :  { %23 = vsyncpa [#allocation3 + $0x1], 0  ;;  %s2178_s21 = smov 0   ;;  %s2180_s22 = smov 0  }
   0x5   :  { %s2182_s23 = smov 0   ;;  %s2184_s24 = smov 0  }
   0x6 LB: > { %2511 = sst [smem:[#allocation5_spill]] %s2080_s23  ;;  %s2199_s25 = sadd.s32 4294967295, %s2084_s24   ;;  %s2084_s24 = sphi %s2184_s24, %s2520_s24   ;;  %s2080_s23 = sphi %s2182_s23, %s2522_s23   ;;  %s2076_s22 = sphi %s2180_s22, %s2524_s22   ;;  %s2072_s21 = sphi %s2178_s21, %s2523_s21  }
   0x7   : > { %s1707_s26 = sadd.s32 4294967294, %s2084_s24   ;;  %s2203_s27 = sadd.s32 1, %s2084_s24  }
   0x8   : > { %2512 = sst [smem:[#allocation6_spill]] %s2203_s27  ;;  %s382_s28 = sadd.s32 1, %s2080_s23 }
   0x9   : > { %s379_s29 = ssub.s32 %s2084_s24, %s2203_s27  ;;  %p392_p0 = scmp.ne.s32.totalorder %s2080_s23, %s2076_s22 }
   0xa   : > { %p380_p1 = scmp.eq.s32.totalorder %s379_s29, 0  ;;  %p393_p2 = scmp.eq.s32.totalorder %s2199_s25, 1 }
   0xb   : > { %p398_p3 = scmp.ne.s32.totalorder %s2076_s22, %s2072_s21  ;;  %p399_p4 = scmp.eq.s32.totalorder %s1707_s26, 1 }
   0xc   : > { %s2214_s30 = scalar_select %p380_p1, %s2080_s23, %s382_s28  }
   0xd   : > { %p2216_p5 = por %p393_p2, %p392_p0  ;;  %p2220_p6 = por %p399_p4, %p398_p3 }
   0xe   : > { %2513 = sst [smem:[#allocation7_spill]] %s2214_s30  ;;  %p1710_p7 = scmp.ge.s32.totalorder %s2084_s24, 1 }
   0xf   : > { %s2515_s17 = scalar_select %p2220_p6, 1, 0 }
  0x10   : > { %p473_p8 = scmp.lt.s32.totalorder %s2084_s24, 3 }
  0x11   : > { %2516 = sst [smem:[#allocation8_spill]] %s2515_s17 }
  0x12   : > { %p474_p9 = pnand %p1710_p7, %p473_p8 }
  0x13   : > { %p526_p10 = scmp.lt.s32.totalorder (!%p474_p9), %s2199_s25, 1  ;;  %vm546_vm0 = vcmask (!%p474_p9), 261120   ;;  %s2517_s28 = sld [smem:[#allocation9_spill]] (!%p474_p9)  ;;  %v2086_v8 = vmov (!%p474_p9), 0.0   ;;  %vm2087_vm1 = vmmov (!%p474_p9), 0   ;;  %v1978_v19 = vld [vmem:[%s2496_s8] sm:$0xff] (!%p474_p9)  }
  0x14   : > { %477 = sbr.rel (%p474_p9) target bundleno = 1957 (0x7a5), region = 84  ;;  %s2518_s4 = sld [smem:[#allocation10_spill]] (!%p474_p9)  ;;  %1807 = vmatprep.subr.bf16.mxu0 (!%p474_p9), %v2086_v8  ;;  %1811 = vmatprep.mubr.msk.bf16.mxu0 (!%p474_p9), %vm2087_vm1, %v2086_v8  ;;  %v1714_v14 = vld [vmem:[%s2490_s2] ss:$0 sm:$0xff] (!%p474_p9)  ;;  %v1979_v22 = vld [vmem:[%s2496_s8 + $0x8] sm:$0xff] (!%p474_p9)   ;;  %v1982_v26 = vld [vmem:[%s2494_s6 + $0x10] sm:$0xff] (!%p474_p9)  }
  0x15   : > { %1815 = vmatprep.subr.bf16.mxu1 (!%p474_p9), %v2086_v8  ;;  %1823 = vmatprep.mubr.msk.bf16.mxu1 (!%p474_p9), %vm2087_vm1, %v2086_v8  ;;  %v1715_v16 = vld [vmem:[%s2491_s3] ss:$0 sm:$0xff] (!%p474_p9)  ;;  %v1981_v25 = vld [vmem:[%s2494_s6 + $0x8] sm:$0xff] (!%p474_p9)   ;;  %v1984_v28 = vld [vmem:[%s2494_s6 + $0x18] sm:$0xff] (!%p474_p9)   ;;  %vm687_vm2 = vcmask (!%p474_p9), 523264   ;;  %vm973_vm3 = vcmask (!%p474_p9), 64512  }
  0x16   : > { %v1980_v24 = vld [vmem:[%s2494_s6] sm:$0xff] (!%p474_p9)   ;;  %v1985_v29 = vld [vmem:[%s2498_s10 + $0x8] sm:$0xff] (!%p474_p9)   ;;  %v1986_v30 = vld [vmem:[%s2498_s10 + $0x10] sm:$0xff] (!%p474_p9)   ;;  %s2088_s26 = smov (!%p474_p9), 112   ;;  %s2089_s23 = smov (!%p474_p9), 120   ;;  %vm1035_vm4 = vcmask (!%p474_p9), 1043456  }
  0x17   : > { %1816 = vmatpush3.bf16.msra.mxu1 (!%p474_p9), %v1980_v24  ;;  %v1983_v27 = vld [vmem:[%s2498_s10] sm:$0xff] (!%p474_p9)   ;;  %v1987_v31 = vld [vmem:[%s2498_s10 + $0x18] sm:$0xff] (!%p474_p9)   ;;  %s2090_s27 = smov (!%p474_p9), 104  }
  0x18   : > { %1817 = vmatprep.subr.bf16.mxu1 (!%p474_p9), %v2086_v8  ;;  %v1716_v32 = vld [vmem:[%s2493_s5] ss:$0 sm:$0xff] (!%p474_p9) }
  0x19   : > { %v1727_v39 = vld [vmem:[%s2497_s9] ss:$0 sm:$0xff] (!%p474_p9) }
  0x1a   : > { %v1976_v7 = vld [vmem:[%s2518_s4] sm:$0xff] (!%p474_p9)   ;;  %v1977_v9 = vld [vmem:[%s2518_s4 + $0x8] sm:$0xff] (!%p474_p9)  }
  0x1b   : > { %s2228_s18 = scalar_select %p526_p10, %s2199_s25, 1  ;;  %1808 = vmatpush3.bf16.msra.mxu0 %v1976_v7  ;;  %1818 = vmatpush3.bf16.msra.mxu1 %v1981_v25  ;;  %v1988_v60 = vld [vmem:[%s2500_s12] sm:$0xff]  }
  0x1c   : > { %1809 = vmatprep.subr.bf16.mxu0 %v2086_v8  ;;  %1819 = vmatprep.subr.bf16.mxu1 %v2086_v8  ;;  %v1721_v61 = vld [vmem:[%s2495_s7] ss:$0 sm:$0xff] }
  0x1d   : > { %s1712_s19 = sshll.u32 %s2228_s18, 3  ;;  %v1732_v62 = vld [vmem:[%s2499_s11] ss:$0 sm:$0xff] }
  0x1e   : > { %s529_s29 = scalar_lea.vmem %s2517_s28, %s1712_s19  ;;  %s533_s17 = scalar_lea.vmem %s2489_s1, %s1712_s19 }
  0x1f   : > { %v2236_v0 = vld [vmem:[%s529_s29] sm:$0xff]  ;;  %1810 = vmatpush3.bf16.msra.mxu0 %v1977_v9  ;;  %1820 = vmatpush3.bf16.msra.mxu1 %v1982_v26  ;;  %s523_s19 = sand.u32 1, %s2076_s22   ;;  %s1759_s29 = sshll.u32 %s2199_s25, 7 }
  0x20   : > { %v547_v1 = vsel %vm546_vm0, %v2236_v0, 0.0  ;;  %1827 = vmatprep.subr.bf16.mxu0 %v2086_v8  ;;  %v536_v21 = vld [vmem:[%s533_s17] sm:$0xff]  ;;  %1821 = vmatprep.subr.bf16.mxu1 %v2086_v8  ;;  %s2091_s17 = smov 64   ;;  %s1711_s28 = sshll.u32 %s523_s19, 3 }
  0x21   : > { %548 = vadd.xlane.f32.xlu0 %v547_v1  ;;  %v537_v23 = vpack.c.bf16 %v536_v21, %v536_v21  ;;  %v1989_v1 = vld [vmem:[%s2500_s12 + $0x8] sm:$0xff]   ;;  %s525_s20 = scalar_lea.vmem [#allocation2], %s1711_s28  ;;  %s2445_s4 = scalar_lea.hbm %s2504_s16, %s1759_s29 }
  0x22   : > { %s2092_s25 = smov [#allocation2]  }
  0x23   : > { %1822 = vmatpush3.bf16.msra.mxu1 %v1984_v28  ;;  %s2026_s18 = sshll.u32 %s2092_s25, 4  ;;  %s2027_s18 = int_to_ptr.vmem [resolvable:$false] %s2026_s18 }
  0x24   : > { %1847 = vmatprep.subr.bf16.mxu1 %v2086_v8  ;;  %s2028_s28 = scalar_lea.vmem %s2027_s18, 256 }
  0xae   : > { %v549_v2 = vpop.xlane.xlu0 %548 }
  0xaf   : > { %v551_v3 = vmul.f32 0.03125, %v549_v2 }
  0xb1   : > { %v552_v4 = vsub.f32 %v2236_v0, %v551_v3 }
  0xb3   : > { %v553_v5 = vmul.f32 %v552_v4, %v552_v4 }
  0xb5   : > { %v554_v6 = vsel %vm546_vm0, %v553_v5, 0.0 }
  0xb6   : > { %555 = vadd.xlane.f32.xlu0 %v554_v6 }
 0x143   : > { %v556_v10 = vpop.xlane.xlu0 %555 }
 0x144   : > { %v557_v11 = vmul.f32 0.03125, %v556_v10  ;;  %v1990_v10 = vld [vmem:[%s2500_s12 + $0x10] sm:$0xff]  }
 0x146   : > { %v558_v12 = vadd.f32 1e-05, %v557_v11 }
 0x148   : > { %1992 = vrsqrt.f32 %v558_v12 }
 0x152   : > { %v1993_v13 = vpop.eup %1992 }
 0x153   : > { %v560_v15 = vmul.f32 %v1993_v13, %v552_v4  ;;  %v1991_v13 = vld [vmem:[%s2500_s12 + $0x18] sm:$0xff]  }
 0x155   : > { %v567_v17 = vmul.f32 %v1714_v14, %v560_v15 }
 0x157   : > { %v574_v18 = vadd.f32 %v1715_v16, %v567_v17 }
 0x159   : > { %v575_v20 = vpack.c.bf16 %v574_v18, %v574_v18 }
 0x15b   : > { %1812 = vmatmul.mubr.msk.bf16.vlgmr.msra.gmra.mrb[0].mxu0 %vm546_vm0, %v575_v20 }
 0x15c   : > { %1828 = vmatpush3.bf16.msra.mxu0 %v1978_v19  ;;  %1831 = vmatprep.mubr.msk.bf16.mxu0 %vm2087_vm1, %v2086_v8 }
 0x15d   : > { %1829 = vmatprep.subr.bf16.mxu0 %v2086_v8 }
 0x160   : > { %1830 = vmatpush3.bf16.msra.mxu0 %v1979_v22 }
 0x161   : > { %1835 = vmatprep.subr.bf16.mxu0 %v2086_v8 }
 0x163   : > { %1832 = vmatmul.mubr.msk.bf16.vlgmr.msra.gmra.mrb[4].mxu0 %vm546_vm0, %v537_v23 }
 0x164   : > { %1843 = vmatprep.mubr.msk.bf16.mxu0 %vm2087_vm1, %v2086_v8  ;;  %1836 = vmatpush3.bf16.msra.mxu0 %v1983_v27 }
 0x165   : > { %1837 = vmatprep.subr.bf16.mxu0 %v2086_v8 }
 0x168   : > { %1838 = vmatpush3.bf16.msra.mxu0 %v1985_v29 }
 0x169   : > { %1839 = vmatprep.subr.bf16.mxu0 %v2086_v8 }
 0x16c   : > { %1840 = vmatpush3.bf16.msra.mxu0 %v1986_v30 }
 0x16d   : > { %1841 = vmatprep.subr.bf16.mxu0 %v2086_v8 }
 0x170   : > { %1842 = vmatpush3.bf16.msra.mxu0 %v1987_v31 }
 0x171   : > { %1859 = vmatprep.subr.bf16.mxu0 %v2086_v8 }
 0x22e   : > { %v635_v33 = vpop.f32.mrb[0].mxu0 }
 0x22f   : > { %v636_v34 = vadd.f32 %v1716_v32, %v635_v33  ;;  %v1813_v35 = vpop.f32.mrb[1].mxu0 }
 0x230   : > { %v638_v36 = vpop.f32.mrb[2].mxu0 }
 0x231   : > { %v1720_v37 = vmul.f32 -1.442695, %v636_v34  ;;  %v1814_v38 = vpop.f32.mrb[3].mxu0 }
 0x232   : > { %v1738_v38 = vld [vmem:[%s2501_s13] ss:$0 sm:$0xff] }
 0x233   : > { %1994 = vpow2.f32 %v1720_v37 }
 0x236   : > { %v791_v40 = vpop.f32.mrb[4].mxu0 }
 0x237   : > { %v792_v41 = vadd.f32 %v1727_v39, %v791_v40  ;;  %v1833_v42 = vpop.f32.mrb[5].mxu0 }
 0x238   : > { %v794_v43 = vpop.f32.mrb[6].mxu0 }
 0x239   : > { %v1731_v44 = vmul.f32 -1.442695, %v792_v41  ;;  %v1834_v45 = vpop.f32.mrb[7].mxu0 }
 0x23b   : > { %1996 = vpow2.f32 %v1731_v44 }
 0x23d   : > { %v1995_v46 = vpop.eup %1994 }
 0x23e   : > { %v644_v47 = vadd.f32 1.0, %v1995_v46 }
 0x240   : > { %1998 = vrcp.f32 %v644_v47 }
 0x245   : > { %v1997_v48 = vpop.eup %1996 }
 0x246   : > { %v800_v49 = vadd.f32 1.0, %v1997_v48 }
 0x248   : > { %2000 = vrcp.f32 %v800_v49 }
 0x24a   : > { %v1999_v50 = vpop.eup %1998 }
 0x24b   : > { %v647_v51 = vmul.f32 %v1999_v50, %v636_v34 }
 0x24d   : > { %v648_v52 = vpack.c.bf16 %v647_v51, %v647_v51 }
 0x24f   : > { %1824 = vmatmul.mubr.msk.bf16.vlgmr.msra.gmra.mrb[0].mxu1 %vm687_vm2, %v648_v52 }
 0x250   : > { %1855 = vmatprep.mubr.msk.bf16.mxu1 %vm2087_vm1, %v2086_v8  ;;  %1848 = vmatpush3.bf16.msra.mxu1 %v1988_v60 }
 0x251   : > { %1849 = vmatprep.subr.bf16.mxu1 %v2086_v8 }
 0x252   : > { %v2001_v53 = vpop.eup %2000 }
 0x253   : > { %v803_v54 = vmul.f32 %v2001_v53, %v792_v41 }
 0x254   : > { %1850 = vmatpush3.bf16.msra.mxu1 %v1989_v1 }
 0x255   : > { %v804_v55 = vpack.c.bf16 %v803_v54, %v803_v54  ;;  %1851 = vmatprep.subr.bf16.mxu1 %v2086_v8 }
 0x257   : > { %1844 = vmatmul.mubr.msk.bf16.vlgmr.msra.gmra.mrb[8].mxu0 %vm687_vm2, %v804_v55 }
 0x258   : > { %1861 = vmatprep.mubr.msk.bf16.mxu0 %vm2087_vm1, %v2086_v8  ;;  %1852 = vmatpush3.bf16.msra.mxu1 %v1990_v10 }
 0x259   : > { %1853 = vmatprep.subr.bf16.mxu1 %v2086_v8 }
 0x25c   : > { %1854 = vmatpush3.bf16.msra.mxu1 %v1991_v13 }
 0x25d   : > { %1865 = vmatprep.subr.bf16.mxu1 %v2086_v8 }
 0x322   : > { %v725_v56 = vpop.f32.mrb[0].mxu1 }
 0x323   : > { %v1825_v57 = vpop.f32.mrb[1].mxu1  ;;  %v726_v63 = vadd.f32 %v1721_v61, %v725_v56 }
 0x324   : > { %v728_v58 = vpop.f32.mrb[2].mxu1 }
 0x325   : > { %v1826_v59 = vpop.f32.mrb[3].mxu1  ;;  %v731_v6 = vmul.f32 0.35355338, %v726_v63 }
 0x327   : > { %v970_v12 = vpack.c.bf16 %v731_v6, %v731_v6 }
 0x32a   : > { %v880_v2 = vpop.f32.mrb[8].mxu0 }
 0x32b   : > { %v881_v3 = vadd.f32 %v1732_v62, %v880_v2  ;;  %v1845_v4 = vpop.f32.mrb[9].mxu0 }
 0x32c   : > { %v883_v5 = vpop.f32.mrb[10].mxu0 }
 0x32d   : > { %v971_v7 = vpack.c.bf16 %v881_v3, %v881_v3  ;;  %v1846_v9 = vpop.f32.mrb[11].mxu0 }
 0x32f   : > { %1194 = vrot.lane.b32.xlu0 %v971_v7, %s2088_s26  ;;  %1083 = vrot.lane.b32.xlu1 %v971_v7, %s2089_s23  ;;  %v978_v11 = vsel %vm973_vm3, %v971_v7, 0 }
 0x330   : > { %1860 = vmatpush3.bf16.xpose.msra.mxu0 %v978_v11 }
 0x331   : > { %1871 = vmatprep.subr.bf16.mxu0 %v2086_v8 }
 0x333   : > { %1080 = vrot.lane.b32.xlu1 %v970_v12, %s2089_s23 }
 0x337   : > { %1192 = vrot.lane.b32.xlu1 %v970_v12, %s2088_s26  ;;  %1862 = vmatmul.mubr.msk.bf16.vlgmr.msra.gmra.mrb[12].mxu0 %vm973_vm3, %v970_v12 }
 0x338   : > { %1873 = vmatprep.mubr.msk.bf16.mxu0 %vm2087_vm1, %v2086_v8 }
 0x33b   : > { %1304 = vrot.lane.b32.xlu1 %v971_v7, %s2090_s27 }
 0x33f   : > { %1302 = vrot.lane.b32.xlu1 %v970_v12, %s2090_s27 }
 0x343   : > { %901 = vrot.lane.b32.xlu1 %v804_v55, %s2091_s17 }
 0x3a1   : > { %v1084_v14 = vpop.permute.xlu1 %1083  ;;  %v1195_v17 = vpop.permute.xlu0 %1194 }
 0x3a2   : > { %v1089_v15 = vsel %vm973_vm3, %v1084_v14, 0  ;;  %v1200_v19 = vsel %vm973_vm3, %v1195_v17, 0 }
 0x3a3   : > { %1872 = vmatpush3.bf16.xpose.msra.mxu0 %v1089_v15 }
 0x3a4   : > { %1883 = vmatprep.subr.bf16.mxu0 %v2086_v8 }
 0x3a5   : > { %v1081_v16 = vpop.permute.xlu1 %1080 }
 0x3a9   : > { %v1193_v18 = vpop.permute.xlu1 %1192 }
 0x3aa   : > { %1874 = vmatmul.mubr.msk.bf16.vlgmr.msra.gmra.mrb[16].mxu0 %vm973_vm3, %v1081_v16 }
 0x3ab   : > { %1884 = vmatpush3.bf16.xpose.msra.mxu0 %v1200_v19  ;;  %1885 = vmatprep.mubr.msk.bf16.mxu0 %vm2087_vm1, %v2086_v8 }
 0x3ac   : > { %1895 = vmatprep.subr.bf16.mxu0 %v2086_v8 }
 0x3ad   : > { %v1305_v20 = vpop.permute.xlu1 %1304 }
 0x3ae   : > { %v1310_v22 = vsel %vm973_vm3, %v1305_v20, 0 }
 0x3b1   : > { %v1303_v21 = vpop.permute.xlu1 %1302 }
 0x3b2   : > { %1886 = vmatmul.mubr.msk.bf16.vlgmr.msra.gmra.mrb[20].mxu0 %vm973_vm3, %v1193_v18 }
 0x3b3   : > { %1896 = vmatpush3.bf16.xpose.msra.mxu0 %v1310_v22  ;;  %1897 = vmatprep.mubr.msk.bf16.mxu0 %vm2087_vm1, %v2086_v8 }
 0x3b4   : > { %1907 = vmatprep.subr.bf16.mxu0 %v2086_v8 }
 0x3b5   : > { %v902_v23 = vpop.permute.xlu1 %901 }
 0x3b6   : > { %1856 = vmatmul.mubr.msk.bf16.vlgmr.msra.gmra.mrb[4].mxu1 %vm687_vm2, %v902_v23 }
 0x3b7   : > { %1867 = vmatprep.mubr.msk.bf16.mxu1 %vm2087_vm1, %v2086_v8 }
 0x3ba   : > { %1898 = vmatmul.mubr.msk.bf16.vlgmr.msra.gmra.mrb[24].mxu0 %vm973_vm3, %v1303_v21 }
 0x3bb   : > { %1909 = vmatprep.mubr.msk.bf16.mxu0 %vm2087_vm1, %v2086_v8 }
 0x40a   : > { %v1014_v24 = vpop.f32.mrb[12].mxu0 }
 0x40b   : > { %v1863_v25 = vpop.f32.mrb[13].mxu0  ;;  %v1020_v26 = vsel %vm973_vm3, %v1014_v24, -inf }
 0x40c   : > { %1021 = vmax.xlane.f32.xlu1 %v1020_v26  ;;  %v1017_v27 = vpop.f32.mrb[14].mxu0 }
 0x40d   : > { %v1864_v28 = vpop.f32.mrb[15].mxu0 }
 0x47d   : > { %v1125_v29 = vpop.f32.mrb[16].mxu0 }
 0x47e   : > { %v1875_v30 = vpop.f32.mrb[17].mxu0  ;;  %v1131_v31 = vsel %vm973_vm3, %v1125_v29, -inf }
 0x47f   : > { %1132 = vmax.xlane.f32.xlu0 %v1131_v31  ;;  %v1128_v32 = vpop.f32.mrb[18].mxu0  ;;  %v1413_v31 = vld [vmem:[%s2502_s14] sm:$0xf] }
 0x480   : > { %v1876_v33 = vpop.f32.mrb[19].mxu0 }
 0x481   : > { %v1466_v33 = vsel %vm1035_vm4, %v1413_v31, 0 }
 0x485   : > { %v1236_v34 = vpop.f32.mrb[20].mxu0 }
 0x486   : > { %v1887_v35 = vpop.f32.mrb[21].mxu0  ;;  %v1242_v36 = vsel %vm973_vm3, %v1236_v34, -inf }
 0x487   : > { %1243 = vmax.xlane.f32.xlu1 %v1242_v36  ;;  %v1239_v37 = vpop.f32.mrb[22].mxu0 }
 0x488   : > { %v1888_v39 = vpop.f32.mrb[23].mxu0 }
 0x489   : > { %v964_v40 = vpop.f32.mrb[4].mxu1 }
 0x48a   : > { %v965_v41 = vadd.f32 %v1738_v38, %v964_v40  ;;  %v1857_v42 = vpop.f32.mrb[5].mxu1 }
 0x48b   : > { %v967_v43 = vpop.f32.mrb[6].mxu1 }
 0x48c   : > { %v972_v44 = vpack.c.bf16 %v965_v41, %v965_v41  ;;  %v1858_v45 = vpop.f32.mrb[7].mxu1  ;;  %v1558_v41 = vld [vmem:[%s2502_s14 + $0xc] sm:$0xf]  ;;  %v1509_v43 = vld [vmem:[%s2502_s14 + $0x8] sm:$0xf] }
 0x48d   : > { %v1346_v46 = vpop.f32.mrb[24].mxu0  ;;  %v1563_v42 = vsel %vm1035_vm4, %v1558_v41, 0 }
 0x48e   : > { %v1899_v47 = vpop.f32.mrb[25].mxu0  ;;  %v1037_v48 = vsel %vm1035_vm4, %v972_v44, 0  ;;  %v1352_v49 = vsel %vm973_vm3, %v1346_v46, -inf }
 0x48f   : > { %1866 = vmatpush3.bf16.msra.mxu1 %v1037_v48  ;;  %1353 = vmax.xlane.f32.xlu0 %v1352_v49  ;;  %v1349_v50 = vpop.f32.mrb[26].mxu0  ;;  %v1514_v47 = vsel %vm1035_vm4, %v1509_v43, 0 }
 0x490   : > { %v1900_v51 = vpop.f32.mrb[27].mxu0  ;;  %1877 = vmatprep.subr.bf16.mxu1 %v2086_v8 }
 0x499   : > { %v1022_v52 = vpop.xlane.xlu1 %1021 }
 0x49a   : > { %v1023_v53 = vsub.f32 %v1014_v24, %v1022_v52 }
 0x49c   : > { %v1024_v54 = vmul.f32 1.442695, %v1023_v53 }
 0x49e   : > { %2002 = vpow2.f32 %v1024_v54 }
 0x4a8   : > { %v2003_v55 = vpop.eup %2002 }
 0x4a9   : > { %v1026_v56 = vsel %vm973_vm3, %v2003_v55, 0.0 }
 0x4aa   : > { %1027 = vadd.xlane.f32.xlu1 %v1026_v56 }
 0x4bb   : > { %1144 = vrot.lane.b32.xlu1 %v972_v44, %s2089_s23 }
 0x50c   : > { %v1133_v57 = vpop.xlane.xlu0 %1132 }
 0x50d   : > { %v1134_v58 = vsub.f32 %v1125_v29, %v1133_v57 }
 0x50f   : > { %v1135_v59 = vmul.f32 1.442695, %v1134_v58 }
 0x511   : > { %2004 = vpow2.f32 %v1135_v59 }
 0x514   : > { %v1244_v60 = vpop.xlane.xlu1 %1243 }
 0x515   : > { %v1245_v61 = vsub.f32 %v1236_v34, %v1244_v60  ;;  %v1415_v34 = vld [vmem:[%s2502_s14 + $0x4] sm:$0xf] }
 0x516   : > { %v1420_v35 = vsel %vm1035_vm4, %v1415_v34, 0 }
 0x517   : > { %v1246_v62 = vmul.f32 1.442695, %v1245_v61  ;;  %1908 = vmatpush3.bf16.msra.mxu0 %v1420_v35 }
 0x518   : > { %1919 = vmatprep.subr.bf16.mxu0 %v2086_v8 }
 0x519   : > { %2006 = vpow2.f32 %v1246_v62 }
 0x51b   : > { %v2005_v63 = vpop.eup %2004 }
 0x51c   : > { %v1354_v1 = vpop.xlane.xlu0 %1353  ;;  %v1137_v2 = vsel %vm973_vm3, %v2005_v63, 0.0 }
 0x51d   : > { %v1355_v3 = vsub.f32 %v1346_v46, %v1354_v1  ;;  %1138 = vadd.xlane.f32.xlu0 %v1137_v2 }
 0x51f   : > { %v1356_v4 = vmul.f32 1.442695, %v1355_v3 }
 0x521   : > { %2008 = vpow2.f32 %v1356_v4 }
 0x523   : > { %v2007_v5 = vpop.eup %2006 }
 0x524   : > { %v1248_v6 = vsel %vm973_vm3, %v2007_v5, 0.0 }
 0x525   : > { %1249 = vadd.xlane.f32.xlu1 %v1248_v6 }
 0x52b   : > { %v2009_v7 = vpop.eup %2008 }
 0x52c   : > { %v1358_v9 = vsel %vm973_vm3, %v2009_v7, 0.0 }
 0x52d   : > { %1359 = vadd.xlane.f32.xlu0 %v1358_v9 }
 0x536   : > { %1364 = vrot.lane.b32.xlu1 %v972_v44, %s2090_s27  ;;  %s1623_s27 = scalar_lea.sflag [#allocation3], %s523_s19 }
 0x537   : > { %v1028_v10 = vpop.xlane.xlu1 %1027 }
 0x538   : > { %2010 = vrcp.f32 %v1028_v10 }
 0x53b   : > { %v1145_v13 = vpop.permute.xlu1 %1144 }
 0x53c   : > { %v1150_v15 = vsel %vm1035_vm4, %v1145_v13, 0 }
 0x542   : > { %v2011_v11 = vpop.eup %2010 }
 0x543   : > { %v1030_v12 = vmul.f32 %v2011_v11, %v2003_v55  ;;  %1254 = vrot.lane.b32.xlu0 %v972_v44, %s2088_s26  ;;  %v1756_v11 = vld [vmem:[%s2503_s15] ss:$0 sm:$0xff]  ;;  %s1636_s26 = sshll.u32 %s525_s20, 4  ;;  %s2447_s26 = int_to_ptr.vmem [resolvable:$true] %s1636_s26 }
 0x544   : > { %s2022_s17 = scalar_lea.vmem %s2447_s26, 128  ;;  %p2029_p0 = scmp.lt.s32.totalorder %s2447_s26, %s2027_s18 }
 0x545   : > { %v1031_v14 = vpack.c.bf16 %v1030_v12, %v1030_v12  ;;  %p2023_p11 = scmp.ne.s32.totalorder %s2447_s26, %s2022_s17  ;;  %p2030_p1 = scmp.lt.s32.totalorder %s2028_s28, %s2022_s17 }
 0x547   : > { %1868 = vmatmul.mubr.msk.bf16.vlgmr.msra.gmra.mrb[8].mxu1 %vm973_vm3, %v1031_v14  ;;  %p2024_p12 = pnand %p2023_p11, %p2216_p5  ;;  %p2031_p2 = por %p2030_p1, %p2029_p0 }
 0x548   : > { %1878 = vmatpush3.bf16.msra.mxu1 %v1150_v15  ;;  %1879 = vmatprep.mubr.msk.bf16.mxu1 %vm2087_vm1, %v2086_v8 }
 0x549   : > { %1889 = vmatprep.subr.bf16.mxu1 %v2086_v8  ;;  %p2025_p13 = pneg %p2024_p12 }
 0x54b   : > { %p2032_p3 = pnand %p2031_p2, %p2025_p13 }
 0x5aa   : > { %v1139_v16 = vpop.xlane.xlu0 %1138 }
 0x5ab   : > { %2012 = vrcp.f32 %v1139_v16 }
 0x5b2   : > { %v1250_v17 = vpop.xlane.xlu1 %1249 }
 0x5b3   : > { %2014 = vrcp.f32 %v1250_v17 }
 0x5b5   : > { %v2013_v18 = vpop.eup %2012 }
 0x5b6   : > { %v1141_v19 = vmul.f32 %v2013_v18, %v2005_v63  ;;  %v1365_v26 = vpop.permute.xlu1 %1364 }
 0x5b7   : > { %v1370_v28 = vsel %vm1035_vm4, %v1365_v26, 0 }
 0x5b8   : > { %v1142_v20 = vpack.c.bf16 %v1141_v19, %v1141_v19 }
 0x5ba   : > { %1880 = vmatmul.mubr.msk.bf16.vlgmr.msra.gmra.mrb[12].mxu1 %vm973_vm3, %v1142_v20  ;;  %v1360_v21 = vpop.xlane.xlu0 %1359 }
 0x5bb   : > { %2016 = vrcp.f32 %v1360_v21  ;;  %1891 = vmatprep.mubr.msk.bf16.mxu1 %vm2087_vm1, %v2086_v8 }
 0x5bd   : > { %v2015_v22 = vpop.eup %2014 }
 0x5be   : > { %v1252_v23 = vmul.f32 %v2015_v22, %v2007_v5  ;;  %v1255_v24 = vpop.permute.xlu0 %1254 }
 0x5bf   : > { %v1260_v25 = vsel %vm1035_vm4, %v1255_v24, 0 }
 0x5c0   : > { %1890 = vmatpush3.bf16.msra.mxu1 %v1260_v25  ;;  %v1253_v27 = vpack.c.bf16 %v1252_v23, %v1252_v23 }
 0x5c1   : > { %1901 = vmatprep.subr.bf16.mxu1 %v2086_v8 }
 0x5c3   : > { %1892 = vmatmul.mubr.msk.bf16.vlgmr.msra.gmra.mrb[16].mxu1 %vm973_vm3, %v1253_v27 }
 0x5c4   : > { %1902 = vmatpush3.bf16.msra.mxu1 %v1370_v28  ;;  %1903 = vmatprep.mubr.msk.bf16.mxu1 %vm2087_vm1, %v2086_v8 }
 0x5c5   : > { %v2017_v29 = vpop.eup %2016  ;;  %1913 = vmatprep.subr.bf16.mxu1 %v2086_v8 }
 0x5c6   : > { %v1362_v30 = vmul.f32 %v2017_v29, %v2009_v7 }
 0x5c8   : > { %v1363_v32 = vpack.c.bf16 %v1362_v30, %v1362_v30 }
 0x5cb   : > { %1904 = vmatmul.mubr.msk.bf16.vlgmr.msra.gmra.mrb[20].mxu1 %vm973_vm3, %v1363_v32 }
 0x5cc   : > { %1914 = vmatpush3.bf16.msra.mxu1 %v1466_v33  ;;  %1915 = vmatprep.mubr.msk.bf16.mxu1 %vm2087_vm1, %v2086_v8 }
 0x5cd   : > { %1925 = vmatprep.subr.bf16.mxu1 %v2086_v8 }
 0x61a   : > { %v1073_v36 = vpop.f32.mrb[8].mxu1 }
 0x61b   : > { %v1412_v37 = vpack.c.bf16 %v1073_v36, %v1073_v36  ;;  %v1869_v38 = vpop.f32.mrb[9].mxu1 }
 0x61c   : > { %v1076_v39 = vpop.f32.mrb[10].mxu1 }
 0x61d   : > { %v1870_v40 = vpop.f32.mrb[11].mxu1  ;;  %1916 = vmatmul.mubr.msk.bf16.vlgmr.msra.gmra.mrb[24].mxu1 %vm973_vm3, %v1412_v37 }
 0x61e   : > { %1927 = vmatprep.mubr.msk.bf16.mxu1 %vm2087_vm1, %v2086_v8  ;;  %1926 = vmatpush3.bf16.msra.mxu1 %v1563_v42 }
 0x68d   : > { %v1186_v44 = vpop.f32.mrb[12].mxu1 }
 0x68e   : > { %v1414_v45 = vpack.c.bf16 %v1186_v44, %v1186_v44  ;;  %v1881_v46 = vpop.f32.mrb[13].mxu1 }
 0x68f   : > { %v1189_v48 = vpop.f32.mrb[14].mxu1 }
 0x690   : > { %v1882_v49 = vpop.f32.mrb[15].mxu1  ;;  %1910 = vmatmul.mubr.msk.bf16.vlgmr.msra.gmra.mrb[28].mxu0 %vm973_vm3, %v1414_v45 }
 0x691   : > { %1920 = vmatpush3.bf16.msra.mxu0 %v1514_v47  ;;  %1921 = vmatprep.mubr.msk.bf16.mxu0 %vm2087_vm1, %v2086_v8 }
 0x696   : > { %v1296_v50 = vpop.f32.mrb[16].mxu1 }
 0x697   : > { %v1508_v51 = vpack.c.bf16 %v1296_v50, %v1296_v50  ;;  %v1893_v52 = vpop.f32.mrb[17].mxu1 }
 0x698   : > { %v1299_v53 = vpop.f32.mrb[18].mxu1 }
 0x699   : > { %v1894_v54 = vpop.f32.mrb[19].mxu1  ;;  %1922 = vmatmul.mubr.msk.bf16.vlgmr.msra.gmra.mrb[32].mxu0 %vm973_vm3, %v1508_v51 }
 0x69e   : > { %v1406_v55 = vpop.f32.mrb[20].mxu1 }
 0x69f   : > { %v1557_v56 = vpack.c.bf16 %v1406_v55, %v1406_v55  ;;  %v1905_v57 = vpop.f32.mrb[21].mxu1 }
 0x6a0   : > { %v1409_v58 = vpop.f32.mrb[22].mxu1 }
 0x6a1   : > { %v1906_v59 = vpop.f32.mrb[23].mxu1  ;;  %1928 = vmatmul.mubr.msk.bf16.vlgmr.msra.gmra.mrb[28].mxu1 %vm973_vm3, %v1557_v56 }
 0x6f0   : > { %v1502_v60 = vpop.f32.mrb[24].mxu1 }
 0x6f1   : > { %v1917_v61 = vpop.f32.mrb[25].mxu1 }
 0x6f2   : > { %v1505_v62 = vpop.f32.mrb[26].mxu1 }
 0x6f3   : > { %v1918_v63 = vpop.f32.mrb[27].mxu1 }
 0x763   : > { %v1456_v1 = vpop.f32.mrb[28].mxu0 }
 0x764   : > { %v1503_v8 = vadd.f32 %v1502_v60, %v1456_v1  ;;  %v1911_v2 = vpop.f32.mrb[29].mxu0 }
 0x765   : > { %v1459_v3 = vpop.f32.mrb[30].mxu0 }
 0x766   : > { %v1912_v4 = vpop.f32.mrb[31].mxu0 }
 0x76c   : > { %v1550_v5 = vpop.f32.mrb[32].mxu0 }
 0x76d   : > { %v1556_v6 = vadd.f32 %v1550_v5, %v1503_v8  ;;  %v1923_v7 = vpop.f32.mrb[33].mxu0 }
 0x76e   : > { %v1553_v9 = vpop.f32.mrb[34].mxu0 }
 0x76f   : > { %v1924_v10 = vpop.f32.mrb[35].mxu0 }
 0x774   : > { %v1599_v12 = vpop.f32.mrb[28].mxu1 }
 0x775   : > { %v1605_v13 = vadd.f32 %v1599_v12, %v1556_v6  ;;  %v1929_v14 = vpop.f32.mrb[29].mxu1 }
 0x776   : > { %v1602_v15 = vpop.f32.mrb[30].mxu1 }
 0x777   : > { %v1612_v16 = vadd.f32 %v1756_v11, %v1605_v13  ;;  %v1930_v17 = vpop.f32.mrb[31].mxu1 }
 0x779   : > { %v1613_v18 = vadd.f32 %v1612_v16, %v2236_v0 }
 0x77b   : > { %v1757_v19 = vmul.f32 -1.442695, %v1613_v18 }
 0x77d   : > { %2018 = vpow2.f32 %v1757_v19 }
 0x787   : > { %v2019_v20 = vpop.eup %2018 }
 0x788   : > { %v1617_v21 = vadd.f32 1.0, %v2019_v20 }
 0x78a   : > { %2020 = vrcp.f32 %v1617_v21 }
 0x794   : > { %v2021_v22 = vpop.eup %2020 }
 0x795   : > { %v1620_v23 = vmul.f32 %v2021_v22, %v1613_v18 }
 0x797   : > { %1621 = vst.msk [vmem:[%s525_s20] sm:$0xff] %vm546_vm0, %v1620_v23 }
 0x798   : > { %2035 = shalt.err (!%p2032_p3)
}
 0x799   : > { %s2036_s19 = scalar_lea.hbm %s2445_s4, 128  ;;  %s2040_s23 = scalar_lea.hbm %s2504_s16, 256 }
 0x79a   : > { %p2037_p4 = scmp.ne.s32.totalorder %s2445_s4, %s2036_s19  ;;  %p2041_p9 = scmp.lt.u32.totalorder %s2445_s4, %s2504_s16 }
 0x79b   : > { %p2042_p10 = scmp.lt.u32.totalorder %s2040_s23, %s2036_s19  ;;  %p2044_p12 = scmp.lt.u32.totalorder %s2036_s19, %s2445_s4 }
 0x79c   : > { %p2038_p7 = pnand %p2037_p4, %p2216_p5 }
 0x79d   : > { %p2043_p11 = por %p2042_p10, %p2041_p9 }
 0x79e   : > { %p2039_p8 = pneg %p2038_p7 }
 0x79f   : > { %p2045_p13 = por %p2044_p12, %p2043_p11 }
 0x7a1   : > { %p2046_p0 = pnand %p2045_p13, %p2039_p8 }
 0x7a3   : > { %2049 = shalt.err (!%p2046_p0)
}
 0x7a4   : > { %1931 = dma.vmem_to_hbm [thread:$0]  (%p2216_p5), %s2447_s26, 128, %s2445_s4, %s1623_s27  }
 0x7a5 PF: > { %p1937_p1 = scmp.ge.s32.totalorder %s2084_s24, 2  ;;  %s1648_s18 = sand.u32 1, %s2072_s21  }
 0x7a6   : > { %s1649_s28 = scalar_lea.sflag [#allocation3], %s1648_s18 }
 0x7a7   : > { %p1934_p2 = pnand %p1937_p1, %p2220_p6 }
 0x7a9   : > { %2067 = dma.done.wait (!%p1934_p2), %s1649_s28, 128  }
 0x7aa   : > { %2069 = vsyncadd (!%p1934_p2), %s1649_s28, 4294967168  ;;  %s2520_s24 = sld [smem:[#allocation6_spill]]  ;;  %s2521_s19 = sld [smem:[#allocation5_spill]] }
 0x7ab   : > { %s2522_s23 = sld [smem:[#allocation7_spill]]  ;;  %s2523_s21 = smov %s2076_s22 }
 0x7b0   : > { %p26_p3 = scmp.ge.s32.totalorder %s2520_s24, 4   ;;  %s2524_s22 = smov %s2521_s19 }
 0x7b2   :  { %28 = sbr.rel (!%p26_p3) target bundleno = 6 (0x6), region = 122 }
 0x7b9   :  { %1654 = vsyncpa [#allocation3], 1 }
 0x7ba   :  { %1656 = vsyncpa [#allocation3 + $0x1], 1 }

</bundles_post_ra>
